<compile_context>
chip_gen: v6e
topology: v6e:2x2x1
jax: 0.10.0
libtpu: 0.0.40
codegen_flags: <defaults>
</compile_context>

<pallas_src>
import functools

import jax
import jax.numpy as jnp
from jax.experimental import pallas as pl
from jax.experimental.pallas import tpu as pltpu

# ----------------------------- config (small, MiniLM-like) ----------------------------
VOCAB = 64
HIDDEN = 128
NUM_HEADS = 4
HEAD_DIM = HIDDEN // NUM_HEADS
NUM_LAYERS = 2
FFN_DIM = 256
MAX_SEQ = 8
BATCH = 2
LN_EPS = 1e-12


def _full_spec(shape):
    # whole-array block (grid=()), index_map takes no args
    return pl.BlockSpec(shape, lambda: (0,) * len(shape))


# --------------------------------- in-kernel math helpers ------------------------------
def _erf(x):
    # Abramowitz & Stegun 7.1.26 rational approximation of erf, |error| < 1.5e-7
    # (~f32 epsilon), i.e. exact-erf GELU semantics.  The divide goes to the EUP via
    # pl.reciprocal so it stays off the VALU slot.
    a1, a2, a3, a4, a5 = (0.254829592, -0.284496736, 1.421413741,
                          -1.453152027, 1.061405429)
    p = 0.3275911
    ax = jnp.abs(x)
    t = pl.reciprocal(1.0 + p * ax, approx=True)
    poly = ((((a5 * t + a4) * t + a3) * t + a2) * t + a1) * t
    y = 1.0 - poly * jnp.exp(-ax * ax)
    return jnp.where(x >= 0, y, -y)


def _gelu_exact(x):
    # Matches PyTorch/HF BERT non-approximate GELU: 0.5*x*(1+erf(x/sqrt(2)))
    return 0.5 * x * (1.0 + _erf(x * (2.0 ** -0.5)))


# --------------------------------- fused encoder+pool kernel ---------------------------
def _encoder_pool_kernel(x_ref, mask_ref, bias_ref, emb_g_ref, emb_b_ref,
                         wqkv_ref, bqkv_ref, wo_ref, bo_ref, ln1_g_ref, ln1_b_ref,
                         w1_ref, b1_ref, w2_ref, b2_ref, ln2_g_ref, ln2_b_ref,
                         out_ref, *,
                         num_layers, num_heads, head_dim, batch, seq, hidden, eps):
    def layernorm(v, g, b):
        mu = jnp.mean(v, axis=-1, keepdims=True)
        var = jnp.mean(jnp.square(v - mu), axis=-1, keepdims=True)
        return (v - mu) * jax.lax.rsqrt(var + eps) * g + b

    # ----- embedding LayerNorm (residual-free) -----
    x = layernorm(x_ref[...], emb_g_ref[...], emb_b_ref[...])        # [B*S, H] f32

    attn_bias = bias_ref[...]                                         # [NH*B*S, NH*B*S]
    scale = 1.0 / (head_dim ** 0.5)
    bs = batch * seq                                                  # tokens per pass

    for l in range(num_layers):
        # ----- fused QKV projection: one [B*S,H] @ [H,3H] bf16 matmul, f32 acc -----
        qkv = jnp.dot(x.astype(jnp.bfloat16), wqkv_ref[l],
                      preferred_element_type=jnp.float32) + bqkv_ref[l]     # [B*S, 3H]

        # ----- heads-major re-layout via static slices + sublane concat -----
        # row (h*B*S + b*S + s) holds head h of token (b, s); no VMEM scratch round-trip.
        q_hm = jnp.concatenate(
            [qkv[:, h * head_dim:(h + 1) * head_dim] for h in range(num_heads)], axis=0)
        k_hm = jnp.concatenate(
            [qkv[:, hidden + h * head_dim:hidden + (h + 1) * head_dim]
             for h in range(num_heads)], axis=0)
        v_hm = jnp.concatenate(
            [qkv[:, 2 * hidden + h * head_dim:2 * hidden + (h + 1) * head_dim]
             for h in range(num_heads)], axis=0)

        q_bf = (q_hm * scale).astype(jnp.bfloat16)                    # [NH*B*S, d]
        k_bf = k_hm.astype(jnp.bfloat16)
        v_bf = v_hm.astype(jnp.bfloat16)

        # ----- ALL heads x ALL sequences in one MXU-shaped bf16 matmul -----
        # Cross-head / cross-sequence / padded-key entries are masked by attn_bias.
        s = jax.lax.dot_general(q_bf, k_bf, (((1,), (1,)), ((), ())),
                                preferred_element_type=jnp.float32)   # [NHBS, NHBS]
        s = s + attn_bias
        m = jnp.max(s, axis=-1, keepdims=True)
        p = jnp.exp(s - m)
        row_sum = jnp.sum(p, axis=-1, keepdims=True)
        ctx_hm = jnp.dot(p.astype(jnp.bfloat16), v_bf,
                         preferred_element_type=jnp.float32)          # [NHBS, d]
        # deferred softmax normalization: one EUP reciprocal on [NHBS, 1]
        ctx_hm = ctx_hm * pl.reciprocal(row_sum, approx=True)

        # back to token-major [B*S, H]: lane concat of the per-head row blocks
        ctx = jnp.concatenate(
            [ctx_hm[h * bs:(h + 1) * bs, :] for h in range(num_heads)], axis=1)

        # ----- attention output projection + fused add&LayerNorm epilogue -----
        attn = jnp.dot(ctx.astype(jnp.bfloat16), wo_ref[l],
                       preferred_element_type=jnp.float32) + bo_ref[l]
        x = layernorm(attn + x, ln1_g_ref[l], ln1_b_ref[l])

        # ----- FFN with exact-erf GELU + fused add&LayerNorm epilogue -----
        h1 = jnp.dot(x.astype(jnp.bfloat16), w1_ref[l],
                     preferred_element_type=jnp.float32) + b1_ref[l]
        h1 = _gelu_exact(h1)
        h2 = jnp.dot(h1.astype(jnp.bfloat16), w2_ref[l],
                     preferred_element_type=jnp.float32) + b2_ref[l]
        x = layernorm(h2 + x, ln2_g_ref[l], ln2_b_ref[l])

    # ----- masked mean pooling: per-sequence masked sum (no dense pool matrix) -----
    mcol = mask_ref[...]                                              # [B*S, 1]
    rows = []
    for b in range(batch):
        x_b = x[b * seq:(b + 1) * seq, :]                             # [S, H]
        m_b = mcol[b * seq:(b + 1) * seq, :]                          # [S, 1]
        sum_b = jnp.sum(x_b * m_b, axis=0, keepdims=True)             # [1, H]
        den_b = jnp.maximum(jnp.sum(m_b, axis=0, keepdims=True), 1e-9)  # [1, 1]
        rows.append(sum_b * pl.reciprocal(den_b, approx=True))
    out_ref[...] = jnp.concatenate(rows, axis=0).astype(out_ref.dtype)


# --------------------------------- wrapper ----------------------------------------------
def encode_and_pool(params, input_ids, attention_mask):
    B2, S = input_ids.shape
    H, NH, d, F, L = HIDDEN, NUM_HEADS, HEAD_DIM, FFN_DIM, NUM_LAYERS

    # embeddings (gathers/broadcasts are JAX glue; the embedding LN runs in the kernel)
    word = params["word_emb"][input_ids]                   # [B2, S, H]
    pos = params["pos_emb"][:S][None, :, :]                # [1, S, H]
    typ = params["type_emb"][0][None, None, :]             # token_type_ids assumed all-zero
    x0 = (word + pos + typ).reshape(B2 * S, H).astype(jnp.float32)

    mask_f = attention_mask.astype(jnp.float32)            # [B2, S]
    mask_col = mask_f.reshape(B2 * S, 1)                   # pooling mask, one col

    # Additive attention bias for the flattened heads-major score matrix.
    # Row/col index r = h*B2*S + b*S + s.  Entry is 0 where (same head, same sequence,
    # key not padded), else -1e9: this masks padding AND the off-diagonal blocks created
    # by flattening all heads/sequences into a single matmul.
    nhbs = NH * B2 * S
    r = jnp.arange(nhbs)
    h_idx = r // (B2 * S)
    rem = r % (B2 * S)
    b_idx = rem // S
    s_idx = rem % S
    same_block = (h_idx[:, None] == h_idx[None, :]) & (b_idx[:, None] == b_idx[None, :])
    key_ok = mask_f[b_idx, s_idx] > 0.5
    attn_bias = jnp.where(same_block & key_ok[None, :], 0.0, -1e9).astype(jnp.float32)

    kern = functools.partial(
        _encoder_pool_kernel,
        num_layers=L, num_heads=NH, head_dim=d,
        batch=B2, seq=S, hidden=H, eps=LN_EPS)

    args = (x0, mask_col, attn_bias,
            params["emb_ln_g"], params["emb_ln_b"],
            params["wqkv"], params["bqkv"], params["wo"], params["bo"],
            params["ln1_g"], params["ln1_b"],
            params["w1"], params["b1"], params["w2"], params["b2"],
            params["ln2_g"], params["ln2_b"])

    bs = B2 * S
    flops = L * (2 * bs * H * 3 * H          # QKV projection
                 + 4 * nhbs * nhbs * d       # scores + context
                 + 2 * bs * H * H            # output projection
                 + 4 * bs * H * F)           # FFN
    transcendentals = L * (nhbs * nhbs + 2 * bs * F)   # softmax exp + GELU exp/rcp
    bytes_accessed = sum(int(a.size) * a.dtype.itemsize for a in args) + B2 * H * 4

    return pl.pallas_call(
        kern,
        out_shape=jax.ShapeDtypeStruct((B2, H), jnp.float32),
        in_specs=[_full_spec(a.shape) for a in args],
        out_specs=_full_spec((B2, H)),
        compiler_params=pltpu.CompilerParams(vmem_limit_bytes=32 * 1024 * 1024),
        cost_estimate=pl.CostEstimate(flops=flops,
                                      transcendentals=transcendentals,
                                      bytes_accessed=bytes_accessed),
    )(*args)


def siamese_sbert_forward(params, input_ids_anchor, attention_mask_anchor,
                          input_ids_other, attention_mask_other):
    # Stack the siamese twin passes into one batch: weights DMA once, one kernel launch.
    B = input_ids_anchor.shape[0]
    input_ids = jnp.concatenate([input_ids_anchor, input_ids_other], axis=0)
    attention_mask = jnp.concatenate([attention_mask_anchor, attention_mask_other], axis=0)
    pooled = encode_and_pool(params, input_ids, attention_mask)
    return pooled[:B], pooled[B:]


# --------------------------------- params -----------------------------------------------
def make_params(key):
    ks = iter(jax.random.split(key, 7))

    def init(shape, dtype=jnp.float32):
        return (0.02 * jax.random.normal(next(ks), shape, jnp.float32)).astype(dtype)

    ones = lambda s: jnp.ones(s, jnp.float32)
    zeros = lambda s: jnp.zeros(s, jnp.float32)
    L, H, F = NUM_LAYERS, HIDDEN, FFN_DIM
    return {
        "word_emb": init((VOCAB, H)),
        "pos_emb": init((MAX_SEQ, H)),
        "type_emb": init((2, H)),
        "emb_ln_g": ones((1, H)), "emb_ln_b": zeros((1, H)),
        # Per-layer weights stacked on a leading axis; wq/wk/wv fused into one [H, 3H].
        # Matmul weights are bf16 (half DMA bytes, MXU-native); biases/LN params stay f32.
        "wqkv": init((L, H, 3 * H), jnp.bfloat16), "bqkv": zeros((L, 1, 3 * H)),
        "wo": init((L, H, H), jnp.bfloat16), "bo": zeros((L, 1, H)),
        "ln1_g": ones((L, 1, H)), "ln1_b": zeros((L, 1, H)),
        "w1": init((L, H, F), jnp.bfloat16), "b1": zeros((L, 1, F)),
        "w2": init((L, F, H), jnp.bfloat16), "b2": zeros((L, 1, H)),
        "ln2_g": ones((L, 1, H)), "ln2_b": zeros((L, 1, H)),
    }


# --------------------------------- main --------------------------------------------------
if __name__ == "__main__":
    key = jax.random.PRNGKey(0)
    kp, ka, ko = jax.random.split(key, 3)
    params = make_params(kp)

    input_ids_anchor = jax.random.randint(ka, (BATCH, MAX_SEQ), 0, VOCAB, dtype=jnp.int32)
    input_ids_other = jax.random.randint(ko, (BATCH, MAX_SEQ), 0, VOCAB, dtype=jnp.int32)
    # deterministic masks with some padding tokens
    attention_mask_anchor = jnp.array(
        [[1, 1, 1, 1, 1, 1, 1, 1],
         [1, 1, 1, 1, 1, 0, 0, 0]], dtype=jnp.int32)
    attention_mask_other = jnp.array(
        [[1, 1, 1, 1, 1, 1, 0, 0],
         [1, 1, 1, 0, 0, 0, 0, 0]], dtype=jnp.int32)

    fwd = jax.jit(siamese_sbert_forward)
    emb_anchor, emb_other = fwd(params, input_ids_anchor, attention_mask_anchor,
                                input_ids_other, attention_mask_other)
    jax.block_until_ready((emb_anchor, emb_other))

    assert emb_anchor.shape == (BATCH, HIDDEN)
    assert emb_other.shape == (BATCH, HIDDEN)
    assert jnp.all(jnp.isfinite(emb_anchor)) and jnp.all(jnp.isfinite(emb_other))
    print("KERNEL_OK")
</pallas_src>

<mosaic_0001>
module attributes {stable_mosaic.version = 11 : i64} {
  func.func @_encoder_pool_kernel(%arg0: memref<32x128xf32, #tpu.memory_space<vmem>>, %arg1: memref<32x1xf32, #tpu.memory_space<vmem>>, %arg2: memref<128x128xf32, #tpu.memory_space<vmem>>, %arg3: memref<1x128xf32, #tpu.memory_space<vmem>>, %arg4: memref<1x128xf32, #tpu.memory_space<vmem>>, %arg5: memref<2x128x384xbf16, #tpu.memory_space<vmem>>, %arg6: memref<2x1x384xf32, #tpu.memory_space<vmem>>, %arg7: memref<2x128x128xbf16, #tpu.memory_space<vmem>>, %arg8: memref<2x1x128xf32, #tpu.memory_space<vmem>>, %arg9: memref<2x1x128xf32, #tpu.memory_space<vmem>>, %arg10: memref<2x1x128xf32, #tpu.memory_space<vmem>>, %arg11: memref<2x128x256xbf16, #tpu.memory_space<vmem>>, %arg12: memref<2x1x256xf32, #tpu.memory_space<vmem>>, %arg13: memref<2x256x128xbf16, #tpu.memory_space<vmem>>, %arg14: memref<2x1x128xf32, #tpu.memory_space<vmem>>, %arg15: memref<2x1x128xf32, #tpu.memory_space<vmem>>, %arg16: memref<2x1x128xf32, #tpu.memory_space<vmem>>, %arg17: memref<4x128xf32, #tpu.memory_space<vmem>>) attributes {dimension_semantics = [], scalar_prefetch = 0 : i64, scratch_operands = 0 : i64, tpu.core_type = #tpu.core_type<tc>} {
    %c0 = arith.constant 0 : index
    %c0_0 = arith.constant 0 : index
    %0 = vector.load %arg0[%c0, %c0_0] : memref<32x128xf32, #tpu.memory_space<vmem>>, vector<32x128xf32>
    %c0_1 = arith.constant 0 : index
    %c0_2 = arith.constant 0 : index
    %1 = vector.load %arg3[%c0_1, %c0_2] : memref<1x128xf32, #tpu.memory_space<vmem>>, vector<1x128xf32>
    %c0_3 = arith.constant 0 : index
    %c0_4 = arith.constant 0 : index
    %2 = vector.load %arg4[%c0_3, %c0_4] : memref<1x128xf32, #tpu.memory_space<vmem>>, vector<1x128xf32>
    %cst = arith.constant dense<0.000000e+00> : vector<32xf32>
    %3 = vector.multi_reduction <add>, %0, %cst [1] : vector<32x128xf32> to vector<32xf32>
    %4 = vector.shape_cast %3 : vector<32xf32> to vector<32x1xf32>
    %cst_5 = arith.constant 1.280000e+02 : f32
    %5 = vector.broadcast %cst_5 : f32 to vector<32x1xf32>
    %6 = arith.divf %4, %5 : vector<32x1xf32>
    %7 = vector.broadcast %6 : vector<32x1xf32> to vector<32x128xf32>
    %8 = arith.subf %0, %7 : vector<32x128xf32>
    %9 = arith.mulf %8, %8 : vector<32x128xf32>
    %cst_6 = arith.constant dense<0.000000e+00> : vector<32xf32>
    %10 = vector.multi_reduction <add>, %9, %cst_6 [1] : vector<32x128xf32> to vector<32xf32>
    %11 = vector.shape_cast %10 : vector<32xf32> to vector<32x1xf32>
    %cst_7 = arith.constant 1.280000e+02 : f32
    %12 = vector.broadcast %cst_7 : f32 to vector<32x1xf32>
    %13 = arith.divf %11, %12 : vector<32x1xf32>
    %14 = vector.broadcast %6 : vector<32x1xf32> to vector<32x128xf32>
    %15 = arith.subf %0, %14 : vector<32x128xf32>
    %cst_8 = arith.constant 9.99999996E-13 : f32
    %16 = vector.broadcast %cst_8 : f32 to vector<32x1xf32>
    %17 = arith.addf %13, %16 : vector<32x1xf32>
    %18 = math.rsqrt %17 : vector<32x1xf32>
    %19 = vector.broadcast %18 : vector<32x1xf32> to vector<32x128xf32>
    %20 = arith.mulf %15, %19 : vector<32x128xf32>
    %21 = vector.broadcast %1 : vector<1x128xf32> to vector<32x128xf32>
    %22 = arith.mulf %20, %21 : vector<32x128xf32>
    %23 = vector.broadcast %2 : vector<1x128xf32> to vector<32x128xf32>
    %24 = arith.addf %22, %23 : vector<32x128xf32>
    %c0_9 = arith.constant 0 : index
    %c0_10 = arith.constant 0 : index
    %25 = vector.load %arg2[%c0_9, %c0_10] : memref<128x128xf32, #tpu.memory_space<vmem>>, vector<128x128xf32>
    %26 = arith.truncf %24 : vector<32x128xf32> to vector<32x128xbf16>
    %c0_11 = arith.constant 0 : index
    %c0_12 = arith.constant 0 : index
    %c0_13 = arith.constant 0 : index
    %27 = vector.load %arg5[%c0_11, %c0_12, %c0_13] : memref<2x128x384xbf16, #tpu.memory_space<vmem>>, vector<1x128x384xbf16>
    %28 = vector.shape_cast %27 : vector<1x128x384xbf16> to vector<128x384xbf16>
    %cst_14 = arith.constant dense<0.000000e+00> : vector<32x384xf32>
    %29 = tpu.matmul %26, %28, %cst_14 {dimension_numbers = #tpu.dot_dimension_numbers<[1], [0], [0], [1], [0, 0, 1, 1], [], []>} : vector<32x128xbf16>, vector<128x384xbf16>, vector<32x384xf32> -> vector<32x384xf32>
    %c0_15 = arith.constant 0 : index
    %c0_16 = arith.constant 0 : index
    %c0_17 = arith.constant 0 : index
    %30 = vector.load %arg6[%c0_15, %c0_16, %c0_17] : memref<2x1x384xf32, #tpu.memory_space<vmem>>, vector<1x1x384xf32>
    %31 = vector.shape_cast %30 : vector<1x1x384xf32> to vector<1x384xf32>
    %32 = vector.broadcast %31 : vector<1x384xf32> to vector<32x384xf32>
    %33 = arith.addf %29, %32 : vector<32x384xf32>
    %34 = vector.extract_strided_slice %33 {offsets = [0, 0], sizes = [32, 32], strides = [1, 1]} : vector<32x384xf32> to vector<32x32xf32>
    %35 = vector.extract_strided_slice %33 {offsets = [0, 32], sizes = [32, 32], strides = [1, 1]} : vector<32x384xf32> to vector<32x32xf32>
    %36 = vector.extract_strided_slice %33 {offsets = [0, 64], sizes = [32, 32], strides = [1, 1]} : vector<32x384xf32> to vector<32x32xf32>
    %37 = vector.extract_strided_slice %33 {offsets = [0, 96], sizes = [32, 32], strides = [1, 1]} : vector<32x384xf32> to vector<32x32xf32>
    %38 = tpu.concatenate %34, %35, %36, %37 in 0 : vector<32x32xf32>, vector<32x32xf32>, vector<32x32xf32>, vector<32x32xf32> -> vector<128x32xf32>
    %39 = vector.extract_strided_slice %33 {offsets = [0, 128], sizes = [32, 32], strides = [1, 1]} : vector<32x384xf32> to vector<32x32xf32>
    %40 = vector.extract_strided_slice %33 {offsets = [0, 160], sizes = [32, 32], strides = [1, 1]} : vector<32x384xf32> to vector<32x32xf32>
    %41 = vector.extract_strided_slice %33 {offsets = [0, 192], sizes = [32, 32], strides = [1, 1]} : vector<32x384xf32> to vector<32x32xf32>
    %42 = vector.extract_strided_slice %33 {offsets = [0, 224], sizes = [32, 32], strides = [1, 1]} : vector<32x384xf32> to vector<32x32xf32>
    %43 = tpu.concatenate %39, %40, %41, %42 in 0 : vector<32x32xf32>, vector<32x32xf32>, vector<32x32xf32>, vector<32x32xf32> -> vector<128x32xf32>
    %44 = vector.extract_strided_slice %33 {offsets = [0, 256], sizes = [32, 32], strides = [1, 1]} : vector<32x384xf32> to vector<32x32xf32>
    %45 = vector.extract_strided_slice %33 {offsets = [0, 288], sizes = [32, 32], strides = [1, 1]} : vector<32x384xf32> to vector<32x32xf32>
    %46 = vector.extract_strided_slice %33 {offsets = [0, 320], sizes = [32, 32], strides = [1, 1]} : vector<32x384xf32> to vector<32x32xf32>
    %47 = vector.extract_strided_slice %33 {offsets = [0, 352], sizes = [32, 32], strides = [1, 1]} : vector<32x384xf32> to vector<32x32xf32>
    %48 = tpu.concatenate %44, %45, %46, %47 in 0 : vector<32x32xf32>, vector<32x32xf32>, vector<32x32xf32>, vector<32x32xf32> -> vector<128x32xf32>
    %cst_18 = arith.constant 0.176776692 : f32
    %49 = vector.broadcast %cst_18 : f32 to vector<128x32xf32>
    %50 = arith.mulf %38, %49 : vector<128x32xf32>
    %51 = arith.truncf %50 : vector<128x32xf32> to vector<128x32xbf16>
    %52 = arith.truncf %43 : vector<128x32xf32> to vector<128x32xbf16>
    %53 = arith.truncf %48 : vector<128x32xf32> to vector<128x32xbf16>
    %cst_19 = arith.constant dense<0.000000e+00> : vector<128x128xf32>
    %54 = tpu.matmul %51, %52, %cst_19 {dimension_numbers = #tpu.dot_dimension_numbers<[1], [1], [0], [0], [0, 0, 1, 0], [], []>} : vector<128x32xbf16>, vector<128x32xbf16>, vector<128x128xf32> -> vector<128x128xf32>
    %55 = arith.addf %54, %25 : vector<128x128xf32>
    %cst_20 = arith.constant dense<0xFF800000> : vector<128xf32>
    %56 = vector.multi_reduction <maximumf>, %55, %cst_20 [1] : vector<128x128xf32> to vector<128xf32>
    %57 = vector.shape_cast %56 : vector<128xf32> to vector<128x1xf32>
    %58 = vector.broadcast %57 : vector<128x1xf32> to vector<128x128xf32>
    %59 = arith.subf %55, %58 : vector<128x128xf32>
    %60 = math.exp %59 : vector<128x128xf32>
    %cst_21 = arith.constant dense<0.000000e+00> : vector<128xf32>
    %61 = vector.multi_reduction <add>, %60, %cst_21 [1] : vector<128x128xf32> to vector<128xf32>
    %62 = vector.shape_cast %61 : vector<128xf32> to vector<128x1xf32>
    %63 = arith.truncf %60 : vector<128x128xf32> to vector<128x128xbf16>
    %cst_22 = arith.constant dense<0.000000e+00> : vector<128x32xf32>
    %64 = tpu.matmul %63, %53, %cst_22 {dimension_numbers = #tpu.dot_dimension_numbers<[1], [0], [0], [1], [0, 0, 1, 1], [], []>} : vector<128x128xbf16>, vector<128x32xbf16>, vector<128x32xf32> -> vector<128x32xf32>
    %65 = tpu.reciprocal %62 {approx = true} : vector<128x1xf32> -> vector<128x1xf32>
    %66 = vector.broadcast %65 : vector<128x1xf32> to vector<128x32xf32>
    %67 = arith.mulf %64, %66 : vector<128x32xf32>
    %68 = vector.extract_strided_slice %67 {offsets = [0, 0], sizes = [32, 32], strides = [1, 1]} : vector<128x32xf32> to vector<32x32xf32>
    %69 = vector.extract_strided_slice %67 {offsets = [32, 0], sizes = [32, 32], strides = [1, 1]} : vector<128x32xf32> to vector<32x32xf32>
    %70 = vector.extract_strided_slice %67 {offsets = [64, 0], sizes = [32, 32], strides = [1, 1]} : vector<128x32xf32> to vector<32x32xf32>
    %71 = vector.extract_strided_slice %67 {offsets = [96, 0], sizes = [32, 32], strides = [1, 1]} : vector<128x32xf32> to vector<32x32xf32>
    %72 = tpu.concatenate %68, %69, %70, %71 in 1 : vector<32x32xf32>, vector<32x32xf32>, vector<32x32xf32>, vector<32x32xf32> -> vector<32x128xf32>
    %73 = arith.truncf %72 : vector<32x128xf32> to vector<32x128xbf16>
    %c0_23 = arith.constant 0 : index
    %c0_24 = arith.constant 0 : index
    %c0_25 = arith.constant 0 : index
    %74 = vector.load %arg7[%c0_23, %c0_24, %c0_25] : memref<2x128x128xbf16, #tpu.memory_space<vmem>>, vector<1x128x128xbf16>
    %75 = vector.shape_cast %74 : vector<1x128x128xbf16> to vector<128x128xbf16>
    %cst_26 = arith.constant dense<0.000000e+00> : vector<32x128xf32>
    %76 = tpu.matmul %73, %75, %cst_26 {dimension_numbers = #tpu.dot_dimension_numbers<[1], [0], [0], [1], [0, 0, 1, 1], [], []>} : vector<32x128xbf16>, vector<128x128xbf16>, vector<32x128xf32> -> vector<32x128xf32>
    %c0_27 = arith.constant 0 : index
    %c0_28 = arith.constant 0 : index
    %c0_29 = arith.constant 0 : index
    %77 = vector.load %arg8[%c0_27, %c0_28, %c0_29] : memref<2x1x128xf32, #tpu.memory_space<vmem>>, vector<1x1x128xf32>
    %78 = vector.shape_cast %77 : vector<1x1x128xf32> to vector<1x128xf32>
    %79 = vector.broadcast %78 : vector<1x128xf32> to vector<32x128xf32>
    %80 = arith.addf %76, %79 : vector<32x128xf32>
    %81 = arith.addf %80, %24 : vector<32x128xf32>
    %c0_30 = arith.constant 0 : index
    %c0_31 = arith.constant 0 : index
    %c0_32 = arith.constant 0 : index
    %82 = vector.load %arg9[%c0_30, %c0_31, %c0_32] : memref<2x1x128xf32, #tpu.memory_space<vmem>>, vector<1x1x128xf32>
    %83 = vector.shape_cast %82 : vector<1x1x128xf32> to vector<1x128xf32>
    %c0_33 = arith.constant 0 : index
    %c0_34 = arith.constant 0 : index
    %c0_35 = arith.constant 0 : index
    %84 = vector.load %arg10[%c0_33, %c0_34, %c0_35] : memref<2x1x128xf32, #tpu.memory_space<vmem>>, vector<1x1x128xf32>
    %85 = vector.shape_cast %84 : vector<1x1x128xf32> to vector<1x128xf32>
    %cst_36 = arith.constant dense<0.000000e+00> : vector<32xf32>
    %86 = vector.multi_reduction <add>, %81, %cst_36 [1] : vector<32x128xf32> to vector<32xf32>
    %87 = vector.shape_cast %86 : vector<32xf32> to vector<32x1xf32>
    %cst_37 = arith.constant 1.280000e+02 : f32
    %88 = vector.broadcast %cst_37 : f32 to vector<32x1xf32>
    %89 = arith.divf %87, %88 : vector<32x1xf32>
    %90 = vector.broadcast %89 : vector<32x1xf32> to vector<32x128xf32>
    %91 = arith.subf %81, %90 : vector<32x128xf32>
    %92 = arith.mulf %91, %91 : vector<32x128xf32>
    %cst_38 = arith.constant dense<0.000000e+00> : vector<32xf32>
    %93 = vector.multi_reduction <add>, %92, %cst_38 [1] : vector<32x128xf32> to vector<32xf32>
    %94 = vector.shape_cast %93 : vector<32xf32> to vector<32x1xf32>
    %cst_39 = arith.constant 1.280000e+02 : f32
    %95 = vector.broadcast %cst_39 : f32 to vector<32x1xf32>
    %96 = arith.divf %94, %95 : vector<32x1xf32>
    %97 = vector.broadcast %89 : vector<32x1xf32> to vector<32x128xf32>
    %98 = arith.subf %81, %97 : vector<32x128xf32>
    %cst_40 = arith.constant 9.99999996E-13 : f32
    %99 = vector.broadcast %cst_40 : f32 to vector<32x1xf32>
    %100 = arith.addf %96, %99 : vector<32x1xf32>
    %101 = math.rsqrt %100 : vector<32x1xf32>
    %102 = vector.broadcast %101 : vector<32x1xf32> to vector<32x128xf32>
    %103 = arith.mulf %98, %102 : vector<32x128xf32>
    %104 = vector.broadcast %83 : vector<1x128xf32> to vector<32x128xf32>
    %105 = arith.mulf %103, %104 : vector<32x128xf32>
    %106 = vector.broadcast %85 : vector<1x128xf32> to vector<32x128xf32>
    %107 = arith.addf %105, %106 : vector<32x128xf32>
    %108 = arith.truncf %107 : vector<32x128xf32> to vector<32x128xbf16>
    %c0_41 = arith.constant 0 : index
    %c0_42 = arith.constant 0 : index
    %c0_43 = arith.constant 0 : index
    %109 = vector.load %arg11[%c0_41, %c0_42, %c0_43] : memref<2x128x256xbf16, #tpu.memory_space<vmem>>, vector<1x128x256xbf16>
    %110 = vector.shape_cast %109 : vector<1x128x256xbf16> to vector<128x256xbf16>
    %cst_44 = arith.constant dense<0.000000e+00> : vector<32x256xf32>
    %111 = tpu.matmul %108, %110, %cst_44 {dimension_numbers = #tpu.dot_dimension_numbers<[1], [0], [0], [1], [0, 0, 1, 1], [], []>} : vector<32x128xbf16>, vector<128x256xbf16>, vector<32x256xf32> -> vector<32x256xf32>
    %c0_45 = arith.constant 0 : index
    %c0_46 = arith.constant 0 : index
    %c0_47 = arith.constant 0 : index
    %112 = vector.load %arg12[%c0_45, %c0_46, %c0_47] : memref<2x1x256xf32, #tpu.memory_space<vmem>>, vector<1x1x256xf32>
    %113 = vector.shape_cast %112 : vector<1x1x256xf32> to vector<1x256xf32>
    %114 = vector.broadcast %113 : vector<1x256xf32> to vector<32x256xf32>
    %115 = arith.addf %111, %114 : vector<32x256xf32>
    %cst_48 = arith.constant 5.000000e-01 : f32
    %116 = vector.broadcast %cst_48 : f32 to vector<32x256xf32>
    %117 = arith.mulf %116, %115 : vector<32x256xf32>
    %cst_49 = arith.constant 0.707106769 : f32
    %118 = vector.broadcast %cst_49 : f32 to vector<32x256xf32>
    %119 = arith.mulf %115, %118 : vector<32x256xf32>
    %120 = math.absf %119 : vector<32x256xf32>
    %cst_50 = arith.constant 0.327591091 : f32
    %121 = vector.broadcast %cst_50 : f32 to vector<32x256xf32>
    %122 = arith.mulf %121, %120 : vector<32x256xf32>
    %cst_51 = arith.constant 1.000000e+00 : f32
    %123 = vector.broadcast %cst_51 : f32 to vector<32x256xf32>
    %124 = arith.addf %123, %122 : vector<32x256xf32>
    %125 = tpu.reciprocal %124 {approx = true} : vector<32x256xf32> -> vector<32x256xf32>
    %cst_52 = arith.constant 1.06140542 : f32
    %126 = vector.broadcast %cst_52 : f32 to vector<32x256xf32>
    %127 = arith.mulf %126, %125 : vector<32x256xf32>
    %cst_53 = arith.constant -1.45315206 : f32
    %128 = vector.broadcast %cst_53 : f32 to vector<32x256xf32>
    %129 = arith.addf %127, %128 : vector<32x256xf32>
    %130 = arith.mulf %129, %125 : vector<32x256xf32>
    %cst_54 = arith.constant 1.42141378 : f32
    %131 = vector.broadcast %cst_54 : f32 to vector<32x256xf32>
    %132 = arith.addf %130, %131 : vector<32x256xf32>
    %133 = arith.mulf %132, %125 : vector<32x256xf32>
    %cst_55 = arith.constant -0.284496725 : f32
    %134 = vector.broadcast %cst_55 : f32 to vector<32x256xf32>
    %135 = arith.addf %133, %134 : vector<32x256xf32>
    %136 = arith.mulf %135, %125 : vector<32x256xf32>
    %cst_56 = arith.constant 0.254829586 : f32
    %137 = vector.broadcast %cst_56 : f32 to vector<32x256xf32>
    %138 = arith.addf %136, %137 : vector<32x256xf32>
    %139 = arith.mulf %138, %125 : vector<32x256xf32>
    %cst_57 = arith.constant 0.000000e+00 : f32
    %140 = vector.broadcast %cst_57 : f32 to vector<32x256xf32>
    %141 = arith.subf %140, %120 : vector<32x256xf32>
    %142 = arith.mulf %141, %120 : vector<32x256xf32>
    %143 = math.exp %142 : vector<32x256xf32>
    %144 = arith.mulf %139, %143 : vector<32x256xf32>
    %cst_58 = arith.constant 1.000000e+00 : f32
    %145 = vector.broadcast %cst_58 : f32 to vector<32x256xf32>
    %146 = arith.subf %145, %144 : vector<32x256xf32>
    %cst_59 = arith.constant 0.000000e+00 : f32
    %147 = vector.broadcast %cst_59 : f32 to vector<32x256xf32>
    %148 = arith.cmpf oge, %119, %147 : vector<32x256xf32>
    %cst_60 = arith.constant 0.000000e+00 : f32
    %149 = vector.broadcast %cst_60 : f32 to vector<32x256xf32>
    %150 = arith.subf %149, %146 : vector<32x256xf32>
    %151 = arith.select %148, %146, %150 : vector<32x256xi1>, vector<32x256xf32>
    %cst_61 = arith.constant 1.000000e+00 : f32
    %152 = vector.broadcast %cst_61 : f32 to vector<32x256xf32>
    %153 = arith.addf %152, %151 : vector<32x256xf32>
    %154 = arith.mulf %117, %153 : vector<32x256xf32>
    %155 = arith.truncf %154 : vector<32x256xf32> to vector<32x256xbf16>
    %c0_62 = arith.constant 0 : index
    %c0_63 = arith.constant 0 : index
    %c0_64 = arith.constant 0 : index
    %156 = vector.load %arg13[%c0_62, %c0_63, %c0_64] : memref<2x256x128xbf16, #tpu.memory_space<vmem>>, vector<1x256x128xbf16>
    %157 = vector.shape_cast %156 : vector<1x256x128xbf16> to vector<256x128xbf16>
    %cst_65 = arith.constant dense<0.000000e+00> : vector<32x128xf32>
    %158 = tpu.matmul %155, %157, %cst_65 {dimension_numbers = #tpu.dot_dimension_numbers<[1], [0], [0], [1], [0, 0, 1, 1], [], []>} : vector<32x256xbf16>, vector<256x128xbf16>, vector<32x128xf32> -> vector<32x128xf32>
    %c0_66 = arith.constant 0 : index
    %c0_67 = arith.constant 0 : index
    %c0_68 = arith.constant 0 : index
    %159 = vector.load %arg14[%c0_66, %c0_67, %c0_68] : memref<2x1x128xf32, #tpu.memory_space<vmem>>, vector<1x1x128xf32>
    %160 = vector.shape_cast %159 : vector<1x1x128xf32> to vector<1x128xf32>
    %161 = vector.broadcast %160 : vector<1x128xf32> to vector<32x128xf32>
    %162 = arith.addf %158, %161 : vector<32x128xf32>
    %163 = arith.addf %162, %107 : vector<32x128xf32>
    %c0_69 = arith.constant 0 : index
    %c0_70 = arith.constant 0 : index
    %c0_71 = arith.constant 0 : index
    %164 = vector.load %arg15[%c0_69, %c0_70, %c0_71] : memref<2x1x128xf32, #tpu.memory_space<vmem>>, vector<1x1x128xf32>
    %165 = vector.shape_cast %164 : vector<1x1x128xf32> to vector<1x128xf32>
    %c0_72 = arith.constant 0 : index
    %c0_73 = arith.constant 0 : index
    %c0_74 = arith.constant 0 : index
    %166 = vector.load %arg16[%c0_72, %c0_73, %c0_74] : memref<2x1x128xf32, #tpu.memory_space<vmem>>, vector<1x1x128xf32>
    %167 = vector.shape_cast %166 : vector<1x1x128xf32> to vector<1x128xf32>
    %cst_75 = arith.constant dense<0.000000e+00> : vector<32xf32>
    %168 = vector.multi_reduction <add>, %163, %cst_75 [1] : vector<32x128xf32> to vector<32xf32>
    %169 = vector.shape_cast %168 : vector<32xf32> to vector<32x1xf32>
    %cst_76 = arith.constant 1.280000e+02 : f32
    %170 = vector.broadcast %cst_76 : f32 to vector<32x1xf32>
    %171 = arith.divf %169, %170 : vector<32x1xf32>
    %172 = vector.broadcast %171 : vector<32x1xf32> to vector<32x128xf32>
    %173 = arith.subf %163, %172 : vector<32x128xf32>
    %174 = arith.mulf %173, %173 : vector<32x128xf32>
    %cst_77 = arith.constant dense<0.000000e+00> : vector<32xf32>
    %175 = vector.multi_reduction <add>, %174, %cst_77 [1] : vector<32x128xf32> to vector<32xf32>
    %176 = vector.shape_cast %175 : vector<32xf32> to vector<32x1xf32>
    %cst_78 = arith.constant 1.280000e+02 : f32
    %177 = vector.broadcast %cst_78 : f32 to vector<32x1xf32>
    %178 = arith.divf %176, %177 : vector<32x1xf32>
    %179 = vector.broadcast %171 : vector<32x1xf32> to vector<32x128xf32>
    %180 = arith.subf %163, %179 : vector<32x128xf32>
    %cst_79 = arith.constant 9.99999996E-13 : f32
    %181 = vector.broadcast %cst_79 : f32 to vector<32x1xf32>
    %182 = arith.addf %178, %181 : vector<32x1xf32>
    %183 = math.rsqrt %182 : vector<32x1xf32>
    %184 = vector.broadcast %183 : vector<32x1xf32> to vector<32x128xf32>
    %185 = arith.mulf %180, %184 : vector<32x128xf32>
    %186 = vector.broadcast %165 : vector<1x128xf32> to vector<32x128xf32>
    %187 = arith.mulf %185, %186 : vector<32x128xf32>
    %188 = vector.broadcast %167 : vector<1x128xf32> to vector<32x128xf32>
    %189 = arith.addf %187, %188 : vector<32x128xf32>
    %190 = arith.truncf %189 : vector<32x128xf32> to vector<32x128xbf16>
    %c1 = arith.constant 1 : index
    %c0_80 = arith.constant 0 : index
    %c0_81 = arith.constant 0 : index
    %191 = vector.load %arg5[%c1, %c0_80, %c0_81] : memref<2x128x384xbf16, #tpu.memory_space<vmem>>, vector<1x128x384xbf16>
    %192 = vector.shape_cast %191 : vector<1x128x384xbf16> to vector<128x384xbf16>
    %cst_82 = arith.constant dense<0.000000e+00> : vector<32x384xf32>
    %193 = tpu.matmul %190, %192, %cst_82 {dimension_numbers = #tpu.dot_dimension_numbers<[1], [0], [0], [1], [0, 0, 1, 1], [], []>} : vector<32x128xbf16>, vector<128x384xbf16>, vector<32x384xf32> -> vector<32x384xf32>
    %c1_83 = arith.constant 1 : index
    %c0_84 = arith.constant 0 : index
    %c0_85 = arith.constant 0 : index
    %194 = vector.load %arg6[%c1_83, %c0_84, %c0_85] : memref<2x1x384xf32, #tpu.memory_space<vmem>>, vector<1x1x384xf32>
    %195 = vector.shape_cast %194 : vector<1x1x384xf32> to vector<1x384xf32>
    %196 = vector.broadcast %195 : vector<1x384xf32> to vector<32x384xf32>
    %197 = arith.addf %193, %196 : vector<32x384xf32>
    %198 = vector.extract_strided_slice %197 {offsets = [0, 0], sizes = [32, 32], strides = [1, 1]} : vector<32x384xf32> to vector<32x32xf32>
    %199 = vector.extract_strided_slice %197 {offsets = [0, 32], sizes = [32, 32], strides = [1, 1]} : vector<32x384xf32> to vector<32x32xf32>
    %200 = vector.extract_strided_slice %197 {offsets = [0, 64], sizes = [32, 32], strides = [1, 1]} : vector<32x384xf32> to vector<32x32xf32>
    %201 = vector.extract_strided_slice %197 {offsets = [0, 96], sizes = [32, 32], strides = [1, 1]} : vector<32x384xf32> to vector<32x32xf32>
    %202 = tpu.concatenate %198, %199, %200, %201 in 0 : vector<32x32xf32>, vector<32x32xf32>, vector<32x32xf32>, vector<32x32xf32> -> vector<128x32xf32>
    %203 = vector.extract_strided_slice %197 {offsets = [0, 128], sizes = [32, 32], strides = [1, 1]} : vector<32x384xf32> to vector<32x32xf32>
    %204 = vector.extract_strided_slice %197 {offsets = [0, 160], sizes = [32, 32], strides = [1, 1]} : vector<32x384xf32> to vector<32x32xf32>
    %205 = vector.extract_strided_slice %197 {offsets = [0, 192], sizes = [32, 32], strides = [1, 1]} : vector<32x384xf32> to vector<32x32xf32>
    %206 = vector.extract_strided_slice %197 {offsets = [0, 224], sizes = [32, 32], strides = [1, 1]} : vector<32x384xf32> to vector<32x32xf32>
    %207 = tpu.concatenate %203, %204, %205, %206 in 0 : vector<32x32xf32>, vector<32x32xf32>, vector<32x32xf32>, vector<32x32xf32> -> vector<128x32xf32>
    %208 = vector.extract_strided_slice %197 {offsets = [0, 256], sizes = [32, 32], strides = [1, 1]} : vector<32x384xf32> to vector<32x32xf32>
    %209 = vector.extract_strided_slice %197 {offsets = [0, 288], sizes = [32, 32], strides = [1, 1]} : vector<32x384xf32> to vector<32x32xf32>
    %210 = vector.extract_strided_slice %197 {offsets = [0, 320], sizes = [32, 32], strides = [1, 1]} : vector<32x384xf32> to vector<32x32xf32>
    %211 = vector.extract_strided_slice %197 {offsets = [0, 352], sizes = [32, 32], strides = [1, 1]} : vector<32x384xf32> to vector<32x32xf32>
    %212 = tpu.concatenate %208, %209, %210, %211 in 0 : vector<32x32xf32>, vector<32x32xf32>, vector<32x32xf32>, vector<32x32xf32> -> vector<128x32xf32>
    %cst_86 = arith.constant 0.176776692 : f32
    %213 = vector.broadcast %cst_86 : f32 to vector<128x32xf32>
    %214 = arith.mulf %202, %213 : vector<128x32xf32>
    %215 = arith.truncf %214 : vector<128x32xf32> to vector<128x32xbf16>
    %216 = arith.truncf %207 : vector<128x32xf32> to vector<128x32xbf16>
    %217 = arith.truncf %212 : vector<128x32xf32> to vector<128x32xbf16>
    %cst_87 = arith.constant dense<0.000000e+00> : vector<128x128xf32>
    %218 = tpu.matmul %215, %216, %cst_87 {dimension_numbers = #tpu.dot_dimension_numbers<[1], [1], [0], [0], [0, 0, 1, 0], [], []>} : vector<128x32xbf16>, vector<128x32xbf16>, vector<128x128xf32> -> vector<128x128xf32>
    %219 = arith.addf %218, %25 : vector<128x128xf32>
    %cst_88 = arith.constant dense<0xFF800000> : vector<128xf32>
    %220 = vector.multi_reduction <maximumf>, %219, %cst_88 [1] : vector<128x128xf32> to vector<128xf32>
    %221 = vector.shape_cast %220 : vector<128xf32> to vector<128x1xf32>
    %222 = vector.broadcast %221 : vector<128x1xf32> to vector<128x128xf32>
    %223 = arith.subf %219, %222 : vector<128x128xf32>
    %224 = math.exp %223 : vector<128x128xf32>
    %cst_89 = arith.constant dense<0.000000e+00> : vector<128xf32>
    %225 = vector.multi_reduction <add>, %224, %cst_89 [1] : vector<128x128xf32> to vector<128xf32>
    %226 = vector.shape_cast %225 : vector<128xf32> to vector<128x1xf32>
    %227 = arith.truncf %224 : vector<128x128xf32> to vector<128x128xbf16>
    %cst_90 = arith.constant dense<0.000000e+00> : vector<128x32xf32>
    %228 = tpu.matmul %227, %217, %cst_90 {dimension_numbers = #tpu.dot_dimension_numbers<[1], [0], [0], [1], [0, 0, 1, 1], [], []>} : vector<128x128xbf16>, vector<128x32xbf16>, vector<128x32xf32> -> vector<128x32xf32>
    %229 = tpu.reciprocal %226 {approx = true} : vector<128x1xf32> -> vector<128x1xf32>
    %230 = vector.broadcast %229 : vector<128x1xf32> to vector<128x32xf32>
    %231 = arith.mulf %228, %230 : vector<128x32xf32>
    %232 = vector.extract_strided_slice %231 {offsets = [0, 0], sizes = [32, 32], strides = [1, 1]} : vector<128x32xf32> to vector<32x32xf32>
    %233 = vector.extract_strided_slice %231 {offsets = [32, 0], sizes = [32, 32], strides = [1, 1]} : vector<128x32xf32> to vector<32x32xf32>
    %234 = vector.extract_strided_slice %231 {offsets = [64, 0], sizes = [32, 32], strides = [1, 1]} : vector<128x32xf32> to vector<32x32xf32>
    %235 = vector.extract_strided_slice %231 {offsets = [96, 0], sizes = [32, 32], strides = [1, 1]} : vector<128x32xf32> to vector<32x32xf32>
    %236 = tpu.concatenate %232, %233, %234, %235 in 1 : vector<32x32xf32>, vector<32x32xf32>, vector<32x32xf32>, vector<32x32xf32> -> vector<32x128xf32>
    %237 = arith.truncf %236 : vector<32x128xf32> to vector<32x128xbf16>
    %c1_91 = arith.constant 1 : index
    %c0_92 = arith.constant 0 : index
    %c0_93 = arith.constant 0 : index
    %238 = vector.load %arg7[%c1_91, %c0_92, %c0_93] : memref<2x128x128xbf16, #tpu.memory_space<vmem>>, vector<1x128x128xbf16>
    %239 = vector.shape_cast %238 : vector<1x128x128xbf16> to vector<128x128xbf16>
    %cst_94 = arith.constant dense<0.000000e+00> : vector<32x128xf32>
    %240 = tpu.matmul %237, %239, %cst_94 {dimension_numbers = #tpu.dot_dimension_numbers<[1], [0], [0], [1], [0, 0, 1, 1], [], []>} : vector<32x128xbf16>, vector<128x128xbf16>, vector<32x128xf32> -> vector<32x128xf32>
    %c1_95 = arith.constant 1 : index
    %c0_96 = arith.constant 0 : index
    %c0_97 = arith.constant 0 : index
    %241 = vector.load %arg8[%c1_95, %c0_96, %c0_97] : memref<2x1x128xf32, #tpu.memory_space<vmem>>, vector<1x1x128xf32>
    %242 = vector.shape_cast %241 : vector<1x1x128xf32> to vector<1x128xf32>
    %243 = vector.broadcast %242 : vector<1x128xf32> to vector<32x128xf32>
    %244 = arith.addf %240, %243 : vector<32x128xf32>
    %245 = arith.addf %244, %189 : vector<32x128xf32>
    %c1_98 = arith.constant 1 : index
    %c0_99 = arith.constant 0 : index
    %c0_100 = arith.constant 0 : index
    %246 = vector.load %arg9[%c1_98, %c0_99, %c0_100] : memref<2x1x128xf32, #tpu.memory_space<vmem>>, vector<1x1x128xf32>
    %247 = vector.shape_cast %246 : vector<1x1x128xf32> to vector<1x128xf32>
    %c1_101 = arith.constant 1 : index
    %c0_102 = arith.constant 0 : index
    %c0_103 = arith.constant 0 : index
    %248 = vector.load %arg10[%c1_101, %c0_102, %c0_103] : memref<2x1x128xf32, #tpu.memory_space<vmem>>, vector<1x1x128xf32>
    %249 = vector.shape_cast %248 : vector<1x1x128xf32> to vector<1x128xf32>
    %cst_104 = arith.constant dense<0.000000e+00> : vector<32xf32>
    %250 = vector.multi_reduction <add>, %245, %cst_104 [1] : vector<32x128xf32> to vector<32xf32>
    %251 = vector.shape_cast %250 : vector<32xf32> to vector<32x1xf32>
    %cst_105 = arith.constant 1.280000e+02 : f32
    %252 = vector.broadcast %cst_105 : f32 to vector<32x1xf32>
    %253 = arith.divf %251, %252 : vector<32x1xf32>
    %254 = vector.broadcast %253 : vector<32x1xf32> to vector<32x128xf32>
    %255 = arith.subf %245, %254 : vector<32x128xf32>
    %256 = arith.mulf %255, %255 : vector<32x128xf32>
    %cst_106 = arith.constant dense<0.000000e+00> : vector<32xf32>
    %257 = vector.multi_reduction <add>, %256, %cst_106 [1] : vector<32x128xf32> to vector<32xf32>
    %258 = vector.shape_cast %257 : vector<32xf32> to vector<32x1xf32>
    %cst_107 = arith.constant 1.280000e+02 : f32
    %259 = vector.broadcast %cst_107 : f32 to vector<32x1xf32>
    %260 = arith.divf %258, %259 : vector<32x1xf32>
    %261 = vector.broadcast %253 : vector<32x1xf32> to vector<32x128xf32>
    %262 = arith.subf %245, %261 : vector<32x128xf32>
    %cst_108 = arith.constant 9.99999996E-13 : f32
    %263 = vector.broadcast %cst_108 : f32 to vector<32x1xf32>
    %264 = arith.addf %260, %263 : vector<32x1xf32>
    %265 = math.rsqrt %264 : vector<32x1xf32>
    %266 = vector.broadcast %265 : vector<32x1xf32> to vector<32x128xf32>
    %267 = arith.mulf %262, %266 : vector<32x128xf32>
    %268 = vector.broadcast %247 : vector<1x128xf32> to vector<32x128xf32>
    %269 = arith.mulf %267, %268 : vector<32x128xf32>
    %270 = vector.broadcast %249 : vector<1x128xf32> to vector<32x128xf32>
    %271 = arith.addf %269, %270 : vector<32x128xf32>
    %272 = arith.truncf %271 : vector<32x128xf32> to vector<32x128xbf16>
    %c1_109 = arith.constant 1 : index
    %c0_110 = arith.constant 0 : index
    %c0_111 = arith.constant 0 : index
    %273 = vector.load %arg11[%c1_109, %c0_110, %c0_111] : memref<2x128x256xbf16, #tpu.memory_space<vmem>>, vector<1x128x256xbf16>
    %274 = vector.shape_cast %273 : vector<1x128x256xbf16> to vector<128x256xbf16>
    %cst_112 = arith.constant dense<0.000000e+00> : vector<32x256xf32>
    %275 = tpu.matmul %272, %274, %cst_112 {dimension_numbers = #tpu.dot_dimension_numbers<[1], [0], [0], [1], [0, 0, 1, 1], [], []>} : vector<32x128xbf16>, vector<128x256xbf16>, vector<32x256xf32> -> vector<32x256xf32>
    %c1_113 = arith.constant 1 : index
    %c0_114 = arith.constant 0 : index
    %c0_115 = arith.constant 0 : index
    %276 = vector.load %arg12[%c1_113, %c0_114, %c0_115] : memref<2x1x256xf32, #tpu.memory_space<vmem>>, vector<1x1x256xf32>
    %277 = vector.shape_cast %276 : vector<1x1x256xf32> to vector<1x256xf32>
    %278 = vector.broadcast %277 : vector<1x256xf32> to vector<32x256xf32>
    %279 = arith.addf %275, %278 : vector<32x256xf32>
    %cst_116 = arith.constant 5.000000e-01 : f32
    %280 = vector.broadcast %cst_116 : f32 to vector<32x256xf32>
    %281 = arith.mulf %280, %279 : vector<32x256xf32>
    %cst_117 = arith.constant 0.707106769 : f32
    %282 = vector.broadcast %cst_117 : f32 to vector<32x256xf32>
    %283 = arith.mulf %279, %282 : vector<32x256xf32>
    %284 = math.absf %283 : vector<32x256xf32>
    %cst_118 = arith.constant 0.327591091 : f32
    %285 = vector.broadcast %cst_118 : f32 to vector<32x256xf32>
    %286 = arith.mulf %285, %284 : vector<32x256xf32>
    %cst_119 = arith.constant 1.000000e+00 : f32
    %287 = vector.broadcast %cst_119 : f32 to vector<32x256xf32>
    %288 = arith.addf %287, %286 : vector<32x256xf32>
    %289 = tpu.reciprocal %288 {approx = true} : vector<32x256xf32> -> vector<32x256xf32>
    %cst_120 = arith.constant 1.06140542 : f32
    %290 = vector.broadcast %cst_120 : f32 to vector<32x256xf32>
    %291 = arith.mulf %290, %289 : vector<32x256xf32>
    %cst_121 = arith.constant -1.45315206 : f32
    %292 = vector.broadcast %cst_121 : f32 to vector<32x256xf32>
    %293 = arith.addf %291, %292 : vector<32x256xf32>
    %294 = arith.mulf %293, %289 : vector<32x256xf32>
    %cst_122 = arith.constant 1.42141378 : f32
    %295 = vector.broadcast %cst_122 : f32 to vector<32x256xf32>
    %296 = arith.addf %294, %295 : vector<32x256xf32>
    %297 = arith.mulf %296, %289 : vector<32x256xf32>
    %cst_123 = arith.constant -0.284496725 : f32
    %298 = vector.broadcast %cst_123 : f32 to vector<32x256xf32>
    %299 = arith.addf %297, %298 : vector<32x256xf32>
    %300 = arith.mulf %299, %289 : vector<32x256xf32>
    %cst_124 = arith.constant 0.254829586 : f32
    %301 = vector.broadcast %cst_124 : f32 to vector<32x256xf32>
    %302 = arith.addf %300, %301 : vector<32x256xf32>
    %303 = arith.mulf %302, %289 : vector<32x256xf32>
    %cst_125 = arith.constant 0.000000e+00 : f32
    %304 = vector.broadcast %cst_125 : f32 to vector<32x256xf32>
    %305 = arith.subf %304, %284 : vector<32x256xf32>
    %306 = arith.mulf %305, %284 : vector<32x256xf32>
    %307 = math.exp %306 : vector<32x256xf32>
    %308 = arith.mulf %303, %307 : vector<32x256xf32>
    %cst_126 = arith.constant 1.000000e+00 : f32
    %309 = vector.broadcast %cst_126 : f32 to vector<32x256xf32>
    %310 = arith.subf %309, %308 : vector<32x256xf32>
    %cst_127 = arith.constant 0.000000e+00 : f32
    %311 = vector.broadcast %cst_127 : f32 to vector<32x256xf32>
    %312 = arith.cmpf oge, %283, %311 : vector<32x256xf32>
    %cst_128 = arith.constant 0.000000e+00 : f32
    %313 = vector.broadcast %cst_128 : f32 to vector<32x256xf32>
    %314 = arith.subf %313, %310 : vector<32x256xf32>
    %315 = arith.select %312, %310, %314 : vector<32x256xi1>, vector<32x256xf32>
    %cst_129 = arith.constant 1.000000e+00 : f32
    %316 = vector.broadcast %cst_129 : f32 to vector<32x256xf32>
    %317 = arith.addf %316, %315 : vector<32x256xf32>
    %318 = arith.mulf %281, %317 : vector<32x256xf32>
    %319 = arith.truncf %318 : vector<32x256xf32> to vector<32x256xbf16>
    %c1_130 = arith.constant 1 : index
    %c0_131 = arith.constant 0 : index
    %c0_132 = arith.constant 0 : index
    %320 = vector.load %arg13[%c1_130, %c0_131, %c0_132] : memref<2x256x128xbf16, #tpu.memory_space<vmem>>, vector<1x256x128xbf16>
    %321 = vector.shape_cast %320 : vector<1x256x128xbf16> to vector<256x128xbf16>
    %cst_133 = arith.constant dense<0.000000e+00> : vector<32x128xf32>
    %322 = tpu.matmul %319, %321, %cst_133 {dimension_numbers = #tpu.dot_dimension_numbers<[1], [0], [0], [1], [0, 0, 1, 1], [], []>} : vector<32x256xbf16>, vector<256x128xbf16>, vector<32x128xf32> -> vector<32x128xf32>
    %c1_134 = arith.constant 1 : index
    %c0_135 = arith.constant 0 : index
    %c0_136 = arith.constant 0 : index
    %323 = vector.load %arg14[%c1_134, %c0_135, %c0_136] : memref<2x1x128xf32, #tpu.memory_space<vmem>>, vector<1x1x128xf32>
    %324 = vector.shape_cast %323 : vector<1x1x128xf32> to vector<1x128xf32>
    %325 = vector.broadcast %324 : vector<1x128xf32> to vector<32x128xf32>
    %326 = arith.addf %322, %325 : vector<32x128xf32>
    %327 = arith.addf %326, %271 : vector<32x128xf32>
    %c1_137 = arith.constant 1 : index
    %c0_138 = arith.constant 0 : index
    %c0_139 = arith.constant 0 : index
    %328 = vector.load %arg15[%c1_137, %c0_138, %c0_139] : memref<2x1x128xf32, #tpu.memory_space<vmem>>, vector<1x1x128xf32>
    %329 = vector.shape_cast %328 : vector<1x1x128xf32> to vector<1x128xf32>
    %c1_140 = arith.constant 1 : index
    %c0_141 = arith.constant 0 : index
    %c0_142 = arith.constant 0 : index
    %330 = vector.load %arg16[%c1_140, %c0_141, %c0_142] : memref<2x1x128xf32, #tpu.memory_space<vmem>>, vector<1x1x128xf32>
    %331 = vector.shape_cast %330 : vector<1x1x128xf32> to vector<1x128xf32>
    %cst_143 = arith.constant dense<0.000000e+00> : vector<32xf32>
    %332 = vector.multi_reduction <add>, %327, %cst_143 [1] : vector<32x128xf32> to vector<32xf32>
    %333 = vector.shape_cast %332 : vector<32xf32> to vector<32x1xf32>
    %cst_144 = arith.constant 1.280000e+02 : f32
    %334 = vector.broadcast %cst_144 : f32 to vector<32x1xf32>
    %335 = arith.divf %333, %334 : vector<32x1xf32>
    %336 = vector.broadcast %335 : vector<32x1xf32> to vector<32x128xf32>
    %337 = arith.subf %327, %336 : vector<32x128xf32>
    %338 = arith.mulf %337, %337 : vector<32x128xf32>
    %cst_145 = arith.constant dense<0.000000e+00> : vector<32xf32>
    %339 = vector.multi_reduction <add>, %338, %cst_145 [1] : vector<32x128xf32> to vector<32xf32>
    %340 = vector.shape_cast %339 : vector<32xf32> to vector<32x1xf32>
    %cst_146 = arith.constant 1.280000e+02 : f32
    %341 = vector.broadcast %cst_146 : f32 to vector<32x1xf32>
    %342 = arith.divf %340, %341 : vector<32x1xf32>
    %343 = vector.broadcast %335 : vector<32x1xf32> to vector<32x128xf32>
    %344 = arith.subf %327, %343 : vector<32x128xf32>
    %cst_147 = arith.constant 9.99999996E-13 : f32
    %345 = vector.broadcast %cst_147 : f32 to vector<32x1xf32>
    %346 = arith.addf %342, %345 : vector<32x1xf32>
    %347 = math.rsqrt %346 : vector<32x1xf32>
    %348 = vector.broadcast %347 : vector<32x1xf32> to vector<32x128xf32>
    %349 = arith.mulf %344, %348 : vector<32x128xf32>
    %350 = vector.broadcast %329 : vector<1x128xf32> to vector<32x128xf32>
    %351 = arith.mulf %349, %350 : vector<32x128xf32>
    %352 = vector.broadcast %331 : vector<1x128xf32> to vector<32x128xf32>
    %353 = arith.addf %351, %352 : vector<32x128xf32>
    %c0_148 = arith.constant 0 : index
    %c0_149 = arith.constant 0 : index
    %354 = vector.load %arg1[%c0_148, %c0_149] : memref<32x1xf32, #tpu.memory_space<vmem>>, vector<32x1xf32>
    %355 = vector.extract_strided_slice %353 {offsets = [0, 0], sizes = [8, 128], strides = [1, 1]} : vector<32x128xf32> to vector<8x128xf32>
    %356 = vector.extract_strided_slice %354 {offsets = [0, 0], sizes = [8, 1], strides = [1, 1]} : vector<32x1xf32> to vector<8x1xf32>
    %357 = vector.broadcast %356 : vector<8x1xf32> to vector<8x128xf32>
    %358 = arith.mulf %355, %357 : vector<8x128xf32>
    %cst_150 = arith.constant dense<0.000000e+00> : vector<128xf32>
    %359 = vector.multi_reduction <add>, %358, %cst_150 [0] : vector<8x128xf32> to vector<128xf32>
    %360 = vector.shape_cast %359 : vector<128xf32> to vector<1x128xf32>
    %cst_151 = arith.constant dense<0.000000e+00> : vector<1xf32>
    %361 = vector.multi_reduction <add>, %356, %cst_151 [0] : vector<8x1xf32> to vector<1xf32>
    %362 = vector.shape_cast %361 : vector<1xf32> to vector<1x1xf32>
    %cst_152 = arith.constant 9.99999971E-10 : f32
    %363 = vector.broadcast %cst_152 : f32 to vector<1x1xf32>
    %364 = arith.maximumf %362, %363 : vector<1x1xf32>
    %365 = tpu.reciprocal %364 {approx = true} : vector<1x1xf32> -> vector<1x1xf32>
    %366 = vector.broadcast %365 : vector<1x1xf32> to vector<1x128xf32>
    %367 = arith.mulf %360, %366 : vector<1x128xf32>
    %368 = vector.extract_strided_slice %353 {offsets = [8, 0], sizes = [8, 128], strides = [1, 1]} : vector<32x128xf32> to vector<8x128xf32>
    %369 = vector.extract_strided_slice %354 {offsets = [8, 0], sizes = [8, 1], strides = [1, 1]} : vector<32x1xf32> to vector<8x1xf32>
    %370 = vector.broadcast %369 : vector<8x1xf32> to vector<8x128xf32>
    %371 = arith.mulf %368, %370 : vector<8x128xf32>
    %cst_153 = arith.constant dense<0.000000e+00> : vector<128xf32>
    %372 = vector.multi_reduction <add>, %371, %cst_153 [0] : vector<8x128xf32> to vector<128xf32>
    %373 = vector.shape_cast %372 : vector<128xf32> to vector<1x128xf32>
    %cst_154 = arith.constant dense<0.000000e+00> : vector<1xf32>
    %374 = vector.multi_reduction <add>, %369, %cst_154 [0] : vector<8x1xf32> to vector<1xf32>
    %375 = vector.shape_cast %374 : vector<1xf32> to vector<1x1xf32>
    %cst_155 = arith.constant 9.99999971E-10 : f32
    %376 = vector.broadcast %cst_155 : f32 to vector<1x1xf32>
    %377 = arith.maximumf %375, %376 : vector<1x1xf32>
    %378 = tpu.reciprocal %377 {approx = true} : vector<1x1xf32> -> vector<1x1xf32>
    %379 = vector.broadcast %378 : vector<1x1xf32> to vector<1x128xf32>
    %380 = arith.mulf %373, %379 : vector<1x128xf32>
    %381 = vector.extract_strided_slice %353 {offsets = [16, 0], sizes = [8, 128], strides = [1, 1]} : vector<32x128xf32> to vector<8x128xf32>
    %382 = vector.extract_strided_slice %354 {offsets = [16, 0], sizes = [8, 1], strides = [1, 1]} : vector<32x1xf32> to vector<8x1xf32>
    %383 = vector.broadcast %382 : vector<8x1xf32> to vector<8x128xf32>
    %384 = arith.mulf %381, %383 : vector<8x128xf32>
    %cst_156 = arith.constant dense<0.000000e+00> : vector<128xf32>
    %385 = vector.multi_reduction <add>, %384, %cst_156 [0] : vector<8x128xf32> to vector<128xf32>
    %386 = vector.shape_cast %385 : vector<128xf32> to vector<1x128xf32>
    %cst_157 = arith.constant dense<0.000000e+00> : vector<1xf32>
    %387 = vector.multi_reduction <add>, %382, %cst_157 [0] : vector<8x1xf32> to vector<1xf32>
    %388 = vector.shape_cast %387 : vector<1xf32> to vector<1x1xf32>
    %cst_158 = arith.constant 9.99999971E-10 : f32
    %389 = vector.broadcast %cst_158 : f32 to vector<1x1xf32>
    %390 = arith.maximumf %388, %389 : vector<1x1xf32>
    %391 = tpu.reciprocal %390 {approx = true} : vector<1x1xf32> -> vector<1x1xf32>
    %392 = vector.broadcast %391 : vector<1x1xf32> to vector<1x128xf32>
    %393 = arith.mulf %386, %392 : vector<1x128xf32>
    %394 = vector.extract_strided_slice %353 {offsets = [24, 0], sizes = [8, 128], strides = [1, 1]} : vector<32x128xf32> to vector<8x128xf32>
    %395 = vector.extract_strided_slice %354 {offsets = [24, 0], sizes = [8, 1], strides = [1, 1]} : vector<32x1xf32> to vector<8x1xf32>
    %396 = vector.broadcast %395 : vector<8x1xf32> to vector<8x128xf32>
    %397 = arith.mulf %394, %396 : vector<8x128xf32>
    %cst_159 = arith.constant dense<0.000000e+00> : vector<128xf32>
    %398 = vector.multi_reduction <add>, %397, %cst_159 [0] : vector<8x128xf32> to vector<128xf32>
    %399 = vector.shape_cast %398 : vector<128xf32> to vector<1x128xf32>
    %cst_160 = arith.constant dense<0.000000e+00> : vector<1xf32>
    %400 = vector.multi_reduction <add>, %395, %cst_160 [0] : vector<8x1xf32> to vector<1xf32>
    %401 = vector.shape_cast %400 : vector<1xf32> to vector<1x1xf32>
    %cst_161 = arith.constant 9.99999971E-10 : f32
    %402 = vector.broadcast %cst_161 : f32 to vector<1x1xf32>
    %403 = arith.maximumf %401, %402 : vector<1x1xf32>
    %404 = tpu.reciprocal %403 {approx = true} : vector<1x1xf32> -> vector<1x1xf32>
    %405 = vector.broadcast %404 : vector<1x1xf32> to vector<1x128xf32>
    %406 = arith.mulf %399, %405 : vector<1x128xf32>
    %407 = tpu.concatenate %367, %380, %393, %406 in 0 : vector<1x128xf32>, vector<1x128xf32>, vector<1x128xf32>, vector<1x128xf32> -> vector<4x128xf32>
    %c0_162 = arith.constant 0 : index
    %c0_163 = arith.constant 0 : index
    %408 = vector.load %arg17[%c0_162, %c0_163] : memref<4x128xf32, #tpu.memory_space<vmem>>, vector<4x128xf32>
    tpu.vector_store %arg17[%c0_162, %c0_163], %407 {strides = array<i32>} : memref<4x128xf32, #tpu.memory_space<vmem>>, vector<4x128xf32>,
    return
  }
}

</mosaic_0001>

<bundles_post_ra>
// kernel: siamese_sbert_forward.1
= control target key start
LH: loop header
LB: loop body
LE: loop exit
PB: predicated region body
PF: predicated region fallthrough
CT: control target
= control target key end

     0   :  { %v4963_v39 = vmov 0   ;;  %vm585_vm0 = vcmask 261120   ;;  %s4964_s29 = smov 32   ;;  %s4966_s30 = smov 96   ;;  %vm1032_vm1 = vcmask 523264   ;;  %vm1037_vm2 = vcmask 785408   ;;  %s6438_s0 = inlined_call_operand.vmem [shape: f32[32,128], index: 0, kind: input, shape index: {}]   ;;  %s6439_s5 = inlined_call_operand.vmem [shape: bf16[2,128,384], index: 5, kind: input, shape index: {}]   ;;  %s6440_s3 = inlined_call_operand.vmem [shape: f32[1,128], index: 3, kind: input, shape index: {}]   ;;  %s6441_s4 = inlined_call_operand.vmem [shape: f32[1,128], index: 4, kind: input, shape index: {}]   ;;  %s6442_s6 = inlined_call_operand.vmem [shape: f32[2,1,384], index: 6, kind: input, shape index: {}]   ;;  %s6443_s2 = inlined_call_operand.vmem [shape: f32[128,128], index: 2, kind: input, shape index: {}]   ;;  %s6444_s7 = inlined_call_operand.vmem [shape: bf16[2,128,128], index: 7, kind: input, shape index: {}]   ;;  %s6445_s8 = inlined_call_operand.vmem [shape: f32[2,1,128], index: 8, kind: input, shape index: {}]   ;;  %s6446_s11 = inlined_call_operand.vmem [shape: bf16[2,128,256], index: 11, kind: input, shape index: {}]   ;;  %s6447_s9 = inlined_call_operand.vmem [shape: f32[2,1,128], index: 9, kind: input, shape index: {}]   ;;  %s6448_s10 = inlined_call_operand.vmem [shape: f32[2,1,128], index: 10, kind: input, shape index: {}]   ;;  %s6449_s13 = inlined_call_operand.vmem [shape: bf16[2,256,128], index: 13, kind: input, shape index: {}]   ;;  %s6450_s12 = inlined_call_operand.vmem [shape: f32[2,1,256], index: 12, kind: input, shape index: {}]   ;;  %s6451_s14 = inlined_call_operand.vmem [shape: f32[2,1,128], index: 14, kind: input, shape index: {}]   ;;  %s6452_s15 = inlined_call_operand.vmem [shape: f32[2,1,128], index: 15, kind: input, shape index: {}]   ;;  %s6453_s16 = inlined_call_operand.vmem [shape: f32[2,1,128], index: 16, kind: input, shape index: {}]   ;;  %s6454_s1 = inlined_call_operand.vmem [shape: f32[32,1], index: 1, kind: input, shape index: {}]   ;;  %s6455_s17 = inlined_call_operand.vmem [shape: f32[4,128], index: 17, kind: output, shape index: {}]  }
   0x1   :  { %6458 = sst [smem:[#allocation2_spill]] %s6438_s0  ;;  %355 = vmatprep.mubr.bf16.mxu0 %v4963_v39  ;;  %4546 = vset.pattern.permute.xlu1 %v4963_v39  ;;  %v3715_v59 = vld [vmem:[%s6440_s3] ss:$0 sm:$0xff]  ;;  %s4965_s0 = smov 64  }
   0x2   :  { %6459 = sst [smem:[#allocation3_spill]] %s6439_s5  ;;  %4545 = vset.pattern.permute.xlu0 %v4963_v39 }
   0x3   :  { %s6460_s26 = sld [smem:[#allocation2_spill]] }
   0x4   :  { %s6461_s20 = sld [smem:[#allocation3_spill]] }
   0x9   :  { %v57_v0 = vld [vmem:[%s6460_s26] sm:$0xff]  ;;  %v59_v1 = vld [vmem:[%s6460_s26 + $0x10] sm:$0xff]  ;;  %v58_v2 = vld [vmem:[%s6460_s26 + $0x8] sm:$0xff] }
   0xa   :  { %63 = vadd.xlane.f32.xlu0 %v57_v0  ;;  %67 = vadd.xlane.f32.xlu1 %v59_v1  ;;  %v60_v3 = vld [vmem:[%s6460_s26 + $0x18] sm:$0xff]  ;;  %v4549_v5 = vld [vmem:[%s6461_s20 + $0xa8] ss:$12 sps:$4 sm:$0xff]   ;;  %v4558_v28 = vld [vmem:[%s6461_s20 + $0x64] ss:$12 sps:$4 sm:$0xff]  }
   0xb   :  { %v4547_v4 = vld [vmem:[%s6461_s20 + $0xac] ss:$12 sps:$4 sm:$0xff]   ;;  %v4550_v22 = vld [vmem:[%s6461_s20 + $0x94] ss:$12 sps:$4 sm:$0xff]   ;;  %v4552_v23 = vld [vmem:[%s6461_s20 + $0xb0] ss:$12 sps:$4 sm:$0xff]  }
   0xc   :  { %323 = vmatprep.subr.bf16.mxu0 %v4547_v4  ;;  %v4553_v24 = vld [vmem:[%s6461_s20 + $0x90] ss:$12 sps:$4 sm:$0xff]   ;;  %4137 = vmatprep.subr.bf16.mxu1 %v4552_v23  ;;  %v4556_v26 = vld [vmem:[%s6461_s20 + $0x98] ss:$12 sps:$4 sm:$0xff]   ;;  %v4560_v29 = vld [vmem:[%s6461_s20 + $0x80] ss:$12 sps:$4 sm:$0xff]  }
   0xd   :  { %324 = vmatpush1.bf16.msra.mxu0 %v4549_v5  ;;  %4138 = vmatpush3.bf16.msra.mxu1 %v4552_v23  ;;  %v4554_v25 = vld [vmem:[%s6461_s20 + $0x7c] ss:$12 sps:$4 sm:$0xff]   ;;  %v4557_v27 = vld [vmem:[%s6461_s20 + $0x78] ss:$12 sps:$4 sm:$0xff]   ;;  %v4561_v30 = vld [vmem:[%s6461_s20 + $0x60] ss:$12 sps:$4 sm:$0xff]  }
   0xe   :  { %65 = vadd.xlane.f32.xlu0 %v58_v2  ;;  %69 = vadd.xlane.f32.xlu1 %v60_v3  ;;  %v4562_v31 = vld [vmem:[%s6461_s20 + $0x4c] ss:$12 sps:$4 sm:$0xff]   ;;  %v4564_v32 = vld [vmem:[%s6461_s20 + $0x68] ss:$12 sps:$4 sm:$0xff]   ;;  %v4568_v35 = vld [vmem:[%s6461_s20 + $0x50] ss:$12 sps:$4 sm:$0xff]  }
   0xf   :  { %325 = vmatprep.subr.bf16.mxu0 %v4550_v22  ;;  %4139 = vmatprep.subr.bf16.mxu1 %v4556_v26  ;;  %v4565_v33 = vld [vmem:[%s6461_s20 + $0x48] ss:$12 sps:$4 sm:$0xff]   ;;  %v4569_v36 = vld [vmem:[%s6461_s20 + $0x30] ss:$12 sps:$4 sm:$0xff]   ;;  %v4572_v38 = vld [vmem:[%s6461_s20 + $0x38] ss:$12 sps:$4 sm:$0xff]  }
  0x10   :  { %v4566_v34 = vld [vmem:[%s6461_s20 + $0x34] ss:$12 sps:$4 sm:$0xff]   ;;  %v4570_v37 = vld [vmem:[%s6461_s20 + $0x1c] ss:$12 sps:$4 sm:$0xff]   ;;  %v4573_v40 = vld [vmem:[%s6461_s20 + $0x18] ss:$12 sps:$4 sm:$0xff]  }
  0x11   :  { %326 = vmatpush1.bf16.msra.mxu0 %v4553_v24  ;;  %4140 = vmatpush3.bf16.msra.mxu1 %v4556_v26  ;;  %v4574_v41 = vld [vmem:[%s6461_s20 + $0x4] ss:$12 sps:$4 sm:$0xff]   ;;  %v4576_v42 = vld [vmem:[%s6461_s20 + $0x20] ss:$12 sps:$4 sm:$0xff]   ;;  %v4578_v44 = vld [vmem:[%s6461_s20 + $0x8] ss:$12 sps:$4 sm:$0xff]  }
  0x12   :  { %327 = vmatprep.subr.bf16.mxu0 %v4554_v25  ;;  %4141 = vmatprep.subr.bf16.mxu1 %v4560_v29  ;;  %v4577_v43 = vld [vmem:[%s6461_s20] ss:$12 sps:$4 sm:$0xff]  }
  0x15   :  { %328 = vmatpush1.bf16.msra.mxu0 %v4557_v27  ;;  %4142 = vmatpush3.bf16.msra.mxu1 %v4560_v29 }
  0x16   :  { %329 = vmatprep.subr.bf16.mxu0 %v4558_v28  ;;  %4143 = vmatprep.subr.bf16.mxu1 %v4564_v32 }
  0x19   :  { %330 = vmatpush1.bf16.msra.mxu0 %v4561_v30  ;;  %4144 = vmatpush3.bf16.msra.mxu1 %v4564_v32 }
  0x1a   :  { %331 = vmatprep.subr.bf16.mxu0 %v4562_v31  ;;  %4145 = vmatprep.subr.bf16.mxu1 %v4568_v35 }
  0x1d   :  { %332 = vmatpush1.bf16.msra.mxu0 %v4565_v33  ;;  %4146 = vmatpush3.bf16.msra.mxu1 %v4568_v35 }
  0x1e   :  { %333 = vmatprep.subr.bf16.mxu0 %v4566_v34  ;;  %4147 = vmatprep.subr.bf16.mxu1 %v4572_v38 }
  0x21   :  { %334 = vmatpush1.bf16.msra.mxu0 %v4569_v36  ;;  %4148 = vmatpush3.bf16.msra.mxu1 %v4572_v38 }
  0x22   :  { %335 = vmatprep.subr.bf16.mxu0 %v4570_v37  ;;  %4149 = vmatprep.subr.bf16.mxu1 %v4576_v42 }
  0x25   :  { %336 = vmatpush1.bf16.msra.mxu0 %v4573_v40  ;;  %4150 = vmatpush3.bf16.msra.mxu1 %v4576_v42 }
  0x26   :  { %337 = vmatprep.subr.bf16.mxu0 %v4574_v41  ;;  %4151 = vmatprep.subr.bf16.mxu1 %v4578_v44 }
  0x29   :  { %338 = vmatpush1.bf16.msra.mxu0 %v4577_v43  ;;  %4152 = vmatpush3.bf16.msra.mxu1 %v4578_v44 }
  0x93   :  { %v64_v6 = vpop.xlane.xlu0 %63  ;;  %v68_v7 = vpop.xlane.xlu1 %67 }
  0x94   :  { %v72_v8 = vmul.f32 0.0078125, %v64_v6  ;;  %v74_v9 = vmul.f32 0.0078125, %v68_v7 }
  0x96   :  { %v5075_v10 = vsub.f32 %v57_v0, %v72_v8  ;;  %v5077_v11 = vsub.f32 %v59_v1, %v74_v9  ;;  %v3716_v0 = vld [vmem:[%s6441_s4] ss:$0 sm:$0xff] }
  0x97   :  { %v66_v12 = vpop.xlane.xlu0 %65  ;;  %v70_v13 = vpop.xlane.xlu1 %69 }
  0x98   :  { %v73_v14 = vmul.f32 0.0078125, %v66_v12  ;;  %v80_v15 = vmul.f32 %v5075_v10, %v5075_v10  ;;  %v75_v16 = vmul.f32 0.0078125, %v70_v13  ;;  %v82_v17 = vmul.f32 %v5077_v11, %v5077_v11 }
  0x99   :  { %v180_v13 = vlaneseq }
  0x9a   :  { %84 = vadd.xlane.f32.xlu0 %v80_v15  ;;  %v5083_v18 = vsub.f32 %v58_v2, %v73_v14  ;;  %v5085_v19 = vsub.f32 %v60_v3, %v75_v16  ;;  %v178_v16 = vld [vmem:[%s6442_s6] sm:$0x7] }
  0x9b   :  { %v5183_v14 = vshrl.u32 %v180_v13, 7 }
  0x9c   :  { %v81_v20 = vmul.f32 %v5083_v18, %v5083_v18  ;;  %v83_v21 = vmul.f32 %v5085_v19, %v5085_v19 }
  0x9d   :  { %v5186_v15 = vsub.s32 0, %v5183_v14 }
  0x9e   :  { %88 = vadd.xlane.f32.xlu0 %v82_v17  ;;  %86 = vadd.xlane.f32.xlu1 %v81_v20 }
  0x9f   :  { %v183_v17 = vrot.slane %v178_v16, %v5186_v15 }
  0xa2   :  { %90 = vadd.xlane.f32.xlu1 %v83_v21  ;;  %v190_v21 = vsub.s32 2, %v5183_v14 }
  0xa4   :  { %v191_v27 = vrot.slane %v178_v16, %v190_v21 }
 0x123   :  { %v85_v45 = vpop.xlane.xlu0 %84 }
 0x124   :  { %v92_v46 = vmul.f32 0.0078125, %v85_v45 }
 0x126   :  { %v96_v47 = vadd.f32 1e-12, %v92_v46 }
 0x127   :  { %v87_v48 = vpop.xlane.xlu1 %86  ;;  %v89_v49 = vpop.xlane.xlu0 %88 }
 0x128   :  { %4707 = vrsqrt.f32 %v96_v47  ;;  %v93_v50 = vmul.f32 0.0078125, %v87_v48  ;;  %v94_v51 = vmul.f32 0.0078125, %v89_v49 }
 0x12a   :  { %v97_v52 = vadd.f32 1e-12, %v93_v50  ;;  %v98_v53 = vadd.f32 1e-12, %v94_v51 }
 0x12b   :  { %v91_v54 = vpop.xlane.xlu1 %90 }
 0x12c   :  { %4709 = vrsqrt.f32 %v97_v52  ;;  %v95_v55 = vmul.f32 0.0078125, %v91_v54 }
 0x12d   :  { %4711 = vrsqrt.f32 %v98_v53 }
 0x12e   :  { %v99_v56 = vadd.f32 1e-12, %v95_v55 }
 0x130   :  { %4713 = vrsqrt.f32 %v99_v56 }
 0x135   :  { %v4708_v57 = vpop.eup %4707 }
 0x136   :  { %v104_v58 = vmul.f32 %v4708_v57, %v5075_v10 }
 0x138   :  { %v114_v63 = vmul.f32 %v3715_v59, %v104_v58 }
 0x139   :  { %v4710_v60 = vpop.eup %4709 }
 0x13a   :  { %v4712_v61 = vpop.eup %4711  ;;  %v105_v62 = vmul.f32 %v4710_v60, %v5083_v18  ;;  %v5169_v4 = vadd.f32 %v3716_v0, %v114_v63  ;;  %v5193_v18 = vsub.s32 1, %v5183_v14 }
 0x13b   :  { %v106_v1 = vmul.f32 %v4712_v61, %v5077_v11 }
 0x13c   :  { %v115_v2 = vmul.f32 %v3715_v59, %v105_v62  ;;  %v187_v23 = vrot.slane %v178_v16, %v5193_v18 }
 0x13d   :  { %v4714_v3 = vpop.eup %4713  ;;  %v116_v7 = vmul.f32 %v3715_v59, %v106_v1 }
 0x13e   :  { %v5171_v5 = vadd.f32 %v3716_v0, %v115_v2  ;;  %v107_v6 = vmul.f32 %v4714_v3, %v5085_v19 }
 0x13f   :  { %v5176_v10 = vadd.f32 %v3716_v0, %v116_v7 }
 0x140   :  { %v144_v8 = vpack.c.bf16 %v5171_v5, %v5169_v4  ;;  %v117_v9 = vmul.f32 %v3715_v59, %v107_v6 }
 0x142   :  { %356 = vmatmul.mubr.bf16.vlgmr.msra.gmra.mxu0 %v144_v8  ;;  %4153 = vmatprep.mubr.bf16.mxu1 %v144_v8  ;;  %v5178_v12 = vadd.f32 %v3716_v0, %v117_v9 }
 0x143   :  { %365 = vmatprep.mubr.bf16.mxu0 %v4963_v39 }
 0x144   :  { %v145_v11 = vpack.c.bf16 %v5178_v12, %v5176_v10 }
 0x146   :  { %4154 = vmatmul.mubr.bf16.vlgmr.msra.gmra.mxu1 %v145_v11 }
 0x14a   :  { %366 = vmatmul.mubr.bf16.gmra.mxu0 %v145_v11 }
 0x202   :  { %v357_v19 = vpop.f32.mrf.mxu0 }
 0x203   :  { %v358_v22 = vadd.f32 %v357_v19, %v183_v17 }
 0x204   :  { %v359_v20 = vpop.f32.mrf.mxu0 }
 0x205   :  { %v545_v30 = vmul.f32 0.17677669, %v358_v22  ;;  %v360_v31 = vadd.f32 %v359_v20, %v187_v23 }
 0x206   :  { %v361_v24 = vpop.f32.mrf.mxu0  ;;  %v4155_v25 = vpop.f32.mrf.mxu1 }
 0x207   :  { %v362_v26 = vadd.f32 %v361_v24, %v183_v17  ;;  %v419_v40 = vadd.f32 %v4155_v25, %v191_v27 }
 0x208   :  { %v363_v28 = vpop.f32.mrf.mxu0  ;;  %v410_v29 = vpop.f32.mrf.mxu1 }
 0x209   :  { %v546_v32 = vmul.f32 0.17677669, %v362_v26  ;;  %v364_v33 = vadd.f32 %v363_v28, %v187_v23  ;;  %v411_v44 = vadd.f32 %v410_v29, %v191_v27 }
 0x20a   :  { %v367_v34 = vpop.f32.mrf.mxu0  ;;  %v4156_v35 = vpop.f32.mrf.mxu1 }
 0x20b   :  { %v422_v36 = vadd.f32 %v4156_v35, %v191_v27  ;;  %v4370_v37 = vpack.i.bf16 %v364_v33, %v360_v31  ;;  %v561_v38 = vpack.c.bf16 %v546_v32, %v545_v30  ;;  %v5199_v43 = vpack.c.bf16 %v364_v33, %v360_v31 }
 0x20c   :  { %v369_v41 = vpop.f32.mrf.mxu0  ;;  %v413_v42 = vpop.f32.mrf.mxu1  ;;  %v368_v45 = vadd.f32 %v367_v34, %v183_v17 }
 0x20d   :  { %v414_v46 = vadd.f32 %v413_v42, %v191_v27  ;;  %4371 = vrot.lane.b32.xlu1 %v4370_v37, %s4964_s29  ;;  %4173 = vmatprep.mubr.msk.bf16.mxu0 %vm585_vm0, %v561_v38  ;;  %v5203_v48 = vpack.c.bf16 %v422_v36, %v419_v40  ;;  %v370_v54 = vadd.f32 %v369_v41, %v187_v23 }
 0x20e   :  { %v371_v47 = vpop.f32.mrf.mxu0  ;;  %v5209_v53 = vmul.f32 0.17677669, %v368_v45  ;;  %v4395_v60 = vpack.i.bf16 %v422_v36, %v419_v40 }
 0x20f   :  { %v372_v49 = vadd.f32 %v371_v47, %v183_v17  ;;  %v5205_v50 = vpack.i.bf16 %v414_v46, %v411_v44  ;;  %v5207_v52 = vpack.c.bf16 %v414_v46, %v411_v44 }
 0x210   :  { %v373_v51 = vpop.f32.mrf.mxu0 }
 0x211   :  { %v5211_v55 = vmul.f32 0.17677669, %v372_v49  ;;  %v374_v56 = vadd.f32 %v373_v51, %v187_v23 }
 0x213   :  { %v562_v57 = vpack.c.bf16 %v5211_v55, %v5209_v53  ;;  %v4375_v58 = vpack.i.bf16 %v374_v56, %v370_v54  ;;  %v5215_v59 = vpack.c.bf16 %v374_v56, %v370_v54 }
 0x215   :  { %4376 = vrot.lane.b32.xlu1 %v4375_v58, %s4965_s0  ;;  %4366 = vrot.lane.b32.xlu0 %v4375_v58, %s4964_s29 }
 0x219   :  { %4381 = vrot.lane.b32.xlu1 %v4370_v37, %s4965_s0  ;;  %4386 = vrot.lane.b32.xlu0 %v4375_v58, %s4966_s30 }
 0x21d   :  { %4391 = vrot.lane.b32.xlu1 %v4370_v37, %s4966_s30  ;;  %429 = vrot.lane.b32.xlu0 %v358_v22, %s4966_s30 }
 0x221   :  { %431 = vrot.lane.b32.xlu1 %v362_v26, %s4966_s30  ;;  %433 = vrot.lane.b32.xlu0 %v368_v45, %s4966_s30 }
 0x225   :  { %435 = vrot.lane.b32.xlu1 %v372_v49, %s4966_s30  ;;  %441 = vrot.lane.b32.xlu0 %v358_v22, %s4965_s0 }
 0x229   :  { %443 = vrot.lane.b32.xlu1 %v362_v26, %s4965_s0  ;;  %445 = vrot.lane.b32.xlu0 %v368_v45, %s4965_s0 }
 0x22d   :  { %447 = vrot.lane.b32.xlu1 %v372_v49, %s4965_s0  ;;  %453 = vrot.lane.b32.xlu0 %v358_v22, %s4964_s29 }
 0x231   :  { %455 = vrot.lane.b32.xlu1 %v362_v26, %s4964_s29  ;;  %457 = vrot.lane.b32.xlu0 %v368_v45, %s4964_s29 }
 0x235   :  { %459 = vrot.lane.b32.xlu1 %v372_v49, %s4964_s29  ;;  %4396 = vrot.lane.b32.xlu0 %v4395_v60, %s4964_s29 }
 0x239   :  { %4401 = vrot.lane.b32.xlu1 %v5205_v50, %s4964_s29  ;;  %4406 = vrot.lane.b32.xlu0 %v4395_v60, %s4965_s0 }
 0x23d   :  { %4411 = vrot.lane.b32.xlu1 %v5205_v50, %s4965_s0  ;;  %4416 = vrot.lane.b32.xlu0 %v4395_v60, %s4966_s30 }
 0x27f   :  { %v4372_v61 = vpop.permute.xlu1 %4371 }
 0x280   :  { %v4374_v2 = vunpack.i.h.bf16 %v4372_v61  ;;  %v4373_v3 = vunpack.i.l.bf16 %v4372_v61 }
 0x282   :  { %v575_v9 = vpack.c.bf16 %v4374_v2, %v4373_v3 }
 0x284   :  { %v629_v24 = vsel %vm585_vm0, %v575_v9, 0 }
 0x287   :  { %v4377_v62 = vpop.permute.xlu1 %4376  ;;  %v4367_v63 = vpop.permute.xlu0 %4366 }
 0x288   :  { %v4369_v0 = vunpack.i.h.bf16 %v4367_v63  ;;  %v4368_v1 = vunpack.i.l.bf16 %v4367_v63  ;;  %v4379_v17 = vunpack.i.h.bf16 %v4377_v62  ;;  %v4378_v19 = vunpack.i.l.bf16 %v4377_v62 }
 0x28a   :  { %v576_v6 = vpack.c.bf16 %v4369_v0, %v4368_v1  ;;  %v574_v23 = vpack.c.bf16 %v4379_v17, %v4378_v19 }
 0x28b   :  { %v4382_v7 = vpop.permute.xlu1 %4381  ;;  %v4387_v8 = vpop.permute.xlu0 %4386 }
 0x28c   :  { %4345 = vmatprep.subr.msk.bf16.mxu0 %vm585_vm0, %v576_v6  ;;  %v632_v11 = vsel %vm585_vm0, %v576_v6, 0  ;;  %v4384_v27 = vunpack.i.h.bf16 %v4382_v7  ;;  %v4383_v28 = vunpack.i.l.bf16 %v4382_v7  ;;  %v626_v32 = vsel %vm585_vm0, %v574_v23, 0 }
 0x28d   :  { %4158 = vmatpush3.bf16.xpose.msra.mxu0 %v632_v11  ;;  %v4389_v35 = vunpack.i.h.bf16 %v4387_v8  ;;  %v4388_v36 = vunpack.i.l.bf16 %v4387_v8 }
 0x28e   :  { %4346 = vmatprep.subr.msk.bf16.mxu0 %vm585_vm0, %v575_v9  ;;  %v573_v31 = vpack.c.bf16 %v4384_v27, %v4383_v28 }
 0x28f   :  { %v4392_v13 = vpop.permute.xlu1 %4391  ;;  %v5244_v16 = vpop.permute.xlu0 %429  ;;  %v572_v40 = vpack.c.bf16 %v4389_v35, %v4388_v36 }
 0x290   :  { %v623_v41 = vsel %vm585_vm0, %v573_v31, 0  ;;  %v4394_v47 = vunpack.i.h.bf16 %v4392_v13  ;;  %v4393_v49 = vunpack.i.l.bf16 %v4392_v13  ;;  %v549_v28 = vmul.f32 0.17677669, %v5244_v16 }
 0x291   :  { %v620_v0 = vsel %vm585_vm0, %v572_v40, 0 }
 0x292   :  { %v571_v63 = vpack.c.bf16 %v4394_v47, %v4393_v49  ;;  %v129_v47 = vld [vmem:[%s6443_s2 + $0x8] sm:$0xff]  ;;  %v134_v49 = vld [vmem:[%s6443_s2 + $0x30] sm:$0xff] }
 0x293   :  { %v5246_v20 = vpop.permute.xlu1 %431  ;;  %v5248_v22 = vpop.permute.xlu0 %433 }
 0x294   :  { %v617_v17 = vsel %vm585_vm0, %v571_v63, 0  ;;  %v550_v27 = vmul.f32 0.17677669, %v5246_v20  ;;  %v551_v35 = vmul.f32 0.17677669, %v5248_v22 }
 0x295   :  { %4160 = vmatpush3.bf16.xpose.msra.mxu0 %v629_v24  ;;  %v611_v24 = vsel %vm585_vm0, %v5199_v43, 0 }
 0x296   :  { %4347 = vmatprep.subr.msk.bf16.mxu0 %vm585_vm0, %v574_v23  ;;  %v614_v23 = vsel %vm585_vm0, %v5215_v59, 0 }
 0x297   :  { %v5252_v25 = vpop.permute.xlu1 %435  ;;  %v5254_v26 = vpop.permute.xlu0 %441 }
 0x29b   :  { %v5256_v29 = vpop.permute.xlu1 %443  ;;  %v5258_v30 = vpop.permute.xlu0 %445 }
 0x29d   :  { %4162 = vmatpush3.bf16.xpose.msra.mxu0 %v626_v32  ;;  %v554_v32 = vmul.f32 0.17677669, %v5256_v29 }
 0x29e   :  { %4348 = vmatprep.subr.msk.bf16.mxu0 %vm585_vm0, %v573_v31  ;;  %v563_v31 = vpack.c.bf16 %v550_v27, %v549_v28  ;;  %v137_v27 = vld [vmem:[%s6443_s2 + $0x48] sm:$0xff] }
 0x29f   :  { %v5262_v33 = vpop.permute.xlu1 %447  ;;  %v5264_v34 = vpop.permute.xlu0 %453 }
 0x2a0   :  { %v556_v53 = vmul.f32 0.17677669, %v5262_v33  ;;  %v557_v16 = vmul.f32 0.17677669, %v5264_v34  ;;  %v128_v34 = vld [vmem:[%s6443_s2] sm:$0xff] }
 0x2a3   :  { %v5266_v37 = vpop.permute.xlu1 %455  ;;  %v5268_v38 = vpop.permute.xlu0 %457 }
 0x2a4   :  { %v558_v55 = vmul.f32 0.17677669, %v5266_v37 }
 0x2a5   :  { %4164 = vmatpush3.bf16.xpose.msra.mxu0 %v623_v41 }
 0x2a6   :  { %4349 = vmatprep.subr.msk.bf16.mxu0 %vm585_vm0, %v572_v40  ;;  %v567_v29 = vpack.c.bf16 %v558_v55, %v557_v16  ;;  %v141_v55 = vld [vmem:[%s6443_s2 + $0x68] sm:$0xff]  ;;  %v143_v16 = vld [vmem:[%s6443_s2 + $0x78] sm:$0xff] }
 0x2a7   :  { %v5272_v42 = vpop.permute.xlu1 %459  ;;  %v4397_v44 = vpop.permute.xlu0 %4396 }
 0x2a8   :  { %v4399_v45 = vunpack.i.h.bf16 %v4397_v44  ;;  %v4398_v46 = vunpack.i.l.bf16 %v4397_v44  ;;  %v560_v22 = vmul.f32 0.17677669, %v5272_v42 }
 0x2aa   :  { %v584_v51 = vpack.c.bf16 %v4399_v45, %v4398_v46 }
 0x2ab   :  { %v4402_v54 = vpop.permute.xlu1 %4401  ;;  %v4407_v56 = vpop.permute.xlu0 %4406 }
 0x2ac   :  { %v4404_v58 = vunpack.i.h.bf16 %v4402_v54  ;;  %v4403_v60 = vunpack.i.l.bf16 %v4402_v54  ;;  %v4409_v61 = vunpack.i.h.bf16 %v4407_v56  ;;  %v4408_v62 = vunpack.i.l.bf16 %v4407_v56  ;;  %4189 = vmatprep.subr.bf16.mxu1 %v584_v51 }
 0x2ad   :  { %4190 = vmatpush3.bf16.msra.mxu1 %v584_v51  ;;  %4166 = vmatpush3.bf16.xpose.msra.mxu0 %v620_v0 }
 0x2ae   :  { %v583_v1 = vpack.c.bf16 %v4404_v58, %v4403_v60  ;;  %4350 = vmatprep.subr.msk.bf16.mxu0 %vm585_vm0, %v571_v63  ;;  %v582_v7 = vpack.c.bf16 %v4409_v61, %v4408_v62  ;;  %v132_v60 = vld [vmem:[%s6443_s2 + $0x20] sm:$0xff]  ;;  %v135_v61 = vld [vmem:[%s6443_s2 + $0x38] sm:$0xff] }
 0x2af   :  { %v4412_v2 = vpop.permute.xlu1 %4411  ;;  %v4417_v8 = vpop.permute.xlu0 %4416 }
 0x2b0   :  { %v4414_v3 = vunpack.i.h.bf16 %v4412_v2  ;;  %v4413_v6 = vunpack.i.l.bf16 %v4412_v2  ;;  %4191 = vmatprep.subr.bf16.mxu1 %v583_v1  ;;  %v4419_v9 = vunpack.i.h.bf16 %v4417_v8  ;;  %v4418_v11 = vunpack.i.l.bf16 %v4417_v8  ;;  %v133_v2 = vld [vmem:[%s6443_s2 + $0x28] sm:$0xff] }
 0x2b1   :  { %4192 = vmatpush3.bf16.msra.mxu1 %v583_v1 }
 0x2b2   :  { %4193 = vmatprep.subr.bf16.mxu1 %v582_v7  ;;  %v581_v13 = vpack.c.bf16 %v4414_v3, %v4413_v6  ;;  %v580_v19 = vpack.c.bf16 %v4419_v9, %v4418_v11  ;;  %v138_v3 = vld [vmem:[%s6443_s2 + $0x50] sm:$0xff]  ;;  %v136_v11 = vld [vmem:[%s6443_s2 + $0x40] sm:$0xff] }
 0x2b5   :  { %4194 = vmatpush3.bf16.msra.mxu1 %v582_v7  ;;  %4168 = vmatpush3.bf16.xpose.msra.mxu0 %v617_v17 }
 0x2b6   :  { %4195 = vmatprep.subr.bf16.mxu1 %v581_v13  ;;  %4351 = vmatprep.subr.msk.bf16.mxu0 %vm585_vm0, %v5215_v59  ;;  %v552_v59 = vmul.f32 0.17677669, %v5252_v25 }
 0x2b8   :  { %v564_v36 = vpack.c.bf16 %v552_v59, %v551_v35  ;;  %v142_v59 = vld [vmem:[%s6443_s2 + $0x70] sm:$0xff] }
 0x2b9   :  { %4196 = vmatpush3.bf16.msra.mxu1 %v581_v13  ;;  %v139_v13 = vld [vmem:[%s6443_s2 + $0x58] sm:$0xff] }
 0x2ba   :  { %4197 = vmatprep.subr.bf16.mxu1 %v580_v19 }
 0x2bd   :  { %4198 = vmatpush3.bf16.msra.mxu1 %v580_v19  ;;  %4170 = vmatpush3.bf16.xpose.msra.mxu0 %v614_v23 }
 0x2be   :  { %4352 = vmatprep.subr.msk.bf16.mxu0 %vm585_vm0, %v5199_v43  ;;  %v553_v43 = vmul.f32 0.17677669, %v5254_v26  ;;  %v559_v26 = vmul.f32 0.17677669, %v5268_v38  ;;  %v131_v38 = vld [vmem:[%s6443_s2 + $0x18] sm:$0xff] }
 0x2c0   :  { %v565_v20 = vpack.c.bf16 %v554_v32, %v553_v43  ;;  %v568_v40 = vpack.c.bf16 %v560_v22, %v559_v26  ;;  %v140_v43 = vld [vmem:[%s6443_s2 + $0x60] sm:$0xff] }
 0x2c5   :  { %4172 = vmatpush3.bf16.xpose.msra.mxu0 %v611_v24 }
 0x2cc   :  { %4174 = vmatmul.mubr.msk.bf16.vlgmr.msra.gmra.mxu0 %vm585_vm0, %v562_v57  ;;  %v555_v57 = vmul.f32 0.17677669, %v5258_v30  ;;  %v130_v30 = vld [vmem:[%s6443_s2 + $0x10] sm:$0xff] }
 0x2cd   :  { %4177 = vmatprep.mubr.msk.bf16.mxu0 %vm585_vm0, %v563_v31 }
 0x2ce   :  { %v566_v25 = vpack.c.bf16 %v556_v53, %v555_v57 }
 0x2d4   :  { %4178 = vmatmul.mubr.msk.bf16.gmra.mxu0 %vm585_vm0, %v564_v36 }
 0x2d5   :  { %4181 = vmatprep.mubr.msk.bf16.mxu0 %vm585_vm0, %v565_v20 }
 0x2dc   :  { %4182 = vmatmul.mubr.msk.bf16.gmra.mxu0 %vm585_vm0, %v566_v25 }
 0x2dd   :  { %4185 = vmatprep.mubr.msk.bf16.mxu0 %vm585_vm0, %v567_v29 }
 0x2e4   :  { %4186 = vmatmul.mubr.msk.bf16.gmra.mxu0 %vm585_vm0, %v568_v40 }
 0x2e5   :  { %1376 = vmatprep.mubr.bf16.mxu0 %v4963_v39 }
 0x38c   :  { %v4175_v33 = vpop.f32.mrf.mxu0 }
 0x38d   :  { %v5314_v37 = vadd.f32 %v4175_v33, %v130_v30 }
 0x38e   :  { %v668_v41 = vpop.f32.mrf.mxu0 }
 0x38f   :  { %v5319_v42 = vadd.f32 %v668_v41, %v128_v34  ;;  %735 = vmax.xlane.f32.xlu0 %v5314_v37 }
 0x390   :  { %v4176_v44 = vpop.f32.mrf.mxu0 }
 0x391   :  { %v5322_v45 = vadd.f32 %v4176_v44, %v131_v38  ;;  %731 = vmax.xlane.f32.xlu1 %v5319_v42 }
 0x392   :  { %v671_v46 = vpop.f32.mrf.mxu0 }
 0x393   :  { %737 = vmax.xlane.f32.xlu0 %v5322_v45  ;;  %v672_v54 = vadd.f32 %v671_v46, %v129_v47 }
 0x394   :  { %v4179_v51 = vpop.f32.mrf.mxu0 }
 0x395   :  { %v693_v56 = vadd.f32 %v4179_v51, %v134_v49 }
 0x396   :  { %v684_v58 = vpop.f32.mrf.mxu0 }
 0x397   :  { %733 = vmax.xlane.f32.xlu0 %v672_v54  ;;  %743 = vmax.xlane.f32.xlu1 %v693_v56  ;;  %v685_v63 = vadd.f32 %v684_v58, %v132_v60 }
 0x398   :  { %v4180_v62 = vpop.f32.mrf.mxu0 }
 0x399   :  { %v696_v0 = vadd.f32 %v4180_v62, %v135_v61 }
 0x39a   :  { %v687_v1 = vpop.f32.mrf.mxu0 }
 0x39b   :  { %745 = vmax.xlane.f32.xlu0 %v696_v0  ;;  %739 = vmax.xlane.f32.xlu1 %v685_v63  ;;  %v688_v7 = vadd.f32 %v687_v1, %v133_v2 }
 0x39c   :  { %v4183_v6 = vpop.f32.mrf.mxu0 }
 0x39d   :  { %v5344_v8 = vadd.f32 %v4183_v6, %v138_v3 }
 0x39e   :  { %v700_v9 = vpop.f32.mrf.mxu0 }
 0x39f   :  { %741 = vmax.xlane.f32.xlu0 %v688_v7  ;;  %751 = vmax.xlane.f32.xlu1 %v5344_v8  ;;  %v5353_v19 = vadd.f32 %v700_v9, %v136_v11 }
 0x3a0   :  { %v4184_v17 = vpop.f32.mrf.mxu0 }
 0x3a1   :  { %v5355_v23 = vadd.f32 %v4184_v17, %v139_v13 }
 0x3a2   :  { %v703_v24 = vpop.f32.mrf.mxu0 }
 0x3a3   :  { %753 = vmax.xlane.f32.xlu0 %v5355_v23  ;;  %747 = vmax.xlane.f32.xlu1 %v5353_v19  ;;  %v5362_v31 = vadd.f32 %v703_v24, %v137_v27 }
 0x3a4   :  { %v4187_v28 = vpop.f32.mrf.mxu0 }
 0x3a5   :  { %v5368_v35 = vadd.f32 %v4187_v28, %v142_v59 }
 0x3a6   :  { %v716_v32 = vpop.f32.mrf.mxu0 }
 0x3a7   :  { %749 = vmax.xlane.f32.xlu0 %v5362_v31  ;;  %v5374_v20 = vadd.f32 %v716_v32, %v140_v43 }
 0x3a8   :  { %v4188_v36 = vpop.f32.mrf.mxu0 }
 0x3a9   :  { %v5388_v25 = vadd.f32 %v4188_v36, %v143_v16 }
 0x3aa   :  { %v719_v53 = vpop.f32.mrf.mxu0 }
 0x3ab   :  { %759 = vmax.xlane.f32.xlu0 %v5368_v35  ;;  %v5380_v57 = vadd.f32 %v719_v53, %v141_v55 }
 0x3af   :  { %755 = vmax.xlane.f32.xlu0 %v5374_v20 }
 0x3b3   :  { %757 = vmax.xlane.f32.xlu0 %v5380_v57 }
 0x3b4   :  { %4421 = vrot.lane.b32.xlu1 %v5205_v50, %s4966_s30 }
 0x3b7   :  { %761 = vmax.xlane.f32.xlu0 %v5388_v25 }
 0x418   :  { %v736_v29 = vpop.xlane.xlu0 %735 }
 0x419   :  { %v765_v1 = vsub.f32 %v5314_v37, %v736_v29 }
 0x41a   :  { %v732_v22 = vpop.xlane.xlu1 %731 }
 0x41b   :  { %v763_v26 = vsub.f32 %v5319_v42, %v732_v22 }
 0x41c   :  { %v738_v40 = vpop.xlane.xlu0 %737 }
 0x41d   :  { %v779_v30 = vmul.f32 1.442695, %v763_v26  ;;  %v766_v58 = vsub.f32 %v5322_v45, %v738_v40 }
 0x41f   :  { %4715 = vpow2.f32 %v779_v30  ;;  %v785_v2 = vmul.f32 1.442695, %v766_v58 }
 0x420   :  { %v734_v33 = vpop.xlane.xlu0 %733  ;;  %v744_v34 = vpop.xlane.xlu1 %743 }
 0x421   :  { %v764_v41 = vsub.f32 %v672_v54, %v734_v33  ;;  %v769_v38 = vsub.f32 %v693_v56, %v744_v34 }
 0x423   :  { %v781_v44 = vmul.f32 1.442695, %v764_v41  ;;  %v791_v46 = vmul.f32 1.442695, %v769_v38 }
 0x424   :  { %v746_v47 = vpop.xlane.xlu0 %745  ;;  %v740_v49 = vpop.xlane.xlu1 %739 }
 0x425   :  { %4717 = vpow2.f32 %v781_v44  ;;  %v770_v50 = vsub.f32 %v696_v0, %v746_v47  ;;  %v767_v51 = vsub.f32 %v685_v63, %v740_v49  ;;  %v783_v0 = vmul.f32 1.442695, %v765_v1 }
 0x426   :  { %4719 = vpow2.f32 %v791_v46 }
 0x427   :  { %v793_v60 = vmul.f32 1.442695, %v770_v50  ;;  %v787_v61 = vmul.f32 1.442695, %v767_v51 }
 0x428   :  { %v742_v42 = vpop.xlane.xlu0 %741  ;;  %v752_v62 = vpop.xlane.xlu1 %751 }
 0x429   :  { %4721 = vpow2.f32 %v793_v60  ;;  %v768_v54 = vsub.f32 %v688_v7, %v742_v42  ;;  %v773_v56 = vsub.f32 %v5344_v8, %v752_v62 }
 0x42a   :  { %4723 = vpow2.f32 %v787_v61 }
 0x42b   :  { %v789_v3 = vmul.f32 1.442695, %v768_v54  ;;  %v799_v63 = vmul.f32 1.442695, %v773_v56  ;;  %v4579_v54 = vld [vmem:[%s6444_s7 + $0x38] sm:$0xff]   ;;  %v4580_v56 = vld [vmem:[%s6444_s7 + $0x30] sm:$0xff]  }
 0x42c   :  { %v754_v6 = vpop.xlane.xlu0 %753  ;;  %v748_v9 = vpop.xlane.xlu1 %747 }
 0x42d   :  { %4725 = vpow2.f32 %v789_v3  ;;  %v771_v45 = vsub.f32 %v5353_v19, %v748_v9  ;;  %v5396_v17 = vpop.eup %4715  ;;  %v774_v27 = vsub.f32 %v5355_v23, %v754_v6 }
 0x42e   :  { %4727 = vpow2.f32 %v785_v2  ;;  %v4581_v2 = vld [vmem:[%s6444_s7 + $0x28] sm:$0xff]  }
 0x42f   :  { %4729 = vpow2.f32 %v783_v0  ;;  %v795_v28 = vmul.f32 1.442695, %v771_v45  ;;  %v801_v55 = vmul.f32 1.442695, %v774_v27 }
 0x430   :  { %v750_v11 = vpop.xlane.xlu0 %749  ;;  %v4422_v13 = vpop.permute.xlu1 %4421  ;;  %4731 = vpow2.f32 %v799_v63 }
 0x431   :  { %v772_v37 = vsub.f32 %v5362_v31, %v750_v11  ;;  %v4424_v7 = vunpack.i.h.bf16 %v4422_v13  ;;  %v4423_v24 = vunpack.i.l.bf16 %v4422_v13  ;;  %4733 = vpow2.f32 %v795_v28 }
 0x432   :  { %v5399_v8 = vpop.eup %4717 }
 0x433   :  { %v4720_v59 = vpop.eup %4719  ;;  %v579_v32 = vpack.c.bf16 %v4424_v7, %v4423_v24  ;;  %v843_v19 = vpack.c.bf16 %v5399_v8, %v5396_v17  ;;  %v797_v43 = vmul.f32 1.442695, %v772_v37 }
 0x434   :  { %823 = vadd.xlane.f32.xlu0 %v4720_v59  ;;  %v760_v36 = vpop.xlane.xlu0 %759 }
 0x435   :  { %v777_v53 = vsub.f32 %v5368_v35, %v760_v36  ;;  %4199 = vmatprep.subr.bf16.mxu1 %v579_v32  ;;  %4205 = vmatprep.mubr.bf16.mxu1 %v843_v19  ;;  %4735 = vpow2.f32 %v797_v43 }
 0x436   :  { %v4722_v31 = vpop.eup %4721  ;;  %4200 = vmatpush3.bf16.msra.mxu1 %v579_v32  ;;  %v4583_v32 = vld [vmem:[%s6444_s7 + $0x18] sm:$0xff]  }
 0x437   :  { %v4724_v16 = vpop.eup %4723  ;;  %v807_v29 = vmul.f32 1.442695, %v777_v53  ;;  %4201 = vmatprep.subr.bf16.mxu1 %v5203_v48 }
 0x438   :  { %825 = vadd.xlane.f32.xlu0 %v4722_v31  ;;  %819 = vadd.xlane.f32.xlu1 %v4724_v16  ;;  %v756_v23 = vpop.xlane.xlu0 %755 }
 0x439   :  { %4737 = vpow2.f32 %v807_v29  ;;  %v775_v22 = vsub.f32 %v5374_v20, %v756_v23 }
 0x43a   :  { %v4726_v26 = vpop.eup %4725  ;;  %4739 = vpow2.f32 %v801_v55  ;;  %4202 = vmatpush3.bf16.msra.mxu1 %v5203_v48 }
 0x43b   :  { %4203 = vmatprep.subr.bf16.mxu1 %v5207_v52  ;;  %v4728_v35 = vpop.eup %4727  ;;  %v803_v40 = vmul.f32 1.442695, %v775_v22  ;;  %v845_v46 = vpack.c.bf16 %v4726_v26, %v4724_v16 }
 0x43c   :  { %821 = vadd.xlane.f32.xlu0 %v4726_v26  ;;  %v758_v30 = vpop.xlane.xlu0 %757  ;;  %v4730_v34 = vpop.eup %4729 }
 0x43d   :  { %v776_v33 = vsub.f32 %v5380_v57, %v758_v30  ;;  %v4732_v41 = vpop.eup %4731  ;;  %v844_v44 = vpack.c.bf16 %v4728_v35, %v4730_v34  ;;  %4741 = vpow2.f32 %v803_v40 }
 0x43e   :  { %4204 = vmatpush3.bf16.msra.mxu1 %v5207_v52  ;;  %v4734_v47 = vpop.eup %4733  ;;  %v846_v52 = vpack.c.bf16 %v4722_v31, %v4720_v59  ;;  %v4582_v59 = vld [vmem:[%s6444_s7 + $0x20] sm:$0xff]  }
 0x43f   :  { %v805_v38 = vmul.f32 1.442695, %v776_v33  ;;  %4221 = vmatprep.subr.bf16.mxu1 %v4579_v54 }
 0x440   :  { %831 = vadd.xlane.f32.xlu0 %v4732_v41  ;;  %v762_v20 = vpop.xlane.xlu0 %761 }
 0x441   :  { %4743 = vpow2.f32 %v805_v38  ;;  %v778_v48 = vsub.f32 %v5388_v25, %v762_v20  ;;  %4206 = vmatmul.mubr.bf16.vlgmr.msra.gmra.mxu1 %v844_v44 }
 0x442   :  { %4209 = vmatprep.mubr.bf16.mxu1 %v845_v46  ;;  %v4736_v50 = vpop.eup %4735  ;;  %4222 = vmatpush3.bf16.msra.mxu1 %v4579_v54 }
 0x443   :  { %v809_v49 = vmul.f32 1.442695, %v778_v48  ;;  %v847_v58 = vpack.c.bf16 %v4736_v50, %v4734_v47  ;;  %4223 = vmatprep.subr.bf16.mxu1 %v4580_v56 }
 0x444   :  { %827 = vadd.xlane.f32.xlu0 %v4734_v47 }
 0x445   :  { %4745 = vpow2.f32 %v809_v49 }
 0x446   :  { %v4738_v57 = vpop.eup %4737  ;;  %4224 = vmatpush3.bf16.msra.mxu1 %v4580_v56 }
 0x447   :  { %v4740_v51 = vpop.eup %4739  ;;  %839 = vadd.xlane.f32.xlu1 %v4738_v57  ;;  %4225 = vmatprep.subr.bf16.mxu1 %v4581_v2 }
 0x448   :  { %833 = vadd.xlane.f32.xlu0 %v4740_v51  ;;  %v848_v61 = vpack.c.bf16 %v4740_v51, %v4732_v41  ;;  %v4585_v41 = vld [vmem:[%s6444_s7 + $0x8] sm:$0xff]  }
 0x449   :  { %4210 = vmatmul.mubr.bf16.gmra.mxu1 %v846_v52 }
 0x44a   :  { %4213 = vmatprep.mubr.bf16.mxu1 %v847_v58  ;;  %v4742_v60 = vpop.eup %4741  ;;  %4226 = vmatpush3.bf16.msra.mxu1 %v4581_v2  ;;  %v4586_v58 = vld [vmem:[%s6444_s7] sm:$0xff]  }
 0x44b   :  { %811 = vadd.xlane.f32.xlu1 %v5396_v17  ;;  %4227 = vmatprep.subr.bf16.mxu1 %v4582_v59 }
 0x44c   :  { %829 = vadd.xlane.f32.xlu0 %v4736_v50 }
 0x44e   :  { %v4744_v25 = vpop.eup %4743  ;;  %4228 = vmatpush3.bf16.msra.mxu1 %v4582_v59 }
 0x44f   :  { %815 = vadd.xlane.f32.xlu1 %v4730_v34  ;;  %v849_v42 = vpack.c.bf16 %v4744_v25, %v4742_v60  ;;  %4229 = vmatprep.subr.bf16.mxu1 %v4583_v32 }
 0x450   :  { %835 = vadd.xlane.f32.xlu0 %v4742_v60 }
 0x451   :  { %4214 = vmatmul.mubr.bf16.gmra.mxu1 %v848_v61 }
 0x452   :  { %4217 = vmatprep.mubr.bf16.mxu1 %v849_v42  ;;  %v4746_v62 = vpop.eup %4745  ;;  %4230 = vmatpush3.bf16.msra.mxu1 %v4583_v32 }
 0x453   :  { %v850_v1 = vpack.c.bf16 %v4746_v62, %v4738_v57 }
 0x454   :  { %837 = vadd.xlane.f32.xlu0 %v4744_v25 }
 0x458   :  { %841 = vadd.xlane.f32.xlu0 %v4746_v62 }
 0x459   :  { %4218 = vmatmul.mubr.bf16.gmra.mxu1 %v850_v1 }
 0x45c   :  { %813 = vadd.xlane.f32.xlu0 %v5399_v8 }
 0x460   :  { %817 = vadd.xlane.f32.xlu0 %v4728_v35  ;;  %v4584_v35 = vld [vmem:[%s6444_s7 + $0x10] sm:$0xff]  }
 0x461   :  { %4231 = vmatprep.subr.bf16.mxu1 %v4584_v35 }
 0x462   :  { %4232 = vmatpush3.bf16.msra.mxu1 %v4584_v35 }
 0x463   :  { %4233 = vmatprep.subr.bf16.mxu1 %v4585_v41 }
 0x466   :  { %4234 = vmatpush3.bf16.msra.mxu1 %v4585_v41 }
 0x467   :  { %4235 = vmatprep.subr.bf16.mxu1 %v4586_v58 }
 0x46a   :  { %4236 = vmatpush3.bf16.msra.mxu1 %v4586_v58 }
 0x4bd   :  { %v824_v3 = vpop.xlane.xlu0 %823 }
 0x4be   :  { %4747 = vrcp.f32 %v824_v3 }
 0x4c1   :  { %v826_v6 = vpop.xlane.xlu0 %825  ;;  %v820_v13 = vpop.xlane.xlu1 %819 }
 0x4c2   :  { %4749 = vrcp.f32 %v826_v6 }
 0x4c3   :  { %4751 = vrcp.f32 %v820_v13 }
 0x4c5   :  { %v822_v9 = vpop.xlane.xlu0 %821 }
 0x4c6   :  { %4753 = vrcp.f32 %v822_v9 }
 0x4c9   :  { %v832_v0 = vpop.xlane.xlu0 %831 }
 0x4ca   :  { %4755 = vrcp.f32 %v832_v0 }
 0x4cb   :  { %v4748_v43 = vpop.eup %4747 }
 0x4cd   :  { %v828_v63 = vpop.xlane.xlu0 %827 }
 0x4cf   :  { %v4750_v53 = vpop.eup %4749 }
 0x4d0   :  { %v840_v36 = vpop.xlane.xlu1 %839  ;;  %v4752_v16 = vpop.eup %4751 }
 0x4d1   :  { %v834_v45 = vpop.xlane.xlu0 %833 }
 0x4d2   :  { %4757 = vrcp.f32 %v834_v45 }
 0x4d3   :  { %v4754_v22 = vpop.eup %4753 }
 0x4d5   :  { %v830_v11 = vpop.xlane.xlu0 %829 }
 0x4d6   :  { %4759 = vrcp.f32 %v830_v11 }
 0x4d7   :  { %4761 = vrcp.f32 %v828_v63  ;;  %v4756_v20 = vpop.eup %4755 }
 0x4d8   :  { %4763 = vrcp.f32 %v840_v36 }
 0x4d9   :  { %v836_v17 = vpop.xlane.xlu0 %835 }
 0x4dd   :  { %v838_v8 = vpop.xlane.xlu0 %837 }
 0x4df   :  { %v4758_v46 = vpop.eup %4757 }
 0x4e1   :  { %v842_v31 = vpop.xlane.xlu0 %841 }
 0x4e2   :  { %4765 = vrcp.f32 %v842_v31 }
 0x4e3   :  { %4767 = vrcp.f32 %v836_v17  ;;  %v4760_v50 = vpop.eup %4759  ;;  %v812_v17 = vpop.xlane.xlu1 %811 }
 0x4e4   :  { %4769 = vrcp.f32 %v838_v8  ;;  %v4762_v60 = vpop.eup %4761 }
 0x4e5   :  { %v4764_v62 = vpop.eup %4763  ;;  %v814_v8 = vpop.xlane.xlu0 %813  ;;  %4771 = vrcp.f32 %v812_v17 }
 0x4e9   :  { %v818_v59 = vpop.xlane.xlu0 %817 }
 0x4ef   :  { %v4766_v54 = vpop.eup %4765 }
 0x4f0   :  { %v4768_v2 = vpop.eup %4767 }
 0x4f1   :  { %v4770_v9 = vpop.eup %4769 }
 0x4f2   :  { %v4772_v36 = vpop.eup %4771 }
 0x501   :  { %v5423_v37 = vpop.f32.mrf.mxu1 }
 0x503   :  { %v5425_v7 = vpop.f32.mrf.mxu1 }
 0x505   :  { %v5427_v24 = vpop.f32.mrf.mxu1 }
 0x507   :  { %v5429_v27 = vpop.f32.mrf.mxu1 }
 0x509   :  { %v4211_v28 = vpop.f32.mrf.mxu1 }
 0x50a   :  { %v970_v29 = vmul.f32 %v4748_v43, %v4211_v28  ;;  %v816_v28 = vpop.xlane.xlu1 %815 }
 0x50b   :  { %v901_v19 = vpop.f32.mrf.mxu1  ;;  %4773 = vrcp.f32 %v816_v28  ;;  %v4587_v28 = vld [vmem:[%s6446_s11 + $0x70] ss:$8 sps:$4 sm:$0xff]  }
 0x50c   :  { %v968_v40 = vmul.f32 %v4752_v16, %v901_v19  ;;  %4775 = vrcp.f32 %v818_v59 }
 0x50d   :  { %v4212_v55 = vpop.f32.mrf.mxu1  ;;  %4777 = vrcp.f32 %v814_v8 }
 0x50e   :  { %v971_v23 = vmul.f32 %v4750_v53, %v4212_v55 }
 0x50f   :  { %v904_v26 = vpop.f32.mrf.mxu1 }
 0x510   :  { %v4425_v30 = vpack.i.bf16 %v971_v23, %v970_v29  ;;  %v969_v33 = vmul.f32 %v4754_v22, %v904_v26 }
 0x511   :  { %v4215_v34 = vpop.f32.mrf.mxu1 }
 0x512   :  { %v4430_v38 = vpack.i.bf16 %v969_v33, %v968_v40  ;;  %4426 = vrot.lane.b32.xlu0 %v4425_v30, %s4964_s29  ;;  %v974_v47 = vmul.f32 %v4756_v20, %v4215_v34  ;;  %v964_v33 = vmul.f32 %v4772_v36, %v5425_v7 }
 0x513   :  { %v917_v44 = vpop.f32.mrf.mxu1 }
 0x514   :  { %4431 = vrot.lane.b32.xlu1 %v4430_v38, %s4964_s29  ;;  %v972_v61 = vmul.f32 %v4762_v60, %v917_v44 }
 0x515   :  { %v4216_v48 = vpop.f32.mrf.mxu1 }
 0x516   :  { %v975_v49 = vmul.f32 %v4758_v46, %v4216_v48 }
 0x517   :  { %v920_v57 = vpop.f32.mrf.mxu1 }
 0x518   :  { %v4435_v51 = vpack.i.bf16 %v975_v49, %v974_v47  ;;  %v973_v52 = vmul.f32 %v4760_v50, %v920_v57  ;;  %v4774_v31 = vpop.eup %4773 }
 0x519   :  { %v4219_v25 = vpop.f32.mrf.mxu1  ;;  %v4776_v29 = vpop.eup %4775  ;;  %v966_v30 = vmul.f32 %v4774_v31, %v5423_v37 }
 0x51a   :  { %4436 = vrot.lane.b32.xlu1 %v4435_v51, %s4965_s0  ;;  %v4440_v1 = vpack.i.bf16 %v973_v52, %v972_v61  ;;  %v978_v3 = vmul.f32 %v4764_v62, %v4219_v25  ;;  %v4778_v40 = vpop.eup %4777  ;;  %v967_v34 = vmul.f32 %v4776_v29, %v5427_v24 }
 0x51b   :  { %v933_v42 = vpop.f32.mrf.mxu1  ;;  %v965_v41 = vmul.f32 %v4778_v40, %v5429_v27  ;;  %v4590_v40 = vld [vmem:[%s6446_s11 + $0x60] ss:$8 sps:$4 sm:$0xff]  }
 0x51c   :  { %v976_v63 = vmul.f32 %v4768_v2, %v933_v42 }
 0x51d   :  { %v4220_v56 = vpop.f32.mrf.mxu1 }
 0x51e   :  { %v979_v6 = vmul.f32 %v4766_v54, %v4220_v56  ;;  %4441 = vrot.lane.b32.xlu1 %v4440_v1, %s4965_s0  ;;  %v3749_v56 = vld [vmem:[%s6445_s8] ss:$0 sm:$0xff] }
 0x51f   :  { %v936_v0 = vpop.f32.mrf.mxu1 }
 0x520   :  { %v4450_v45 = vpack.i.bf16 %v979_v6, %v978_v3  ;;  %v977_v11 = vmul.f32 %v4770_v9, %v936_v0 }
 0x522   :  { %v4445_v13 = vpack.i.bf16 %v977_v11, %v976_v63  ;;  %4451 = vrot.lane.b32.xlu1 %v4450_v45, %s4966_s30 }
 0x524   :  { %4446 = vrot.lane.b32.xlu0 %v4445_v13, %s4966_s30 }
 0x584   :  { %v4427_v43 = vpop.permute.xlu0 %4426 }
 0x585   :  { %v4429_v55 = vunpack.i.h.bf16 %v4427_v43  ;;  %v4428_v16 = vunpack.i.l.bf16 %v4427_v43 }
 0x586   :  { %v4432_v32 = vpop.permute.xlu1 %4431 }
 0x587   :  { %v4434_v23 = vunpack.i.h.bf16 %v4432_v32  ;;  %v4433_v22 = vunpack.i.l.bf16 %v4432_v32  ;;  %v1031_v46 = vsel %vm585_vm0, %v967_v34, %v4429_v55  ;;  %v1030_v48 = vsel %vm585_vm0, %v966_v30, %v4428_v16  ;;  %v4595_v30 = vld [vmem:[%s6446_s11 + $0x54] ss:$8 sps:$4 sm:$0xff]   ;;  %v4598_v34 = vld [vmem:[%s6446_s11 + $0x44] ss:$8 sps:$4 sm:$0xff]  }
 0x589   :  { %v1029_v50 = vsel %vm585_vm0, %v965_v41, %v4434_v23  ;;  %v1028_v37 = vsel %vm585_vm0, %v964_v33, %v4433_v22  ;;  %v4593_v33 = vld [vmem:[%s6446_s11 + $0x50] ss:$8 sps:$4 sm:$0xff]   ;;  %v4596_v41 = vld [vmem:[%s6446_s11 + $0x40] ss:$8 sps:$4 sm:$0xff]  }
 0x58c   :  { %v4437_v19 = vpop.permute.xlu1 %4436 }
 0x58d   :  { %v4439_v26 = vunpack.i.h.bf16 %v4437_v19  ;;  %v4438_v35 = vunpack.i.l.bf16 %v4437_v19 }
 0x58f   :  { %v1036_v7 = vsel %vm1032_vm1, %v1031_v46, %v4439_v26  ;;  %v1035_v24 = vsel %vm1032_vm1, %v1030_v48, %v4438_v35  ;;  %v4592_v35 = vld [vmem:[%s6446_s11 + $0x64] ss:$8 sps:$4 sm:$0xff]   ;;  %v4602_v46 = vld [vmem:[%s6446_s11 + $0x20] ss:$8 sps:$4 sm:$0xff]   ;;  %v4607_v48 = vld [vmem:[%s6446_s11 + $0x14] ss:$8 sps:$4 sm:$0xff]  }
 0x590   :  { %v4442_v53 = vpop.permute.xlu1 %4441 }
 0x591   :  { %v4444_v38 = vunpack.i.h.bf16 %v4442_v53  ;;  %v4443_v44 = vunpack.i.l.bf16 %v4442_v53 }
 0x593   :  { %v1033_v25 = vsel %vm1032_vm1, %v1028_v37, %v4443_v44  ;;  %v1034_v61 = vsel %vm1032_vm1, %v1029_v50, %v4444_v38  ;;  %v4601_v38 = vld [vmem:[%s6446_s11 + $0x34] ss:$8 sps:$4 sm:$0xff]   ;;  %v4599_v44 = vld [vmem:[%s6446_s11 + $0x30] ss:$8 sps:$4 sm:$0xff]   ;;  %v4608_v50 = vld [vmem:[%s6446_s11] ss:$8 sps:$4 sm:$0xff]  }
 0x594   :  { %v4452_v20 = vpop.permute.xlu1 %4451 }
 0x595   :  { %v4454_v47 = vunpack.i.h.bf16 %v4452_v20  ;;  %v4453_v49 = vunpack.i.l.bf16 %v4452_v20  ;;  %v4604_v20 = vld [vmem:[%s6446_s11 + $0x24] ss:$8 sps:$4 sm:$0xff]  }
 0x596   :  { %v4447_v57 = vpop.permute.xlu0 %4446 }
 0x597   :  { %v1041_v27 = vsel %vm1037_vm2, %v1036_v7, %v4454_v47  ;;  %v1040_v51 = vsel %vm1037_vm2, %v1035_v24, %v4453_v49  ;;  %v4449_v52 = vunpack.i.h.bf16 %v4447_v57  ;;  %v4448_v58 = vunpack.i.l.bf16 %v4447_v57  ;;  %v4605_v47 = vld [vmem:[%s6446_s11 + $0x10] ss:$8 sps:$4 sm:$0xff]   ;;  %v4610_v49 = vld [vmem:[%s6446_s11 + $0x4] ss:$8 sps:$4 sm:$0xff]  }
 0x598   :  { %v1043_v60 = vpack.c.bf16 %v1041_v27, %v1040_v51 }
 0x599   :  { %v1038_v42 = vsel %vm1037_vm2, %v1033_v25, %v4448_v58  ;;  %v1039_v62 = vsel %vm1037_vm2, %v1034_v61, %v4449_v52 }
 0x59a   :  { %v1042_v1 = vpack.c.bf16 %v1039_v62, %v1038_v42 }
 0x59c   :  { %4237 = vmatprep.mubr.bf16.mxu1 %v1042_v1 }
 0x59d   :  { %4238 = vmatmul.mubr.bf16.vlgmr.msra.gmra.mxu1 %v1043_v60 }
 0x65d   :  { %v4239_v54 = vpop.f32.mrf.mxu1 }
 0x65e   :  { %v1158_v9 = vadd.f32 %v4239_v54, %v3749_v56  ;;  %v3758_v54 = vld [vmem:[%s6447_s9] ss:$0 sm:$0xff] }
 0x65f   :  { %v1149_v2 = vpop.f32.mrf.mxu1 }
 0x660   :  { %v1150_v3 = vadd.f32 %v3749_v56, %v1149_v2  ;;  %v1166_v17 = vadd.f32 %v1158_v9, %v5176_v10  ;;  %v3759_v9 = vld [vmem:[%s6448_s10] ss:$0 sm:$0xff] }
 0x661   :  { %v4240_v6 = vpop.f32.mrf.mxu1 }
 0x662   :  { %v1164_v0 = vadd.f32 %v1150_v3, %v5169_v4  ;;  %v1161_v11 = vadd.f32 %v4240_v6, %v3749_v56  ;;  %v4589_v4 = vld [vmem:[%s6446_s11 + $0x74] ss:$8 sps:$4 sm:$0xff]  }
 0x663   :  { %v1152_v63 = vpop.f32.mrf.mxu1  ;;  %1344 = vmatprep.subr.bf16.mxu0 %v4589_v4 }
 0x664   :  { %v1153_v45 = vadd.f32 %v3749_v56, %v1152_v63  ;;  %1170 = vadd.xlane.f32.xlu0 %v1164_v0  ;;  %v1167_v8 = vadd.f32 %v1161_v11, %v5178_v12  ;;  %1345 = vmatpush1.bf16.msra.mxu0 %v4587_v28 }
 0x665   :  { %1346 = vmatprep.subr.bf16.mxu0 %v4592_v35  ;;  %v4624_v35 = vld [vmem:[%s6449_s13 + $0x8] sm:$0xff]  }
 0x666   :  { %v1165_v13 = vadd.f32 %v1153_v45, %v5171_v5 }
 0x668   :  { %1172 = vadd.xlane.f32.xlu1 %v1165_v13  ;;  %1174 = vadd.xlane.f32.xlu0 %v1166_v17 }
 0x669   :  { %1347 = vmatpush1.bf16.msra.mxu0 %v4590_v40  ;;  %v4625_v40 = vld [vmem:[%s6449_s13 + $0x40] sm:$0xff]  }
 0x66a   :  { %1348 = vmatprep.subr.bf16.mxu0 %v4595_v30  ;;  %v4626_v30 = vld [vmem:[%s6449_s13] sm:$0xff]  }
 0x66c   :  { %1176 = vadd.xlane.f32.xlu0 %v1167_v8 }
 0x66d   :  { %1349 = vmatpush1.bf16.msra.mxu0 %v4593_v33  ;;  %v1252_v33 = vld [vmem:[%s6450_s12] sm:$0x3] }
 0x66e   :  { %1350 = vmatprep.subr.bf16.mxu0 %v4598_v34  ;;  %v1257_v34 = vrot.slane %v1252_v33, %v5186_v15 }
 0x671   :  { %1351 = vmatpush1.bf16.msra.mxu0 %v4596_v41  ;;  %v1261_v41 = vrot.slane %v1252_v33, %v5193_v18 }
 0x672   :  { %1352 = vmatprep.subr.bf16.mxu0 %v4601_v38 }
 0x675   :  { %1353 = vmatpush1.bf16.msra.mxu0 %v4599_v44 }
 0x676   :  { %1354 = vmatprep.subr.bf16.mxu0 %v4604_v20 }
 0x679   :  { %1355 = vmatpush1.bf16.msra.mxu0 %v4602_v46 }
 0x67a   :  { %1356 = vmatprep.subr.bf16.mxu0 %v4607_v48 }
 0x67d   :  { %1357 = vmatpush1.bf16.msra.mxu0 %v4605_v47 }
 0x67e   :  { %1358 = vmatprep.subr.bf16.mxu0 %v4610_v49 }
 0x681   :  { %1359 = vmatpush1.bf16.msra.mxu0 %v4608_v50 }
 0x6ed   :  { %v1171_v59 = vpop.xlane.xlu0 %1170 }
 0x6ee   :  { %v1178_v32 = vmul.f32 0.0078125, %v1171_v59 }
 0x6f0   :  { %v5481_v5 = vsub.f32 %v1164_v0, %v1178_v32 }
 0x6f1   :  { %v1173_v10 = vpop.xlane.xlu1 %1172  ;;  %v1175_v19 = vpop.xlane.xlu0 %1174 }
 0x6f2   :  { %v1179_v43 = vmul.f32 0.0078125, %v1173_v10  ;;  %v1180_v36 = vmul.f32 0.0078125, %v1175_v19  ;;  %v1186_v12 = vmul.f32 %v5481_v5, %v5481_v5  ;;  %v4611_v10 = vld [vmem:[%s6449_s13 + $0x78] sm:$0xff]  }
 0x6f3   :  { %v4612_v19 = vld [vmem:[%s6449_s13 + $0x38] sm:$0xff]   ;;  %4029 = vmatprep.subr.bf16.mxu1 %v4611_v10 }
 0x6f4   :  { %v5485_v53 = vsub.f32 %v1166_v17, %v1180_v36  ;;  %1190 = vadd.xlane.f32.xlu1 %v1186_v12  ;;  %v1183_v31 = vsub.f32 %v1165_v13, %v1179_v43  ;;  %4030 = vmatpush3.bf16.msra.mxu1 %v4612_v19  ;;  %v4613_v43 = vld [vmem:[%s6449_s13 + $0x70] sm:$0xff]   ;;  %v4615_v12 = vld [vmem:[%s6449_s13 + $0x68] sm:$0xff]  }
 0x6f5   :  { %v1177_v55 = vpop.xlane.xlu0 %1176  ;;  %v4614_v36 = vld [vmem:[%s6449_s13 + $0x30] sm:$0xff]   ;;  %4031 = vmatprep.subr.bf16.mxu1 %v4613_v43 }
 0x6f6   :  { %v1181_v16 = vmul.f32 0.0078125, %v1177_v55  ;;  %v1187_v29 = vmul.f32 %v1183_v31, %v1183_v31  ;;  %v1188_v23 = vmul.f32 %v5485_v53, %v5485_v53  ;;  %v4618_v55 = vld [vmem:[%s6449_s13 + $0x20] sm:$0xff]  }
 0x6f8   :  { %v1185_v22 = vsub.f32 %v1167_v8, %v1181_v16  ;;  %1192 = vadd.xlane.f32.xlu0 %v1187_v29  ;;  %1194 = vadd.xlane.f32.xlu1 %v1188_v23  ;;  %v4619_v16 = vld [vmem:[%s6449_s13 + $0x58] sm:$0xff]   ;;  %v4621_v23 = vld [vmem:[%s6449_s13 + $0x50] sm:$0xff]  }
 0x6f9   :  { %4032 = vmatpush3.bf16.msra.mxu1 %v4614_v36  ;;  %v4620_v29 = vld [vmem:[%s6449_s13 + $0x18] sm:$0xff]  }
 0x6fa   :  { %v1189_v26 = vmul.f32 %v1185_v22, %v1185_v22  ;;  %4033 = vmatprep.subr.bf16.mxu1 %v4615_v12 }
 0x6fc   :  { %1196 = vadd.xlane.f32.xlu0 %v1189_v26  ;;  %v4623_v26 = vld [vmem:[%s6449_s13 + $0x48] sm:$0xff]  }
 0x77d   :  { %v1191_v37 = vpop.xlane.xlu1 %1190 }
 0x77e   :  { %v1198_v7 = vmul.f32 0.0078125, %v1191_v37 }
 0x780   :  { %v1202_v24 = vadd.f32 1e-12, %v1198_v7 }
 0x781   :  { %v1195_v57 = vpop.xlane.xlu1 %1194  ;;  %v1193_v27 = vpop.xlane.xlu0 %1192 }
 0x782   :  { %4779 = vrsqrt.f32 %v1202_v24  ;;  %v1200_v51 = vmul.f32 0.0078125, %v1195_v57  ;;  %v1199_v52 = vmul.f32 0.0078125, %v1193_v27 }
 0x784   :  { %v1203_v58 = vadd.f32 1e-12, %v1199_v52  ;;  %v1204_v60 = vadd.f32 1e-12, %v1200_v51 }
 0x785   :  { %v1197_v25 = vpop.xlane.xlu0 %1196 }
 0x786   :  { %v1201_v61 = vmul.f32 0.0078125, %v1197_v25  ;;  %4781 = vrsqrt.f32 %v1203_v58 }
 0x787   :  { %4783 = vrsqrt.f32 %v1204_v60 }
 0x788   :  { %v1205_v42 = vadd.f32 1e-12, %v1201_v61 }
 0x78a   :  { %4785 = vrsqrt.f32 %v1205_v42 }
 0x78f   :  { %v4780_v62 = vpop.eup %4779 }
 0x790   :  { %v1210_v1 = vmul.f32 %v4780_v62, %v5481_v5 }
 0x792   :  { %v1220_v3 = vmul.f32 %v3758_v54, %v1210_v1 }
 0x793   :  { %v4782_v56 = vpop.eup %4781 }
 0x794   :  { %v1211_v2 = vmul.f32 %v4782_v56, %v1183_v31  ;;  %v4784_v6 = vpop.eup %4783  ;;  %v5538_v11 = vadd.f32 %v3759_v9, %v1220_v3  ;;  %v4617_v31 = vld [vmem:[%s6449_s13 + $0x60] sm:$0xff]  }
 0x795   :  { %v1212_v17 = vmul.f32 %v4784_v6, %v5485_v53  ;;  %v4616_v53 = vld [vmem:[%s6449_s13 + $0x28] sm:$0xff]  }
 0x796   :  { %v1221_v63 = vmul.f32 %v3758_v54, %v1211_v2  ;;  %4034 = vmatpush3.bf16.msra.mxu1 %v4616_v53 }
 0x797   :  { %v4786_v0 = vpop.eup %4785  ;;  %v1222_v4 = vmul.f32 %v3758_v54, %v1212_v17  ;;  %4035 = vmatprep.subr.bf16.mxu1 %v4617_v31 }
 0x798   :  { %v1213_v45 = vmul.f32 %v4786_v0, %v1185_v22  ;;  %v5540_v13 = vadd.f32 %v3759_v9, %v1221_v63  ;;  %v4622_v22 = vld [vmem:[%s6449_s13 + $0x10] sm:$0xff]  }
 0x799   :  { %v5548_v32 = vadd.f32 %v3759_v9, %v1222_v4 }
 0x79a   :  { %v1234_v8 = vpack.c.bf16 %v5540_v13, %v5538_v11  ;;  %v1223_v28 = vmul.f32 %v3758_v54, %v1213_v45  ;;  %4036 = vmatpush3.bf16.msra.mxu1 %v4618_v55 }
 0x79b   :  { %4037 = vmatprep.subr.bf16.mxu1 %v4619_v16 }
 0x79c   :  { %1377 = vmatmul.mubr.bf16.vlgmr.msra.gmra.mxu0 %v1234_v8  ;;  %v5546_v59 = vadd.f32 %v3759_v9, %v1223_v28 }
 0x79d   :  { %1386 = vmatprep.mubr.bf16.mxu0 %v4963_v39 }
 0x79e   :  { %v1235_v5 = vpack.c.bf16 %v5546_v59, %v5548_v32  ;;  %4038 = vmatpush3.bf16.msra.mxu1 %v4620_v29 }
 0x79f   :  { %4039 = vmatprep.subr.bf16.mxu1 %v4621_v23 }
 0x7a2   :  { %4040 = vmatpush3.bf16.msra.mxu1 %v4622_v22 }
 0x7a3   :  { %4041 = vmatprep.subr.bf16.mxu1 %v4623_v26 }
 0x7a4   :  { %1387 = vmatmul.mubr.bf16.gmra.mxu0 %v1235_v5 }
 0x7a5   :  { %2076 = vmatprep.mubr.bf16.mxu0 %v4963_v39 }
 0x7a6   :  { %4042 = vmatpush3.bf16.msra.mxu1 %v4624_v35 }
 0x7a7   :  { %4043 = vmatprep.subr.bf16.mxu1 %v4625_v40 }
 0x7aa   :  { %4044 = vmatpush3.bf16.msra.mxu1 %v4626_v30 }
 0x85c   :  { %v1378_v38 = vpop.f32.mrf.mxu0 }
 0x85d   :  { %v5606_v44 = vadd.f32 %v1378_v38, %v1257_v34 }
 0x85e   :  { %v1380_v20 = vpop.f32.mrf.mxu0 }
 0x85f   :  { %v5609_v46 = vmul.f32 0.70710677, %v5606_v44  ;;  %v5611_v48 = vadd.f32 %v1380_v20, %v1261_v41 }
 0x860   :  { %v1382_v47 = vpop.f32.mrf.mxu0 }
 0x861   :  { %v1413_v49 = vand.u32 2147483647, %v5609_v46  ;;  %v5615_v50 = vmul.f32 0.70710677, %v5611_v48  ;;  %v5617_v37 = vadd.f32 %v1382_v47, %v1257_v34  ;;  %vm1565_vm3 = vcmp.ge.f32.partialorder %v5609_v46, 0.0 }
 0x862   :  { %v1384_v7 = vpop.f32.mrf.mxu0 }
 0x863   :  { %v1421_v24 = vmul.f32 0.3275911, %v1413_v49  ;;  %v1414_v57 = vand.u32 2147483647, %v5615_v50  ;;  %v5621_v27 = vmul.f32 0.70710677, %v5617_v37  ;;  %v5623_v51 = vadd.f32 %v1384_v7, %v1261_v41 }
 0x864   :  { %v1388_v52 = vpop.f32.mrf.mxu0  ;;  %v1517_v63 = vsub.f32 0.0, %v1413_v49  ;;  %vm1566_vm4 = vcmp.ge.f32.partialorder %v5615_v50, 0.0 }
 0x865   :  { %v1429_v58 = vadd.f32 1.0, %v1421_v24  ;;  %v1422_v60 = vmul.f32 0.3275911, %v1414_v57  ;;  %v1415_v25 = vand.u32 2147483647, %v5621_v27  ;;  %v5630_v2 = vadd.f32 %v1388_v52, %v1257_v34 }
 0x866   :  { %v5627_v61 = vmul.f32 0.70710677, %v5623_v51  ;;  %v1390_v42 = vpop.f32.mrf.mxu0  ;;  %v1518_v4 = vsub.f32 0.0, %v1414_v57  ;;  %v1525_v43 = vmul.f32 %v1517_v63, %v1413_v49  ;;  %vm1567_vm5 = vcmp.ge.f32.partialorder %v5621_v27, 0.0 }
 0x867   :  { %4787 = vrcp.f32 %v1429_v58  ;;  %v1430_v62 = vadd.f32 1.0, %v1422_v60  ;;  %v1423_v1 = vmul.f32 0.3275911, %v1415_v25  ;;  %v5632_v3 = vadd.f32 %v1390_v42, %v1261_v41 }
 0x868   :  { %v1416_v54 = vand.u32 2147483647, %v5627_v61  ;;  %v1392_v56 = vpop.f32.mrf.mxu0  ;;  %v5635_v0 = vmul.f32 0.70710677, %v5630_v2  ;;  %v1526_v31 = vmul.f32 %v1518_v4, %v1414_v57  ;;  %v1519_v55 = vsub.f32 0.0, %v1415_v25 }
 0x869   :  { %4789 = vrcp.f32 %v1430_v62  ;;  %v1431_v6 = vadd.f32 1.0, %v1423_v1  ;;  %v5639_v28 = vmul.f32 0.70710677, %v5632_v3  ;;  %v5641_v5 = vadd.f32 %v1392_v56, %v1257_v34 }
 0x86a   :  { %v1424_v9 = vmul.f32 0.3275911, %v1416_v54  ;;  %v1394_v17 = vpop.f32.mrf.mxu0  ;;  %v1417_v8 = vand.u32 2147483647, %v5635_v0  ;;  %v1533_v26 = vmul.f32 1.442695, %v1525_v43  ;;  %v1527_v38 = vmul.f32 %v1519_v55, %v1415_v25 }
 0x86b   :  { %4791 = vrcp.f32 %v1431_v6  ;;  %v5643_v19 = vadd.f32 %v1394_v17, %v1261_v41  ;;  %v1418_v36 = vand.u32 2147483647, %v5639_v28  ;;  %v5647_v12 = vmul.f32 0.70710677, %v5641_v5 }
 0x86c   :  { %v1432_v45 = vadd.f32 1.0, %v1424_v9  ;;  %v1425_v10 = vmul.f32 0.3275911, %v1417_v8  ;;  %v1520_v35 = vsub.f32 0.0, %v1416_v54  ;;  %v1535_v41 = vmul.f32 1.442695, %v1526_v31 }
 0x86d   :  { %v1426_v16 = vmul.f32 0.3275911, %v1418_v36  ;;  %v1419_v29 = vand.u32 2147483647, %v5647_v12  ;;  %v5651_v23 = vmul.f32 0.70710677, %v5643_v19 }
 0x86e   :  { %4793 = vrcp.f32 %v1432_v45  ;;  %v1433_v53 = vadd.f32 1.0, %v1425_v10  ;;  %v1521_v7 = vsub.f32 0.0, %v1417_v8  ;;  %v1528_v52 = vmul.f32 %v1520_v35, %v1416_v54 }
 0x86f   :  { %v1434_v40 = vadd.f32 1.0, %v1426_v16  ;;  %v1427_v30 = vmul.f32 0.3275911, %v1419_v29  ;;  %v5657_v34 = vand.u32 2147483647, %v5651_v23  ;;  %v1522_v42 = vsub.f32 0.0, %v1418_v36 }
 0x870   :  { %4795 = vrcp.f32 %v1433_v53  ;;  %v1537_v56 = vmul.f32 1.442695, %v1527_v38  ;;  %v1529_v9 = vmul.f32 %v1521_v7, %v1417_v8  ;;  %v1539_v17 = vmul.f32 1.442695, %v1528_v52 }
 0x871   :  { %4797 = vrcp.f32 %v1434_v40  ;;  %v1435_v20 = vadd.f32 1.0, %v1427_v30  ;;  %v1428_v24 = vmul.f32 0.3275911, %v5657_v34  ;;  %v1523_v4 = vsub.f32 0.0, %v1419_v29 }
 0x872   :  { %4799 = vpow2.f32 %v1533_v26  ;;  %v1530_v53 = vmul.f32 %v1522_v42, %v1418_v36  ;;  %v1541_v8 = vmul.f32 1.442695, %v1529_v9  ;;  %v1399_v27 = vmul.f32 0.5, %v5617_v37 }
 0x873   :  { %4801 = vrcp.f32 %v1435_v20  ;;  %v1436_v62 = vadd.f32 1.0, %v1428_v24  ;;  %v1524_v24 = vsub.f32 0.0, %v5657_v34  ;;  %vm1568_vm6 = vcmp.ge.f32.partialorder %v5627_v61, 0.0 }
 0x874   :  { %v5653_v22 = vpop.eup %4787  ;;  %4803 = vpow2.f32 %v1535_v41  ;;  %v1543_v20 = vmul.f32 1.442695, %v1530_v53  ;;  %vm1570_vm7 = vcmp.ge.f32.partialorder %v5639_v28, 0.0  ;;  %vm1571_vm8 = vcmp.ge.f32.partialorder %v5647_v12, 0.0 }
 0x875   :  { %v1445_v33 = vmul.f32 1.0614054, %v5653_v22  ;;  %4805 = vrcp.f32 %v1436_v62  ;;  %vm1569_vm9 = vcmp.ge.f32.partialorder %v5635_v0, 0.0  ;;  %vm1572_vm10 = vcmp.ge.f32.partialorder %v5651_v23, 0.0 }
 0x876   :  { %v5659_v47 = vpop.eup %4789  ;;  %4807 = vpow2.f32 %v1537_v56  ;;  %v1404_v28 = vmul.f32 0.5, %v5643_v19  ;;  %v1401_v0 = vmul.f32 0.5, %v5630_v2 }
 0x877   :  { %v1453_v49 = vadd.f32 -1.4531521, %v1445_v33  ;;  %v1446_v57 = vmul.f32 1.0614054, %v5659_v47  ;;  %4809 = vpow2.f32 %v1539_v17  ;;  %v1531_v33 = vmul.f32 %v1523_v4, %v1419_v29 }
 0x878   :  { %v5663_v58 = vpop.eup %4791  ;;  %4811 = vpow2.f32 %v1541_v8 }
 0x879   :  { %v1461_v60 = vmul.f32 %v5653_v22, %v1453_v49  ;;  %v1454_v25 = vadd.f32 -1.4531521, %v1446_v57  ;;  %v1447_v1 = vmul.f32 1.0614054, %v5663_v58  ;;  %4813 = vpow2.f32 %v1543_v20 }
 0x87b   :  { %v1469_v6 = vadd.f32 1.4214138, %v1461_v60  ;;  %v5667_v63 = vpop.eup %4793  ;;  %v1462_v45 = vmul.f32 %v5659_v47, %v1454_v25  ;;  %v1455_v54 = vadd.f32 -1.4531521, %v1447_v1  ;;  %v1545_v1 = vmul.f32 1.442695, %v1531_v33 }
 0x87c   :  { %v1448_v43 = vmul.f32 1.0614054, %v5667_v63 }
 0x87d   :  { %v1477_v10 = vmul.f32 %v5653_v22, %v1469_v6  ;;  %v1470_v31 = vadd.f32 1.4214138, %v1462_v45  ;;  %v1463_v55 = vmul.f32 %v5663_v58, %v1455_v54  ;;  %v5673_v35 = vpop.eup %4795  ;;  %4815 = vpow2.f32 %v1545_v1 }
 0x87e   :  { %v1456_v26 = vadd.f32 -1.4531521, %v1448_v43  ;;  %v1449_v36 = vmul.f32 1.0614054, %v5673_v35  ;;  %v5681_v57 = vpop.eup %4797  ;;  %v1532_v43 = vmul.f32 %v1524_v24, %v5657_v34 }
 0x87f   :  { %v1485_v16 = vadd.f32 -0.28449672, %v1477_v10  ;;  %v1478_v40 = vmul.f32 %v5659_v47, %v1470_v31  ;;  %v1471_v30 = vadd.f32 1.4214138, %v1463_v55  ;;  %v1450_v25 = vmul.f32 1.0614054, %v5681_v57  ;;  %v4800_v56 = vpop.eup %4799 }
 0x880   :  { %v1464_v38 = vmul.f32 %v5667_v63, %v1456_v26  ;;  %v1457_v42 = vadd.f32 -1.4531521, %v1449_v36  ;;  %v5688_v54 = vpop.eup %4801 }
 0x881   :  { %v1493_v41 = vmul.f32 %v5653_v22, %v1485_v16  ;;  %v1486_v49 = vadd.f32 -0.28449672, %v1478_v40  ;;  %v1479_v7 = vmul.f32 %v5663_v58, %v1471_v30  ;;  %v1458_v10 = vadd.f32 -1.4531521, %v1450_v25  ;;  %v4804_v53 = vpop.eup %4803 }
 0x882   :  { %v1472_v60 = vadd.f32 1.4214138, %v1464_v38  ;;  %v1465_v45 = vmul.f32 %v5673_v35, %v1457_v42  ;;  %v1451_v26 = vmul.f32 1.0614054, %v5688_v54  ;;  %v1547_v42 = vmul.f32 1.442695, %v1532_v43 }
 0x883   :  { %v1501_v52 = vadd.f32 0.2548296, %v1493_v41  ;;  %v1494_v29 = vmul.f32 %v5659_v47, %v1486_v49  ;;  %v1487_v62 = vadd.f32 -0.28449672, %v1479_v7  ;;  %v1466_v30 = vmul.f32 %v5681_v57, %v1458_v10 }
 0x884   :  { %v1480_v9 = vmul.f32 %v5667_v63, %v1472_v60  ;;  %v1473_v16 = vadd.f32 1.4214138, %v1465_v45  ;;  %v1459_v38 = vadd.f32 -1.4531521, %v1451_v26  ;;  %4817 = vpow2.f32 %v1547_v42 }
 0x885   :  { %v1509_v6 = vmul.f32 %v5653_v22, %v1501_v52  ;;  %v1502_v17 = vadd.f32 0.2548296, %v1494_v29  ;;  %v1495_v4 = vmul.f32 %v5663_v58, %v1487_v62  ;;  %v5693_v22 = vpop.eup %4805  ;;  %v1474_v49 = vadd.f32 1.4214138, %v1466_v30 }
 0x886   :  { %v1488_v55 = vadd.f32 -0.28449672, %v1480_v9  ;;  %v1481_v34 = vmul.f32 %v5673_v35, %v1473_v16  ;;  %v1452_v7 = vmul.f32 1.0614054, %v5693_v22  ;;  %v4808_v24 = vpop.eup %4807 }
 0x887   :  { %v1549_v31 = vmul.f32 %v4800_v56, %v1509_v6  ;;  %v1510_v8 = vmul.f32 %v5659_v47, %v1502_v17  ;;  %v1503_v40 = vadd.f32 0.2548296, %v1495_v4  ;;  %v1467_v47 = vmul.f32 %v5688_v54, %v1459_v38  ;;  %v4810_v56 = vpop.eup %4809 }
 0x888   :  { %v1496_v41 = vmul.f32 %v5667_v63, %v1488_v55  ;;  %v1489_v60 = vadd.f32 -0.28449672, %v1481_v34  ;;  %v1482_v25 = vmul.f32 %v5681_v57, %v1474_v49  ;;  %v1460_v1 = vadd.f32 -1.4531521, %v1452_v7  ;;  %v4812_v16 = vpop.eup %4811 }
 0x889   :  { %v1557_v33 = vsub.f32 1.0, %v1549_v31  ;;  %v1550_v36 = vmul.f32 %v4804_v53, %v1510_v8  ;;  %v1511_v20 = vmul.f32 %v5663_v58, %v1503_v40  ;;  %v1475_v45 = vadd.f32 1.4214138, %v1467_v47  ;;  %v4814_v34 = vpop.eup %4813 }
 0x88a   :  { %v1504_v52 = vadd.f32 0.2548296, %v1496_v41  ;;  %v1497_v58 = vmul.f32 %v5673_v35, %v1489_v60  ;;  %v1490_v10 = vadd.f32 -0.28449672, %v1482_v25  ;;  %v1468_v55 = vmul.f32 %v5693_v22, %v1460_v1  ;;  %v4816_v60 = vpop.eup %4815 }
 0x88b   :  { %v1558_v29 = vsub.f32 1.0, %v1550_v36  ;;  %v1551_v62 = vmul.f32 %v4808_v24, %v1511_v20  ;;  %v1573_v6 = vsub.f32 0.0, %v1557_v33  ;;  %v1483_v43 = vmul.f32 %v5688_v54, %v1475_v45 }
 0x88c   :  { %v1512_v9 = vmul.f32 %v5667_v63, %v1504_v52  ;;  %v1505_v31 = vadd.f32 0.2548296, %v1497_v58  ;;  %v1498_v63 = vmul.f32 %v5681_v57, %v1490_v10  ;;  %v1476_v49 = vadd.f32 1.4214138, %v1468_v55 }
 0x88d   :  { %v1574_v17 = vsub.f32 0.0, %v1558_v29  ;;  %v1559_v4 = vsub.f32 1.0, %v1551_v62  ;;  %v1581_v8 = vsel %vm1565_vm3, %v1557_v33, %v1573_v6  ;;  %v1491_v41 = vadd.f32 -0.28449672, %v1483_v43 }
 0x88e   :  { %v1552_v53 = vmul.f32 %v4810_v56, %v1512_v9  ;;  %v1513_v30 = vmul.f32 %v5673_v35, %v1505_v31  ;;  %v1506_v20 = vadd.f32 0.2548296, %v1498_v63  ;;  %v1400_v24 = vmul.f32 0.5, %v5623_v51 }
 0x88f   :  { %v1575_v26 = vsub.f32 0.0, %v1559_v4  ;;  %v1582_v38 = vsel %vm1566_vm4, %v1558_v29, %v1574_v17  ;;  %v1499_v35 = vmul.f32 %v5688_v54, %v1491_v41  ;;  %v1484_v33 = vmul.f32 %v5693_v22, %v1476_v49 }
 0x890   :  { %v1560_v40 = vsub.f32 1.0, %v1552_v53  ;;  %v1514_v46 = vmul.f32 %v5681_v57, %v1506_v20  ;;  %v1589_v50 = vadd.f32 1.0, %v1581_v8  ;;  %v1590_v47 = vadd.f32 1.0, %v1582_v38 }
 0x891   :  { %v1583_v36 = vsel %vm1567_vm5, %v1559_v4, %v1575_v26  ;;  %v1553_v29 = vmul.f32 %v4812_v16, %v1513_v30  ;;  %v1507_v37 = vadd.f32 0.2548296, %v1499_v35  ;;  %v1492_v1 = vadd.f32 -0.28449672, %v1484_v33  ;;  %v4818_v26 = vpop.eup %4817 }
 0x892   :  { %v1591_v7 = vadd.f32 1.0, %v1583_v36  ;;  %v1576_v52 = vsub.f32 0.0, %v1560_v40  ;;  %v1554_v25 = vmul.f32 %v4814_v34, %v1514_v46  ;;  %v1397_v51 = vmul.f32 0.5, %v5606_v44 }
 0x893   :  { %v1398_v56 = vmul.f32 0.5, %v5611_v48  ;;  %v1515_v9 = vmul.f32 %v5688_v54, %v1507_v37  ;;  %v1500_v58 = vmul.f32 %v5693_v22, %v1492_v1  ;;  %v1561_v17 = vsub.f32 1.0, %v1553_v29 }
 0x894   :  { %v1584_v42 = vsel %vm1568_vm6, %v1560_v40, %v1576_v52  ;;  %v1599_v61 = vmul.f32 %v1591_v7, %v1399_v27  ;;  %v1562_v57 = vsub.f32 1.0, %v1554_v25  ;;  %v1597_v4 = vmul.f32 %v1589_v50, %v1397_v51 }
 0x895   :  { %v1592_v62 = vadd.f32 1.0, %v1584_v42  ;;  %v1598_v45 = vmul.f32 %v1590_v47, %v1398_v56  ;;  %v1555_v10 = vmul.f32 %v4816_v60, %v1515_v9  ;;  %v1508_v53 = vadd.f32 0.2548296, %v1500_v58 }
 0x896   :  { %v1605_v43 = vpack.c.bf16 %v1599_v61, %v1597_v4  ;;  %v1578_v55 = vsub.f32 0.0, %v1562_v57  ;;  %v1577_v48 = vsub.f32 0.0, %v1561_v17  ;;  %v1403_v20 = vmul.f32 0.5, %v5641_v5  ;;  %v3776_v5 = vld [vmem:[%s6451_s14] ss:$0 sm:$0xff] }
 0x897   :  { %v1600_v6 = vmul.f32 %v1592_v62, %v1400_v24  ;;  %v1563_v16 = vsub.f32 1.0, %v1555_v10  ;;  %v1516_v44 = vmul.f32 %v5693_v22, %v1508_v53  ;;  %v1402_v27 = vmul.f32 0.5, %v5632_v3 }
 0x898   :  { %v1586_v54 = vsel %vm1570_vm7, %v1562_v57, %v1578_v55  ;;  %v1585_v41 = vsel %vm1569_vm9, %v1561_v17, %v1577_v48  ;;  %vm3607_vm3 = vcmask 7168   ;;  %vm3704_vm4 = vcmask 1040384  }
 0x899   :  { %v1606_v31 = vpack.c.bf16 %v1600_v6, %v1598_v45  ;;  %v1579_v63 = vsub.f32 0.0, %v1563_v16  ;;  %v1556_v8 = vmul.f32 %v4818_v26, %v1516_v44  ;;  %v1594_v36 = vadd.f32 1.0, %v1586_v54  ;;  %v4632_v54 = vld [vmem:[%s6461_s20 + $0x154] ss:$12 sps:$4 sm:$0xff]  }
 0x89a   :  { %v1593_v22 = vadd.f32 1.0, %v1585_v41  ;;  %v4636_v41 = vld [vmem:[%s6461_s20 + $0x170] ss:$12 sps:$4 sm:$0xff]   ;;  %vm3706_vm5 = vcmask 1041408   ;;  %vm3708_vm6 = vcmask 1042432  }
 0x89b   :  { %1776 = vmatprep.mubr.bf16.mxu1 %v1606_v31  ;;  %v1587_v40 = vsel %vm1571_vm8, %v1563_v16, %v1579_v63  ;;  %v1564_v30 = vsub.f32 1.0, %v1556_v8  ;;  %v1602_v24 = vmul.f32 %v1594_v36, %v1402_v27  ;;  %4241 = vmatprep.subr.bf16.mxu1 %v4636_v41  ;;  %v4640_v36 = vld [vmem:[%s6461_s20 + $0x158] ss:$12 sps:$4 sm:$0xff]   ;;  %v4641_v27 = vld [vmem:[%s6461_s20 + $0x108] ss:$12 sps:$4 sm:$0xff]  }
 0x89c   :  { %1777 = vmatmul.mubr.bf16.vlgmr.msra.gmra.mxu1 %v1605_v43  ;;  %v1595_v34 = vadd.f32 1.0, %v1587_v40  ;;  %v1601_v46 = vmul.f32 %v1593_v22, %v1401_v0  ;;  %v4630_v40 = vld [vmem:[%s6461_s20 + $0x150] ss:$12 sps:$4 sm:$0xff]   ;;  %v4637_v22 = vld [vmem:[%s6461_s20 + $0x120] ss:$12 sps:$4 sm:$0xff]  }
 0x89d   :  { %v1580_v38 = vsub.f32 0.0, %v1564_v30  ;;  %4242 = vmatpush3.bf16.msra.mxu1 %v4636_v41  ;;  %v4648_v0 = vld [vmem:[%s6461_s20 + $0x128] ss:$12 sps:$4 sm:$0xff]  }
 0x89e   :  { %v1603_v7 = vmul.f32 %v1595_v34, %v1403_v20  ;;  %v4633_v34 = vld [vmem:[%s6461_s20 + $0x138] ss:$12 sps:$4 sm:$0xff]   ;;  %4243 = vmatprep.subr.bf16.mxu1 %v4640_v36 }
 0x89f   :  { %v1588_v49 = vsel %vm1572_vm10, %v1564_v30, %v1580_v38  ;;  %v4635_v30 = vld [vmem:[%s6461_s20 + $0x13c] ss:$12 sps:$4 sm:$0xff]   ;;  %v4639_v38 = vld [vmem:[%s6461_s20 + $0x124] ss:$12 sps:$4 sm:$0xff]   ;;  %v4643_v20 = vld [vmem:[%s6461_s20 + $0x10c] ss:$12 sps:$4 sm:$0xff]  }
 0x8a0   :  { %v1596_v12 = vadd.f32 1.0, %v1588_v49  ;;  %v1607_v33 = vpack.c.bf16 %v1603_v7, %v1601_v46  ;;  %v4644_v49 = vld [vmem:[%s6461_s20 + $0x140] ss:$12 sps:$4 sm:$0xff]   ;;  %v4651_v7 = vld [vmem:[%s6461_s20 + $0xdc] ss:$12 sps:$4 sm:$0xff]  }
 0x8a1   :  { %4244 = vmatpush3.bf16.msra.mxu1 %v4640_v36  ;;  %v4655_v46 = vld [vmem:[%s6461_s20 + $0xc4] ss:$12 sps:$4 sm:$0xff]  }
 0x8a2   :  { %v1604_v52 = vmul.f32 %v1596_v12, %v1404_v28  ;;  %4245 = vmatprep.subr.bf16.mxu1 %v4644_v49  ;;  %v4645_v28 = vld [vmem:[%s6461_s20 + $0xf0] ss:$12 sps:$4 sm:$0xff]   ;;  %v4647_v12 = vld [vmem:[%s6461_s20 + $0xf4] ss:$12 sps:$4 sm:$0xff]  }
 0x8a4   :  { %v1608_v35 = vpack.c.bf16 %v1604_v52, %v1602_v24  ;;  %v4652_v24 = vld [vmem:[%s6461_s20 + $0x110] ss:$12 sps:$4 sm:$0xff]   ;;  %v4649_v52 = vld [vmem:[%s6461_s20 + $0xd8] ss:$12 sps:$4 sm:$0xff]  }
 0x8a5   :  { %4246 = vmatpush3.bf16.msra.mxu1 %v4644_v49 }
 0x8a6   :  { %1784 = vmatprep.mubr.bf16.mxu1 %v1608_v35  ;;  %4247 = vmatprep.subr.bf16.mxu1 %v4648_v0  ;;  %v4656_v35 = vld [vmem:[%s6461_s20 + $0xf8] ss:$12 sps:$4 sm:$0xff]  }
 0x8a7   :  { %1785 = vmatmul.mubr.bf16.gmra.mxu1 %v1607_v33  ;;  %v4653_v33 = vld [vmem:[%s6461_s20 + $0xc0] ss:$12 sps:$4 sm:$0xff]  }
 0x8a9   :  { %4248 = vmatpush3.bf16.msra.mxu1 %v4648_v0 }
 0x8aa   :  { %4249 = vmatprep.subr.bf16.mxu1 %v4652_v24 }
 0x8ad   :  { %4250 = vmatpush3.bf16.msra.mxu1 %v4652_v24 }
 0x8ae   :  { %4251 = vmatprep.subr.bf16.mxu1 %v4656_v35 }
 0x8b1   :  { %4252 = vmatpush3.bf16.msra.mxu1 %v4656_v35 }
 0x95c   :  { %v4045_v23 = vpop.f32.mrf.mxu1 }
 0x95e   :  { %v4046_v60 = vpop.f32.mrf.mxu1 }
 0x95f   :  { %v4047_v3 = vadd.f32 %v4046_v60, %v4045_v23  ;;  %v4657_v23 = vld [vmem:[%s6461_s20 + $0xe0] ss:$12 sps:$4 sm:$0xff]  }
 0x960   :  { %v4048_v50 = vpop.f32.mrf.mxu1  ;;  %4253 = vmatprep.subr.bf16.mxu1 %v4657_v23 }
 0x961   :  { %v1779_v19 = vadd.f32 %v4047_v3, %v3776_v5  ;;  %4254 = vmatpush3.bf16.msra.mxu1 %v4657_v23 }
 0x962   :  { %v4049_v47 = vpop.f32.mrf.mxu1 }
 0x963   :  { %v4050_v42 = vadd.f32 %v4049_v47, %v4048_v50  ;;  %v1793_v2 = vadd.f32 %v1779_v19, %v5538_v11  ;;  %v4627_v11 = vld [vmem:[%s6461_s20 + $0x168] ss:$12 sps:$4 sm:$0xff]  }
 0x965   :  { %v1782_v29 = vadd.f32 %v4050_v42, %v3776_v5  ;;  %1799 = vadd.xlane.f32.xlu1 %v1793_v2 }
 0x967   :  { %v1794_v62 = vadd.f32 %v1782_v29, %v5540_v13  ;;  %v4051_v25 = vpop.f32.mrf.mxu1  ;;  %v4629_v13 = vld [vmem:[%s6461_s20 + $0x16c] ss:$12 sps:$4 sm:$0xff]  }
 0x968   :  { %2044 = vmatprep.subr.bf16.mxu0 %v4629_v13 }
 0x969   :  { %1801 = vadd.xlane.f32.xlu0 %v1794_v62  ;;  %v4052_v37 = vpop.f32.mrf.mxu1  ;;  %2045 = vmatpush1.bf16.msra.mxu0 %v4627_v11 }
 0x96a   :  { %v4053_v1 = vadd.f32 %v4052_v37, %v4051_v25  ;;  %2046 = vmatprep.subr.bf16.mxu0 %v4632_v54 }
 0x96b   :  { %v4054_v51 = vpop.f32.mrf.mxu1 }
 0x96c   :  { %v1787_v56 = vadd.f32 %v4053_v1, %v3776_v5 }
 0x96d   :  { %v4055_v61 = vpop.f32.mrf.mxu1  ;;  %2047 = vmatpush1.bf16.msra.mxu0 %v4630_v40 }
 0x96e   :  { %v4056_v6 = vadd.f32 %v4055_v61, %v4054_v51  ;;  %v1795_v57 = vadd.f32 %v1787_v56, %v5548_v32  ;;  %2048 = vmatprep.subr.bf16.mxu0 %v4635_v30  ;;  %v3793_v56 = vld [vmem:[%s6452_s15] ss:$0 sm:$0xff] }
 0x970   :  { %v1790_v9 = vadd.f32 %v4056_v6, %v3776_v5  ;;  %1803 = vadd.xlane.f32.xlu1 %v1795_v57  ;;  %v4658_v5 = vld [vmem:[%s6461_s20 + $0xc8] ss:$12 sps:$4 sm:$0xff]  }
 0x971   :  { %2049 = vmatpush1.bf16.msra.mxu0 %v4633_v34  ;;  %4255 = vmatprep.subr.bf16.mxu1 %v4658_v5 }
 0x972   :  { %v1796_v58 = vadd.f32 %v1790_v9, %v5546_v59  ;;  %2050 = vmatprep.subr.bf16.mxu0 %v4639_v38  ;;  %4256 = vmatpush3.bf16.msra.mxu1 %v4658_v5 }
 0x974   :  { %1805 = vadd.xlane.f32.xlu0 %v1796_v58 }
 0x975   :  { %2051 = vmatpush1.bf16.msra.mxu0 %v4637_v22 }
 0x976   :  { %2052 = vmatprep.subr.bf16.mxu0 %v4643_v20 }
 0x979   :  { %2053 = vmatpush1.bf16.msra.mxu0 %v4641_v27 }
 0x97a   :  { %2054 = vmatprep.subr.bf16.mxu0 %v4647_v12 }
 0x97d   :  { %2055 = vmatpush1.bf16.msra.mxu0 %v4645_v28 }
 0x97e   :  { %2056 = vmatprep.subr.bf16.mxu0 %v4651_v7 }
 0x981   :  { %2057 = vmatpush1.bf16.msra.mxu0 %v4649_v52 }
 0x982   :  { %2058 = vmatprep.subr.bf16.mxu0 %v4655_v46 }
 0x985   :  { %2059 = vmatpush1.bf16.msra.mxu0 %v4653_v33 }
 0x9ee   :  { %v1800_v45 = vpop.xlane.xlu1 %1799 }
 0x9ef   :  { %v1807_v17 = vmul.f32 0.0078125, %v1800_v45 }
 0x9f1   :  { %v5748_v4 = vsub.f32 %v1793_v2, %v1807_v17 }
 0x9f2   :  { %v1802_v32 = vpop.xlane.xlu0 %1801 }
 0x9f3   :  { %v1808_v10 = vmul.f32 0.0078125, %v1802_v32  ;;  %v1815_v59 = vmul.f32 %v5748_v4, %v5748_v4 }
 0x9f5   :  { %v5752_v53 = vsub.f32 %v1794_v62, %v1808_v10  ;;  %1819 = vadd.xlane.f32.xlu1 %v1815_v59 }
 0x9f7   :  { %v1816_v31 = vmul.f32 %v5752_v53, %v5752_v53 }
 0x9f9   :  { %1821 = vadd.xlane.f32.xlu0 %v1816_v31  ;;  %v1804_v43 = vpop.xlane.xlu1 %1803 }
 0x9fa   :  { %v1809_v55 = vmul.f32 0.0078125, %v1804_v43 }
 0x9fc   :  { %v5756_v16 = vsub.f32 %v1795_v57, %v1809_v55 }
 0x9fd   :  { %v1806_v44 = vpop.xlane.xlu0 %1805 }
 0x9fe   :  { %v1810_v26 = vmul.f32 0.0078125, %v1806_v44  ;;  %v1817_v48 = vmul.f32 %v5756_v16, %v5756_v16 }
 0xa00   :  { %v5760_v63 = vsub.f32 %v1796_v58, %v1810_v26  ;;  %1823 = vadd.xlane.f32.xlu1 %v1817_v48  ;;  %v3794_v58 = vld [vmem:[%s6453_s16] ss:$0 sm:$0xff]  ;;  %v3827_v26 = vld [vmem:[%s6442_s6 + $0x3] sm:$0x7] }
 0xa01   :  { %v1908_v54 = vrot.slane %v3827_v26, %v5193_v18  ;;  %v1912_v7 = vrot.slane %v3827_v26, %v190_v21 }
 0xa02   :  { %v1818_v8 = vmul.f32 %v5760_v63, %v5760_v63 }
 0xa04   :  { %1825 = vadd.xlane.f32.xlu0 %v1818_v8 }
 0xa7e   :  { %v1820_v60 = vpop.xlane.xlu1 %1819 }
 0xa7f   :  { %v1827_v3 = vmul.f32 0.0078125, %v1820_v60 }
 0xa81   :  { %v1831_v50 = vadd.f32 1e-12, %v1827_v3 }
 0xa82   :  { %v1822_v19 = vpop.xlane.xlu0 %1821 }
 0xa83   :  { %4819 = vrsqrt.f32 %v1831_v50  ;;  %v1828_v47 = vmul.f32 0.0078125, %v1822_v19 }
 0xa85   :  { %v1832_v42 = vadd.f32 1e-12, %v1828_v47 }
 0xa87   :  { %4821 = vrsqrt.f32 %v1832_v42 }
 0xa89   :  { %v1824_v2 = vpop.xlane.xlu1 %1823 }
 0xa8a   :  { %v1829_v29 = vmul.f32 0.0078125, %v1824_v2 }
 0xa8c   :  { %v1833_v62 = vadd.f32 1e-12, %v1829_v29 }
 0xa8d   :  { %v1826_v37 = vpop.xlane.xlu0 %1825 }
 0xa8e   :  { %4823 = vrsqrt.f32 %v1833_v62  ;;  %v1830_v51 = vmul.f32 0.0078125, %v1826_v37 }
 0xa90   :  { %v4820_v25 = vpop.eup %4819  ;;  %v1834_v61 = vadd.f32 1e-12, %v1830_v51 }
 0xa91   :  { %v1839_v1 = vmul.f32 %v4820_v25, %v5748_v4 }
 0xa92   :  { %4825 = vrsqrt.f32 %v1834_v61 }
 0xa93   :  { %v1849_v9 = vmul.f32 %v3793_v56, %v1839_v1 }
 0xa94   :  { %v4822_v6 = vpop.eup %4821 }
 0xa95   :  { %v1840_v57 = vmul.f32 %v4822_v6, %v5752_v53  ;;  %v5838_v13 = vadd.f32 %v3794_v58, %v1849_v9 }
 0xa97   :  { %v1850_v11 = vmul.f32 %v3793_v56, %v1840_v57 }
 0xa99   :  { %v5840_v45 = vadd.f32 %v3794_v58, %v1850_v11 }
 0xa9b   :  { %v1863_v17 = vpack.c.bf16 %v5840_v45, %v5838_v13  ;;  %v4824_v4 = vpop.eup %4823 }
 0xa9c   :  { %v1841_v32 = vmul.f32 %v4824_v4, %v5756_v16  ;;  %v1904_v16 = vrot.slane %v3827_v26, %v5186_v15 }
 0xa9d   :  { %2077 = vmatmul.mubr.bf16.vlgmr.msra.gmra.mxu0 %v1863_v17  ;;  %4257 = vmatprep.mubr.bf16.mxu1 %v1863_v17 }
 0xa9e   :  { %2086 = vmatprep.mubr.bf16.mxu0 %v4963_v39  ;;  %v1851_v53 = vmul.f32 %v3793_v56, %v1841_v32 }
 0xa9f   :  { %v4826_v10 = vpop.eup %4825 }
 0xaa0   :  { %v1842_v59 = vmul.f32 %v4826_v10, %v5760_v63  ;;  %v5847_v43 = vadd.f32 %v3794_v58, %v1851_v53 }
 0xaa2   :  { %v1852_v31 = vmul.f32 %v3793_v56, %v1842_v59 }
 0xaa4   :  { %v5849_v55 = vadd.f32 %v3794_v58, %v1852_v31 }
 0xaa6   :  { %v1864_v44 = vpack.c.bf16 %v5849_v55, %v5847_v43 }
 0xaa8   :  { %2087 = vmatmul.mubr.bf16.gmra.mxu0 %v1864_v44  ;;  %4258 = vmatmul.mubr.bf16.vlgmr.msra.gmra.mxu1 %v1864_v44 }
 0xb5d   :  { %v2078_v48 = vpop.f32.mrf.mxu0 }
 0xb5e   :  { %v2079_v63 = vadd.f32 %v2078_v48, %v1904_v16 }
 0xb5f   :  { %v2080_v8 = vpop.f32.mrf.mxu0 }
 0xb60   :  { %v2266_v34 = vmul.f32 0.17677669, %v2079_v63  ;;  %v2081_v38 = vadd.f32 %v2080_v8, %v1908_v54 }
 0xb61   :  { %v2082_v40 = vpop.f32.mrf.mxu0 }
 0xb62   :  { %v2083_v30 = vadd.f32 %v2082_v40, %v1904_v16 }
 0xb63   :  { %v2084_v41 = vpop.f32.mrf.mxu0 }
 0xb64   :  { %v2267_v36 = vmul.f32 0.17677669, %v2083_v30  ;;  %v2085_v22 = vadd.f32 %v2084_v41, %v1908_v54 }
 0xb66   :  { %v4460_v20 = vpack.i.bf16 %v2085_v22, %v2081_v38  ;;  %v2282_v49 = vpack.c.bf16 %v2267_v36, %v2266_v34  ;;  %v5858_v27 = vpack.c.bf16 %v2085_v22, %v2081_v38 }
 0xb68   :  { %4461 = vrot.lane.b32.xlu0 %v4460_v20, %s4964_s29  ;;  %4277 = vmatprep.mubr.msk.bf16.mxu0 %vm585_vm0, %v2282_v49  ;;  %v2088_v28 = vpop.f32.mrf.mxu0  ;;  %v4259_v12 = vpop.f32.mrf.mxu1 }
 0xb69   :  { %v2089_v0 = vadd.f32 %v2088_v28, %v1904_v16  ;;  %v2140_v60 = vadd.f32 %v4259_v12, %v1912_v7 }
 0xb6a   :  { %v2090_v24 = vpop.f32.mrf.mxu0  ;;  %v2131_v52 = vpop.f32.mrf.mxu1 }
 0xb6b   :  { %v5864_v5 = vmul.f32 0.17677669, %v2089_v0  ;;  %v2091_v19 = vadd.f32 %v2090_v24, %v1908_v54  ;;  %v2132_v29 = vadd.f32 %v2131_v52, %v1912_v7 }
 0xb6c   :  { %v2092_v46 = vpop.f32.mrf.mxu0  ;;  %v4260_v35 = vpop.f32.mrf.mxu1 }
 0xb6d   :  { %v2093_v33 = vadd.f32 %v2092_v46, %v1904_v16  ;;  %v2143_v23 = vadd.f32 %v4260_v35, %v1912_v7 }
 0xb6e   :  { %v2094_v3 = vpop.f32.mrf.mxu0  ;;  %v2134_v50 = vpop.f32.mrf.mxu1 }
 0xb6f   :  { %v5866_v47 = vmul.f32 0.17677669, %v2093_v33  ;;  %v2095_v42 = vadd.f32 %v2094_v3, %v1908_v54  ;;  %v2135_v2 = vadd.f32 %v2134_v50, %v1912_v7  ;;  %v5868_v62 = vpack.c.bf16 %v2143_v23, %v2140_v60 }
 0xb70   :  { %v4485_v51 = vpack.i.bf16 %v2143_v23, %v2140_v60 }
 0xb71   :  { %v2283_v14 = vpack.c.bf16 %v5866_v47, %v5864_v5  ;;  %v4475_v21 = vpack.i.bf16 %v2095_v42, %v2091_v19  ;;  %v5872_v25 = vpack.c.bf16 %v2095_v42, %v2091_v19  ;;  %v5874_v37 = vpack.i.bf16 %v2135_v2, %v2132_v29 }
 0xb72   :  { %v5878_v1 = vpack.c.bf16 %v2135_v2, %v2132_v29 }
 0xb73   :  { %4476 = vrot.lane.b32.xlu0 %v4475_v21, %s4966_s30  ;;  %4456 = vrot.lane.b32.xlu1 %v4475_v21, %s4964_s29 }
 0xb77   :  { %2150 = vrot.lane.b32.xlu0 %v2079_v63, %s4966_s30  ;;  %4466 = vrot.lane.b32.xlu1 %v4475_v21, %s4965_s0 }
 0xb7b   :  { %4471 = vrot.lane.b32.xlu1 %v4460_v20, %s4965_s0  ;;  %2154 = vrot.lane.b32.xlu0 %v2089_v0, %s4966_s30 }
 0xb7f   :  { %4481 = vrot.lane.b32.xlu1 %v4460_v20, %s4966_s30  ;;  %2162 = vrot.lane.b32.xlu0 %v2079_v63, %s4965_s0 }
 0xb83   :  { %2152 = vrot.lane.b32.xlu1 %v2083_v30, %s4966_s30  ;;  %2166 = vrot.lane.b32.xlu0 %v2089_v0, %s4965_s0 }
 0xb87   :  { %2156 = vrot.lane.b32.xlu1 %v2093_v33, %s4966_s30  ;;  %2174 = vrot.lane.b32.xlu0 %v2079_v63, %s4964_s29 }
 0xb8b   :  { %2164 = vrot.lane.b32.xlu1 %v2083_v30, %s4965_s0  ;;  %2178 = vrot.lane.b32.xlu0 %v2089_v0, %s4964_s29 }
 0xb8f   :  { %2168 = vrot.lane.b32.xlu1 %v2093_v33, %s4965_s0  ;;  %4486 = vrot.lane.b32.xlu0 %v4485_v51, %s4964_s29 }
 0xb93   :  { %2176 = vrot.lane.b32.xlu1 %v2083_v30, %s4964_s29  ;;  %4501 = vrot.lane.b32.xlu0 %v5874_v37, %s4964_s29 }
 0xb97   :  { %2180 = vrot.lane.b32.xlu1 %v2093_v33, %s4964_s29  ;;  %4506 = vrot.lane.b32.xlu0 %v5874_v37, %s4965_s0 }
 0xb9b   :  { %4491 = vrot.lane.b32.xlu1 %v4485_v51, %s4965_s0 }
 0xb9f   :  { %4496 = vrot.lane.b32.xlu1 %v4485_v51, %s4966_s30 }
 0xbda   :  { %v4462_v56 = vpop.permute.xlu0 %4461 }
 0xbdb   :  { %v4464_v57 = vunpack.i.h.bf16 %v4462_v56  ;;  %v4463_v9 = vunpack.i.l.bf16 %v4462_v56 }
 0xbdd   :  { %v2296_v10 = vpack.c.bf16 %v4464_v57, %v4463_v9 }
 0xbdf   :  { %v2349_v63 = vsel %vm585_vm0, %v2296_v10, 0 }
 0xbe5   :  { %v4457_v61 = vpop.permute.xlu1 %4456  ;;  %v4477_v6 = vpop.permute.xlu0 %4476 }
 0xbe6   :  { %v4459_v58 = vunpack.i.h.bf16 %v4457_v61  ;;  %v4458_v11 = vunpack.i.l.bf16 %v4457_v61  ;;  %v4479_v28 = vunpack.i.h.bf16 %v4477_v6  ;;  %v4478_v12 = vunpack.i.l.bf16 %v4477_v6 }
 0xbe8   :  { %v2297_v17 = vpack.c.bf16 %v4459_v58, %v4458_v11  ;;  %v2293_v24 = vpack.c.bf16 %v4479_v28, %v4478_v12 }
 0xbe9   :  { %v4467_v4 = vpop.permute.xlu1 %4466  ;;  %v5902_v32 = vpop.permute.xlu0 %2150 }
 0xbea   :  { %4353 = vmatprep.subr.msk.bf16.mxu0 %vm585_vm0, %v2297_v17  ;;  %v2352_v59 = vsel %vm585_vm0, %v2297_v17, 0  ;;  %v4469_v44 = vunpack.i.h.bf16 %v4467_v4  ;;  %v4468_v26 = vunpack.i.l.bf16 %v4467_v4  ;;  %v2340_v51 = vsel %vm585_vm0, %v2293_v24, 0 }
 0xbeb   :  { %4262 = vmatpush3.bf16.xpose.msra.mxu0 %v2352_v59 }
 0xbec   :  { %4354 = vmatprep.subr.msk.bf16.mxu0 %vm585_vm0, %v2296_v10  ;;  %v2295_v8 = vpack.c.bf16 %v4469_v44, %v4468_v26  ;;  %v2334_v26 = vsel %vm585_vm0, %v5872_v25, 0 }
 0xbed   :  { %v4472_v53 = vpop.permute.xlu1 %4471  ;;  %v5907_v31 = vpop.permute.xlu0 %2154 }
 0xbee   :  { %v4474_v30 = vunpack.i.h.bf16 %v4472_v53  ;;  %v4473_v41 = vunpack.i.l.bf16 %v4472_v53  ;;  %v2346_v22 = vsel %vm585_vm0, %v2295_v8, 0 }
 0xbf0   :  { %v2294_v36 = vpack.c.bf16 %v4474_v30, %v4473_v41 }
 0xbf1   :  { %v4482_v16 = vpop.permute.xlu1 %4481  ;;  %v5909_v48 = vpop.permute.xlu0 %2162 }
 0xbf2   :  { %v2343_v35 = vsel %vm585_vm0, %v2294_v36, 0  ;;  %v4484_v3 = vunpack.i.h.bf16 %v4482_v16  ;;  %v4483_v50 = vunpack.i.l.bf16 %v4482_v16  ;;  %v2331_v16 = vsel %vm585_vm0, %v5858_v27, 0 }
 0xbf3   :  { %4264 = vmatpush3.bf16.xpose.msra.mxu0 %v2349_v63  ;;  %v2270_v63 = vmul.f32 0.17677669, %v5902_v32 }
 0xbf4   :  { %4355 = vmatprep.subr.msk.bf16.mxu0 %vm585_vm0, %v2295_v8  ;;  %v2292_v21 = vpack.c.bf16 %v4484_v3, %v4483_v50  ;;  %v4951_v50 = vld [vmem:[%s6443_s2 + $0x30] sm:$0xff] }
 0xbf5   :  { %v5913_v54 = vpop.permute.xlu1 %2152  ;;  %v5915_v40 = vpop.permute.xlu0 %2166 }
 0xbf6   :  { %v2337_v53 = vsel %vm585_vm0, %v2292_v21, 0  ;;  %v2271_v8 = vmul.f32 0.17677669, %v5913_v54  ;;  %v2276_v47 = vmul.f32 0.17677669, %v5915_v40  ;;  %v4947_v40 = vld [vmem:[%s6443_s2 + $0x10] sm:$0xff] }
 0xbf8   :  { %v2284_v30 = vpack.c.bf16 %v2271_v8, %v2270_v63 }
 0xbf9   :  { %v5917_v34 = vpop.permute.xlu1 %2156  ;;  %v5919_v38 = vpop.permute.xlu0 %2174 }
 0xbfb   :  { %4266 = vmatpush3.bf16.xpose.msra.mxu0 %v2346_v22 }
 0xbfc   :  { %4356 = vmatprep.subr.msk.bf16.mxu0 %vm585_vm0, %v2294_v36  ;;  %v2272_v36 = vmul.f32 0.17677669, %v5907_v31 }
 0xbfd   :  { %v2165_v20 = vpop.permute.xlu1 %2164  ;;  %v5923_v49 = vpop.permute.xlu0 %2178 }
 0xbfe   :  { %v2275_v41 = vmul.f32 0.17677669, %v2165_v20 }
 0xc01   :  { %v5925_v0 = vpop.permute.xlu1 %2168  ;;  %v4487_v7 = vpop.permute.xlu0 %4486 }
 0xc02   :  { %v4489_v52 = vunpack.i.h.bf16 %v4487_v7  ;;  %v4488_v46 = vunpack.i.l.bf16 %v4487_v7  ;;  %v2277_v32 = vmul.f32 0.17677669, %v5925_v0  ;;  %v4948_v7 = vld [vmem:[%s6443_s2] sm:$0xff] }
 0xc03   :  { %4268 = vmatpush3.bf16.xpose.msra.mxu0 %v2343_v35 }
 0xc04   :  { %v2305_v33 = vpack.c.bf16 %v4489_v52, %v4488_v46  ;;  %4357 = vmatprep.subr.msk.bf16.mxu0 %vm585_vm0, %v2293_v24  ;;  %v2287_v54 = vpack.c.bf16 %v2277_v32, %v2276_v47  ;;  %v4949_v46 = vld [vmem:[%s6443_s2 + $0x18] sm:$0xff] }
 0xc05   :  { %v2177_v23 = vpop.permute.xlu1 %2176  ;;  %v4502_v60 = vpop.permute.xlu0 %4501 }
 0xc06   :  { %v4504_v19 = vunpack.i.h.bf16 %v4502_v60  ;;  %v4503_v42 = vunpack.i.l.bf16 %v4502_v60  ;;  %4293 = vmatprep.subr.bf16.mxu1 %v2305_v33  ;;  %v2279_v5 = vmul.f32 0.17677669, %v2177_v23 }
 0xc07   :  { %4294 = vmatpush3.bf16.msra.mxu1 %v2305_v33  ;;  %v4950_v33 = vld [vmem:[%s6443_s2 + $0x8] sm:$0xff] }
 0xc08   :  { %v2304_v2 = vpack.c.bf16 %v4504_v19, %v4503_v42  ;;  %v4952_v42 = vld [vmem:[%s6443_s2 + $0x20] sm:$0xff] }
 0xc09   :  { %v2181_v29 = vpop.permute.xlu1 %2180  ;;  %v4507_v56 = vpop.permute.xlu0 %4506 }
 0xc0a   :  { %4295 = vmatprep.subr.bf16.mxu1 %v2304_v2  ;;  %v4509_v6 = vunpack.i.h.bf16 %v4507_v56  ;;  %v4508_v57 = vunpack.i.l.bf16 %v4507_v56  ;;  %v2281_v31 = vmul.f32 0.17677669, %v2181_v29 }
 0xc0b   :  { %4270 = vmatpush3.bf16.xpose.msra.mxu0 %v2340_v51  ;;  %4296 = vmatpush3.bf16.msra.mxu1 %v2304_v2  ;;  %v4953_v51 = vld [vmem:[%s6443_s2 + $0x38] sm:$0xff] }
 0xc0c   :  { %4358 = vmatprep.subr.msk.bf16.mxu0 %vm585_vm0, %v2292_v21  ;;  %v2302_v4 = vpack.c.bf16 %v4509_v6, %v4508_v57 }
 0xc0d   :  { %v4492_v61 = vpop.permute.xlu1 %4491 }
 0xc0e   :  { %v4494_v9 = vunpack.i.h.bf16 %v4492_v61  ;;  %v4493_v58 = vunpack.i.l.bf16 %v4492_v61  ;;  %v4954_v61 = vld [vmem:[%s6443_s2 + $0x28] sm:$0xff] }
 0xc10   :  { %v2303_v11 = vpack.c.bf16 %v4494_v9, %v4493_v58  ;;  %v4955_v58 = vld [vmem:[%s6443_s2 + $0x50] sm:$0xff] }
 0xc11   :  { %v4497_v17 = vpop.permute.xlu1 %4496 }
 0xc12   :  { %v4499_v10 = vunpack.i.h.bf16 %v4497_v17  ;;  %v4498_v59 = vunpack.i.l.bf16 %v4497_v17  ;;  %4297 = vmatprep.subr.bf16.mxu1 %v2303_v11  ;;  %v4956_v17 = vld [vmem:[%s6443_s2 + $0x40] sm:$0xff] }
 0xc13   :  { %4272 = vmatpush3.bf16.xpose.msra.mxu0 %v2337_v53  ;;  %4298 = vmatpush3.bf16.msra.mxu1 %v2303_v11  ;;  %v4957_v53 = vld [vmem:[%s6443_s2 + $0x58] sm:$0xff] }
 0xc14   :  { %4359 = vmatprep.subr.msk.bf16.mxu0 %vm585_vm0, %v5872_v25  ;;  %4299 = vmatprep.subr.bf16.mxu1 %v2302_v4  ;;  %v2301_v44 = vpack.c.bf16 %v4499_v10, %v4498_v59  ;;  %v2273_v25 = vmul.f32 0.17677669, %v5917_v34 }
 0xc16   :  { %v2285_v22 = vpack.c.bf16 %v2273_v25, %v2272_v36  ;;  %v4960_v36 = vld [vmem:[%s6443_s2 + $0x60] sm:$0xff] }
 0xc17   :  { %4300 = vmatpush3.bf16.msra.mxu1 %v2302_v4 }
 0xc18   :  { %4301 = vmatprep.subr.bf16.mxu1 %v2301_v44 }
 0xc1b   :  { %4274 = vmatpush3.bf16.xpose.msra.mxu0 %v2334_v26  ;;  %4302 = vmatpush3.bf16.msra.mxu1 %v2301_v44  ;;  %v4958_v26 = vld [vmem:[%s6443_s2 + $0x48] sm:$0xff] }
 0xc1c   :  { %4360 = vmatprep.subr.msk.bf16.mxu0 %vm585_vm0, %v5858_v27  ;;  %v2274_v27 = vmul.f32 0.17677669, %v5909_v48  ;;  %v2280_v48 = vmul.f32 0.17677669, %v5923_v49 }
 0xc1e   :  { %v2286_v28 = vpack.c.bf16 %v2275_v41, %v2274_v27  ;;  %v2289_v20 = vpack.c.bf16 %v2281_v31, %v2280_v48 }
 0xc23   :  { %4276 = vmatpush3.bf16.xpose.msra.mxu0 %v2331_v16 }
 0xc2a   :  { %4278 = vmatmul.mubr.msk.bf16.vlgmr.msra.gmra.mxu0 %vm585_vm0, %v2283_v14  ;;  %v2278_v14 = vmul.f32 0.17677669, %v5919_v38 }
 0xc2b   :  { %4281 = vmatprep.mubr.msk.bf16.mxu0 %vm585_vm0, %v2284_v30  ;;  %v4959_v30 = vld [vmem:[%s6443_s2 + $0x70] sm:$0xff] }
 0xc2c   :  { %v2288_v34 = vpack.c.bf16 %v2279_v5, %v2278_v14  ;;  %v4962_v5 = vld [vmem:[%s6443_s2 + $0x78] sm:$0xff] }
 0xc32   :  { %4282 = vmatmul.mubr.msk.bf16.gmra.mxu0 %vm585_vm0, %v2285_v22 }
 0xc33   :  { %4285 = vmatprep.mubr.msk.bf16.mxu0 %vm585_vm0, %v2286_v28  ;;  %v4961_v28 = vld [vmem:[%s6443_s2 + $0x68] sm:$0xff] }
 0xc3a   :  { %4286 = vmatmul.mubr.msk.bf16.gmra.mxu0 %vm585_vm0, %v2287_v54 }
 0xc3b   :  { %4289 = vmatprep.mubr.msk.bf16.mxu0 %vm585_vm0, %v2288_v34 }
 0xc42   :  { %4290 = vmatmul.mubr.msk.bf16.gmra.mxu0 %vm585_vm0, %v2289_v20 }
 0xc43   :  { %3100 = vmatprep.mubr.bf16.mxu0 %v4963_v39 }
 0xcea   :  { %v4279_v12 = vpop.f32.mrf.mxu0 }
 0xceb   :  { %v5963_v38 = vadd.f32 %v4947_v40, %v4279_v12 }
 0xcec   :  { %v2388_v0 = vpop.f32.mrf.mxu0 }
 0xced   :  { %v5968_v24 = vadd.f32 %v4948_v7, %v2388_v0  ;;  %2455 = vmax.xlane.f32.xlu0 %v5963_v38 }
 0xcee   :  { %v4280_v49 = vpop.f32.mrf.mxu0 }
 0xcef   :  { %2451 = vmax.xlane.f32.xlu1 %v5968_v24  ;;  %v5975_v35 = vadd.f32 %v4949_v46, %v4280_v49 }
 0xcf0   :  { %v2391_v52 = vpop.f32.mrf.mxu0 }
 0xcf1   :  { %v2392_v23 = vadd.f32 %v4950_v33, %v2391_v52 }
 0xcf2   :  { %v4283_v60 = vpop.f32.mrf.mxu0 }
 0xcf3   :  { %2453 = vmax.xlane.f32.xlu0 %v2392_v23  ;;  %2457 = vmax.xlane.f32.xlu1 %v5975_v35  ;;  %v2413_v19 = vadd.f32 %v4951_v50, %v4283_v60 }
 0xcf4   :  { %v2404_v3 = vpop.f32.mrf.mxu0 }
 0xcf5   :  { %v2405_v2 = vadd.f32 %v4952_v42, %v2404_v3 }
 0xcf6   :  { %v4284_v29 = vpop.f32.mrf.mxu0 }
 0xcf7   :  { %2463 = vmax.xlane.f32.xlu0 %v2413_v19  ;;  %2459 = vmax.xlane.f32.xlu1 %v2405_v2  ;;  %v2416_v56 = vadd.f32 %v4953_v51, %v4284_v29 }
 0xcf8   :  { %v2407_v21 = vpop.f32.mrf.mxu0 }
 0xcf9   :  { %v5993_v6 = vadd.f32 %v4954_v61, %v2407_v21 }
 0xcfa   :  { %v4287_v57 = vpop.f32.mrf.mxu0 }
 0xcfb   :  { %2461 = vmax.xlane.f32.xlu0 %v5993_v6  ;;  %2465 = vmax.xlane.f32.xlu1 %v2416_v56  ;;  %v5999_v11 = vadd.f32 %v4955_v58, %v4287_v57 }
 0xcfc   :  { %v2420_v9 = vpop.f32.mrf.mxu0 }
 0xcfd   :  { %v6004_v4 = vadd.f32 %v4956_v17, %v2420_v9 }
 0xcfe   :  { %v4288_v10 = vpop.f32.mrf.mxu0 }
 0xcff   :  { %2471 = vmax.xlane.f32.xlu0 %v5999_v11  ;;  %2467 = vmax.xlane.f32.xlu1 %v6004_v4  ;;  %v6011_v44 = vadd.f32 %v4957_v53, %v4288_v10 }
 0xd00   :  { %v2423_v59 = vpop.f32.mrf.mxu0 }
 0xd01   :  { %v6016_v16 = vadd.f32 %v4958_v26, %v2423_v59 }
 0xd02   :  { %v4291_v8 = vpop.f32.mrf.mxu0 }
 0xd03   :  { %2469 = vmax.xlane.f32.xlu0 %v6016_v16  ;;  %2473 = vmax.xlane.f32.xlu1 %v6011_v44  ;;  %v6023_v25 = vadd.f32 %v4959_v30, %v4291_v8 }
 0xd04   :  { %v2436_v63 = vpop.f32.mrf.mxu0 }
 0xd05   :  { %v6029_v27 = vadd.f32 %v4960_v36, %v2436_v63 }
 0xd06   :  { %v4292_v41 = vpop.f32.mrf.mxu0 }
 0xd07   :  { %2479 = vmax.xlane.f32.xlu1 %v6023_v25  ;;  %v6041_v47 = vadd.f32 %v4962_v5, %v4292_v41 }
 0xd08   :  { %v2439_v22 = vpop.f32.mrf.mxu0 }
 0xd09   :  { %v6035_v32 = vadd.f32 %v4961_v28, %v2439_v22 }
 0xd0b   :  { %2475 = vmax.xlane.f32.xlu1 %v6029_v27 }
 0xd0f   :  { %2477 = vmax.xlane.f32.xlu1 %v6035_v32 }
 0xd13   :  { %2481 = vmax.xlane.f32.xlu1 %v6041_v47 }
 0xd19   :  { %4511 = vrot.lane.b32.xlu0 %v5874_v37, %s4966_s30 }
 0xd76   :  { %v2456_v14 = vpop.xlane.xlu0 %2455 }
 0xd77   :  { %v2485_v21 = vsub.f32 %v5963_v38, %v2456_v14 }
 0xd78   :  { %v2452_v54 = vpop.xlane.xlu1 %2451 }
 0xd79   :  { %v2483_v34 = vsub.f32 %v5968_v24, %v2452_v54 }
 0xd7b   :  { %v2499_v31 = vmul.f32 1.442695, %v2483_v34 }
 0xd7c   :  { %v2454_v48 = vpop.xlane.xlu0 %2453  ;;  %v2458_v20 = vpop.xlane.xlu1 %2457 }
 0xd7d   :  { %v2484_v12 = vsub.f32 %v2392_v23, %v2454_v48  ;;  %4827 = vpow2.f32 %v2499_v31  ;;  %v2486_v50 = vsub.f32 %v5975_v35, %v2458_v20 }
 0xd7f   :  { %v2501_v40 = vmul.f32 1.442695, %v2484_v12 }
 0xd80   :  { %v2464_v0 = vpop.xlane.xlu0 %2463  ;;  %v2460_v7 = vpop.xlane.xlu1 %2459 }
 0xd81   :  { %4829 = vpow2.f32 %v2501_v40  ;;  %v2489_v49 = vsub.f32 %v2413_v19, %v2464_v0  ;;  %v2487_v52 = vsub.f32 %v2405_v2, %v2460_v7  ;;  %v2505_v2 = vmul.f32 1.442695, %v2486_v50 }
 0xd83   :  { %v2511_v46 = vmul.f32 1.442695, %v2489_v49  ;;  %v2507_v33 = vmul.f32 1.442695, %v2487_v52 }
 0xd84   :  { %v2462_v60 = vpop.xlane.xlu0 %2461  ;;  %v2466_v3 = vpop.xlane.xlu1 %2465 }
 0xd85   :  { %4831 = vpow2.f32 %v2511_v46  ;;  %v2490_v37 = vsub.f32 %v2416_v56, %v2466_v3  ;;  %v2488_v24 = vsub.f32 %v5993_v6, %v2462_v60  ;;  %v2503_v56 = vmul.f32 1.442695, %v2485_v21 }
 0xd86   :  { %4833 = vpow2.f32 %v2507_v33 }
 0xd87   :  { %v2513_v42 = vmul.f32 1.442695, %v2490_v37  ;;  %v2509_v51 = vmul.f32 1.442695, %v2488_v24 }
 0xd88   :  { %v2472_v23 = vpop.xlane.xlu0 %2471  ;;  %v2468_v29 = vpop.xlane.xlu1 %2467 }
 0xd89   :  { %4835 = vpow2.f32 %v2513_v42  ;;  %v2493_v19 = vsub.f32 %v5999_v11, %v2472_v23  ;;  %v2491_v35 = vsub.f32 %v6004_v4, %v2468_v29  ;;  %v4659_v42 = vld [vmem:[%s6444_s7 + $0x78] sm:$0xff]   ;;  %v4660_v23 = vld [vmem:[%s6444_s7 + $0x70] sm:$0xff]   ;;  %v4661_v29 = vld [vmem:[%s6444_s7 + $0x68] sm:$0xff]  }
 0xd8a   :  { %v6051_v9 = vpop.eup %4827  ;;  %4837 = vpow2.f32 %v2509_v51 }
 0xd8b   :  { %v2519_v6 = vmul.f32 1.442695, %v2493_v19  ;;  %4839 = vpow2.f32 %v2505_v2  ;;  %v2515_v63 = vmul.f32 1.442695, %v2491_v35 }
 0xd8c   :  { %v2470_v61 = vpop.xlane.xlu0 %2469  ;;  %v2474_v57 = vpop.xlane.xlu1 %2473  ;;  %4841 = vpow2.f32 %v2503_v56 }
 0xd8d   :  { %v2492_v17 = vsub.f32 %v6016_v16, %v2470_v61  ;;  %4843 = vpow2.f32 %v2519_v6  ;;  %v2494_v30 = vsub.f32 %v6011_v44, %v2474_v57 }
 0xd8e   :  { %v6053_v58 = vpop.eup %4829 }
 0xd8f   :  { %v2563_v38 = vpack.c.bf16 %v6053_v58, %v6051_v9  ;;  %v2517_v22 = vmul.f32 1.442695, %v2492_v17  ;;  %v2521_v28 = vmul.f32 1.442695, %v2494_v30 }
 0xd90   :  { %v4512_v10 = vpop.permute.xlu0 %4511  ;;  %v2480_v11 = vpop.xlane.xlu1 %2479 }
 0xd91   :  { %v4514_v59 = vunpack.i.h.bf16 %v4512_v10  ;;  %v4513_v53 = vunpack.i.l.bf16 %v4512_v10  ;;  %v2497_v26 = vsub.f32 %v6023_v25, %v2480_v11  ;;  %4309 = vmatprep.mubr.bf16.mxu1 %v2563_v38 }
 0xd92   :  { %v4832_v8 = vpop.eup %4831 }
 0xd93   :  { %v4834_v4 = vpop.eup %4833  ;;  %v2300_v41 = vpack.c.bf16 %v4514_v59, %v4513_v53  ;;  %v2527_v36 = vmul.f32 1.442695, %v2497_v26  ;;  %2543 = vadd.xlane.f32.xlu0 %v4832_v8  ;;  %v4662_v59 = vld [vmem:[%s6444_s7 + $0x60] sm:$0xff]   ;;  %v4663_v53 = vld [vmem:[%s6444_s7 + $0x58] sm:$0xff]  }
 0xd94   :  { %2539 = vadd.xlane.f32.xlu1 %v4834_v4  ;;  %v2476_v16 = vpop.xlane.xlu1 %2475 }
 0xd95   :  { %4845 = vpow2.f32 %v2527_v36  ;;  %4303 = vmatprep.subr.bf16.mxu1 %v2300_v41  ;;  %v2495_v14 = vsub.f32 %v6029_v27, %v2476_v16 }
 0xd96   :  { %4847 = vpow2.f32 %v2515_v63  ;;  %4304 = vmatpush3.bf16.msra.mxu1 %v2300_v41  ;;  %v4836_v5 = vpop.eup %4835 }
 0xd97   :  { %4305 = vmatprep.subr.bf16.mxu1 %v5868_v62  ;;  %4849 = vpow2.f32 %v2517_v22  ;;  %v4838_v54 = vpop.eup %4837  ;;  %v2523_v12 = vmul.f32 1.442695, %v2495_v14 }
 0xd98   :  { %2545 = vadd.xlane.f32.xlu1 %v4836_v5  ;;  %v2478_v25 = vpop.xlane.xlu1 %2477  ;;  %4851 = vpow2.f32 %v2521_v28  ;;  %v4840_v34 = vpop.eup %4839  ;;  %v2565_v27 = vpack.c.bf16 %v4838_v54, %v4834_v4 }
 0xd99   :  { %v2496_v44 = vsub.f32 %v6035_v32, %v2478_v25  ;;  %v4842_v20 = vpop.eup %4841  ;;  %v4664_v25 = vld [vmem:[%s6444_s7 + $0x50] sm:$0xff]  }
 0xd9a   :  { %4306 = vmatpush3.bf16.msra.mxu1 %v5868_v62  ;;  %v4844_v40 = vpop.eup %4843  ;;  %v2564_v32 = vpack.c.bf16 %v4840_v34, %v4842_v20 }
 0xd9b   :  { %4307 = vmatprep.subr.bf16.mxu1 %v5878_v1  ;;  %v2525_v31 = vmul.f32 1.442695, %v2496_v44 }
 0xd9c   :  { %2541 = vadd.xlane.f32.xlu1 %v4838_v54  ;;  %v2482_v48 = vpop.xlane.xlu1 %2481 }
 0xd9d   :  { %v2498_v0 = vsub.f32 %v6041_v47, %v2482_v48  ;;  %4853 = vpow2.f32 %v2525_v31 }
 0xd9e   :  { %4308 = vmatpush3.bf16.msra.mxu1 %v5878_v1  ;;  %4855 = vpow2.f32 %v2523_v12  ;;  %v2566_v1 = vpack.c.bf16 %v4836_v5, %v4832_v8 }
 0xd9f   :  { %v2529_v49 = vmul.f32 1.442695, %v2498_v0  ;;  %4325 = vmatprep.subr.bf16.mxu1 %v4659_v42 }
 0xda0   :  { %2551 = vadd.xlane.f32.xlu1 %v4844_v40 }
 0xda1   :  { %4310 = vmatmul.mubr.bf16.vlgmr.msra.gmra.mxu1 %v2564_v32  ;;  %4857 = vpow2.f32 %v2529_v49 }
 0xda2   :  { %v4846_v62 = vpop.eup %4845  ;;  %4313 = vmatprep.mubr.bf16.mxu1 %v2565_v27  ;;  %4326 = vmatpush3.bf16.msra.mxu1 %v4659_v42 }
 0xda3   :  { %v4848_v7 = vpop.eup %4847  ;;  %2559 = vadd.xlane.f32.xlu0 %v4846_v62  ;;  %4327 = vmatprep.subr.bf16.mxu1 %v4660_v23 }
 0xda4   :  { %2547 = vadd.xlane.f32.xlu1 %v4848_v7  ;;  %v4850_v52 = vpop.eup %4849 }
 0xda5   :  { %v4852_v46 = vpop.eup %4851  ;;  %v2567_v47 = vpack.c.bf16 %v4850_v52, %v4848_v7 }
 0xda6   :  { %v2568_v3 = vpack.c.bf16 %v4852_v46, %v4844_v40  ;;  %4328 = vmatpush3.bf16.msra.mxu1 %v4660_v23 }
 0xda7   :  { %2531 = vadd.xlane.f32.xlu0 %v6051_v9  ;;  %4329 = vmatprep.subr.bf16.mxu1 %v4661_v29 }
 0xda8   :  { %2553 = vadd.xlane.f32.xlu1 %v4852_v46  ;;  %v4666_v46 = vld [vmem:[%s6444_s7 + $0x40] sm:$0xff]  }
 0xda9   :  { %4314 = vmatmul.mubr.bf16.gmra.mxu1 %v2566_v1 }
 0xdaa   :  { %4317 = vmatprep.mubr.bf16.mxu1 %v2567_v47  ;;  %v4854_v33 = vpop.eup %4853  ;;  %4330 = vmatpush3.bf16.msra.mxu1 %v4661_v29 }
 0xdab   :  { %2535 = vadd.xlane.f32.xlu0 %v4842_v20  ;;  %v4856_v60 = vpop.eup %4855  ;;  %4331 = vmatprep.subr.bf16.mxu1 %v4662_v59  ;;  %v4665_v20 = vld [vmem:[%s6444_s7 + $0x48] sm:$0xff]  }
 0xdac   :  { %2549 = vadd.xlane.f32.xlu1 %v4850_v52  ;;  %v2569_v37 = vpack.c.bf16 %v4854_v33, %v4856_v60 }
 0xdae   :  { %v4858_v24 = vpop.eup %4857  ;;  %4332 = vmatpush3.bf16.msra.mxu1 %v4662_v59 }
 0xdaf   :  { %v2570_v50 = vpack.c.bf16 %v4858_v24, %v4846_v62  ;;  %4333 = vmatprep.subr.bf16.mxu1 %v4663_v53 }
 0xdb0   :  { %2555 = vadd.xlane.f32.xlu1 %v4856_v60 }
 0xdb1   :  { %4318 = vmatmul.mubr.bf16.gmra.mxu1 %v2568_v3 }
 0xdb2   :  { %4321 = vmatprep.mubr.bf16.mxu1 %v2569_v37  ;;  %4334 = vmatpush3.bf16.msra.mxu1 %v4663_v53 }
 0xdb3   :  { %4335 = vmatprep.subr.bf16.mxu1 %v4664_v25 }
 0xdb4   :  { %2557 = vadd.xlane.f32.xlu1 %v4854_v33 }
 0xdb6   :  { %4336 = vmatpush3.bf16.msra.mxu1 %v4664_v25 }
 0xdb7   :  { %4337 = vmatprep.subr.bf16.mxu1 %v4665_v20 }
 0xdb8   :  { %2561 = vadd.xlane.f32.xlu1 %v4858_v24 }
 0xdb9   :  { %4322 = vmatmul.mubr.bf16.gmra.mxu1 %v2570_v50 }
 0xdba   :  { %4338 = vmatpush3.bf16.msra.mxu1 %v4665_v20 }
 0xdbb   :  { %4339 = vmatprep.subr.bf16.mxu1 %v4666_v46 }
 0xdbc   :  { %2533 = vadd.xlane.f32.xlu1 %v6053_v58 }
 0xdbe   :  { %4340 = vmatpush3.bf16.msra.mxu1 %v4666_v46 }
 0xdc0   :  { %2537 = vadd.xlane.f32.xlu1 %v4840_v34 }
 0xe1c   :  { %v2544_v56 = vpop.xlane.xlu0 %2543 }
 0xe1d   :  { %v2540_v21 = vpop.xlane.xlu1 %2539  ;;  %4859 = vrcp.f32 %v2544_v56 }
 0xe21   :  { %v2546_v51 = vpop.xlane.xlu1 %2545 }
 0xe22   :  { %4861 = vrcp.f32 %v2546_v51 }
 0xe23   :  { %4863 = vrcp.f32 %v2540_v21 }
 0xe25   :  { %v2542_v19 = vpop.xlane.xlu1 %2541 }
 0xe26   :  { %4865 = vrcp.f32 %v2542_v19 }
 0xe29   :  { %v2552_v2 = vpop.xlane.xlu1 %2551 }
 0xe2a   :  { %4867 = vrcp.f32 %v2552_v2  ;;  %v4860_v8 = vpop.eup %4859 }
 0xe2c   :  { %v2560_v63 = vpop.xlane.xlu0 %2559 }
 0xe2d   :  { %v2548_v61 = vpop.xlane.xlu1 %2547 }
 0xe2f   :  { %v4862_v30 = vpop.eup %4861 }
 0xe30   :  { %v4864_v36 = vpop.eup %4863 }
 0xe31   :  { %v2554_v57 = vpop.xlane.xlu1 %2553 }
 0xe32   :  { %4869 = vrcp.f32 %v2554_v57 }
 0xe33   :  { %v4866_v28 = vpop.eup %4865 }
 0xe35   :  { %v2550_v9 = vpop.xlane.xlu1 %2549 }
 0xe36   :  { %4871 = vrcp.f32 %v2550_v9  ;;  %v2532_v9 = vpop.xlane.xlu0 %2531 }
 0xe37   :  { %4873 = vrcp.f32 %v2548_v61  ;;  %v4868_v12 = vpop.eup %4867 }
 0xe38   :  { %4875 = vrcp.f32 %v2560_v63 }
 0xe39   :  { %v2556_v58 = vpop.xlane.xlu1 %2555 }
 0xe3d   :  { %v2558_v17 = vpop.xlane.xlu1 %2557 }
 0xe3f   :  { %v4870_v40 = vpop.eup %4869 }
 0xe41   :  { %v2562_v4 = vpop.xlane.xlu1 %2561 }
 0xe42   :  { %4877 = vrcp.f32 %v2562_v4 }
 0xe43   :  { %4879 = vrcp.f32 %v2556_v58  ;;  %v4872_v62 = vpop.eup %4871  ;;  %v2536_v58 = vpop.xlane.xlu0 %2535 }
 0xe44   :  { %4881 = vrcp.f32 %v2558_v17  ;;  %v4874_v1 = vpop.eup %4873 }
 0xe45   :  { %v4876_v3 = vpop.eup %4875  ;;  %v2534_v56 = vpop.xlane.xlu1 %2533  ;;  %4883 = vrcp.f32 %v2532_v9  ;;  %v4667_v9 = vld [vmem:[%s6446_s11 + $0xf0] ss:$8 sps:$4 sm:$0xff]  }
 0xe46   :  { %4885 = vrcp.f32 %v2536_v58 }
 0xe49   :  { %v2538_v17 = vpop.xlane.xlu1 %2537 }
 0xe4a   :  { %4887 = vrcp.f32 %v2538_v17 }
 0xe4b   :  { %4889 = vrcp.f32 %v2534_v56 }
 0xe4f   :  { %v4878_v24 = vpop.eup %4877 }
 0xe50   :  { %v4880_v42 = vpop.eup %4879 }
 0xe51   :  { %v4882_v21 = vpop.eup %4881 }
 0xe61   :  { %v6079_v6 = vpop.f32.mrf.mxu1 }
 0xe63   :  { %v6081_v35 = vpop.f32.mrf.mxu1 }
 0xe65   :  { %v6083_v38 = vpop.f32.mrf.mxu1 }
 0xe67   :  { %v6085_v10 = vpop.f32.mrf.mxu1 }
 0xe69   :  { %v4315_v11 = vpop.f32.mrf.mxu1 }
 0xe6a   :  { %v2690_v22 = vmul.f32 %v4860_v8, %v4315_v11 }
 0xe6b   :  { %v2621_v26 = vpop.f32.mrf.mxu1 }
 0xe6c   :  { %v2688_v44 = vmul.f32 %v4864_v36, %v2621_v26  ;;  %v4884_v26 = vpop.eup %4883 }
 0xe6d   :  { %v4316_v41 = vpop.f32.mrf.mxu1  ;;  %v4886_v63 = vpop.eup %4885 }
 0xe6e   :  { %v2691_v16 = vmul.f32 %v4862_v30, %v4316_v41  ;;  %v4888_v41 = vpop.eup %4887  ;;  %v2686_v25 = vmul.f32 %v4886_v63, %v6079_v6 }
 0xe6f   :  { %v2624_v5 = vpop.f32.mrf.mxu1 }
 0xe70   :  { %v4515_v14 = vpack.i.bf16 %v2691_v16, %v2690_v22  ;;  %v2689_v54 = vmul.f32 %v4866_v28, %v2624_v5  ;;  %v4890_v5 = vpop.eup %4889 }
 0xe71   :  { %v4319_v34 = vpop.f32.mrf.mxu1 }
 0xe72   :  { %v4520_v31 = vpack.i.bf16 %v2689_v54, %v2688_v44  ;;  %4516 = vrot.lane.b32.xlu1 %v4515_v14, %s4964_s29  ;;  %v2694_v32 = vmul.f32 %v4868_v12, %v4319_v34  ;;  %v2687_v44 = vmul.f32 %v4888_v41, %v6083_v38  ;;  %v2684_v14 = vmul.f32 %v4884_v26, %v6081_v35 }
 0xe73   :  { %v2637_v48 = vpop.f32.mrf.mxu1  ;;  %v2685_v54 = vmul.f32 %v4890_v5, %v6085_v10  ;;  %v4673_v5 = vld [vmem:[%s6446_s11 + $0xd0] ss:$8 sps:$4 sm:$0xff]  }
 0xe74   :  { %4521 = vrot.lane.b32.xlu0 %v4520_v31, %s4964_s29  ;;  %v2692_v33 = vmul.f32 %v4874_v1, %v2637_v48 }
 0xe75   :  { %v4320_v0 = vpop.f32.mrf.mxu1 }
 0xe76   :  { %v2695_v27 = vmul.f32 %v4870_v40, %v4320_v0 }
 0xe77   :  { %v2640_v7 = vpop.f32.mrf.mxu1 }
 0xe78   :  { %v4525_v49 = vpack.i.bf16 %v2695_v27, %v2694_v32  ;;  %v2693_v52 = vmul.f32 %v4872_v62, %v2640_v7 }
 0xe79   :  { %v4323_v47 = vpop.f32.mrf.mxu1 }
 0xe7a   :  { %4526 = vrot.lane.b32.xlu1 %v4525_v49, %s4965_s0  ;;  %v4530_v37 = vpack.i.bf16 %v2693_v52, %v2692_v33  ;;  %v2698_v23 = vmul.f32 %v4876_v3, %v4323_v47 }
 0xe7b   :  { %v2653_v60 = vpop.f32.mrf.mxu1 }
 0xe7c   :  { %v2696_v19 = vmul.f32 %v4880_v42, %v2653_v60 }
 0xe7d   :  { %v4324_v50 = vpop.f32.mrf.mxu1 }
 0xe7e   :  { %v2699_v29 = vmul.f32 %v4878_v24, %v4324_v50  ;;  %4531 = vrot.lane.b32.xlu1 %v4530_v37, %s4965_s0  ;;  %v3877_v37 = vld [vmem:[%s6445_s8 + $0x1] ss:$0 sm:$0xff] }
 0xe7f   :  { %v2656_v51 = vpop.f32.mrf.mxu1 }
 0xe80   :  { %v4540_v2 = vpack.i.bf16 %v2699_v29, %v2698_v23  ;;  %v2697_v61 = vmul.f32 %v4882_v21, %v2656_v51 }
 0xe82   :  { %v4535_v57 = vpack.i.bf16 %v2697_v61, %v2696_v19  ;;  %4541 = vrot.lane.b32.xlu1 %v4540_v2, %s4966_s30 }
 0xe84   :  { %4536 = vrot.lane.b32.xlu0 %v4535_v57, %s4966_s30 }
 0xee4   :  { %v4517_v11 = vpop.permute.xlu1 %4516 }
 0xee5   :  { %v4519_v30 = vunpack.i.h.bf16 %v4517_v11  ;;  %v4518_v4 = vunpack.i.l.bf16 %v4517_v11 }
 0xee6   :  { %v4522_v53 = vpop.permute.xlu0 %4521 }
 0xee7   :  { %v4524_v36 = vunpack.i.h.bf16 %v4522_v53  ;;  %v4523_v22 = vunpack.i.l.bf16 %v4522_v53  ;;  %v2751_v20 = vsel %vm585_vm0, %v2687_v44, %v4519_v30  ;;  %v2750_v12 = vsel %vm585_vm0, %v2686_v25, %v4518_v4  ;;  %v4678_v25 = vld [vmem:[%s6446_s11 + $0xc4] ss:$8 sps:$4 sm:$0xff]   ;;  %v4676_v44 = vld [vmem:[%s6446_s11 + $0xc0] ss:$8 sps:$4 sm:$0xff]  }
 0xee9   :  { %v2748_v32 = vsel %vm585_vm0, %v2684_v14, %v4523_v22  ;;  %v2749_v27 = vsel %vm585_vm0, %v2685_v54, %v4524_v36  ;;  %v4672_v22 = vld [vmem:[%s6446_s11 + $0xe4] ss:$8 sps:$4 sm:$0xff]   ;;  %v4681_v14 = vld [vmem:[%s6446_s11 + $0xb4] ss:$8 sps:$4 sm:$0xff]   ;;  %v4679_v54 = vld [vmem:[%s6446_s11 + $0xb0] ss:$8 sps:$4 sm:$0xff]  }
 0xeec   :  { %v4527_v59 = vpop.permute.xlu1 %4526 }
 0xeed   :  { %v4529_v16 = vunpack.i.h.bf16 %v4527_v59  ;;  %v4528_v28 = vunpack.i.l.bf16 %v4527_v59 }
 0xeef   :  { %v2754_v6 = vsel %vm1032_vm1, %v2750_v12, %v4528_v28  ;;  %v2755_v38 = vsel %vm1032_vm1, %v2751_v20, %v4529_v16  ;;  %v4670_v16 = vld [vmem:[%s6446_s11 + $0xe0] ss:$8 sps:$4 sm:$0xff]   ;;  %v4675_v28 = vld [vmem:[%s6446_s11 + $0xd4] ss:$8 sps:$4 sm:$0xff]   ;;  %v4690_v12 = vld [vmem:[%s6446_s11 + $0x84] ss:$8 sps:$4 sm:$0xff]  }
 0xef0   :  { %v4532_v8 = vpop.permute.xlu1 %4531  ;;  %v4687_v20 = vld [vmem:[%s6446_s11 + $0x94] ss:$8 sps:$4 sm:$0xff]  }
 0xef1   :  { %v4534_v34 = vunpack.i.h.bf16 %v4532_v8  ;;  %v4533_v31 = vunpack.i.l.bf16 %v4532_v8 }
 0xef3   :  { %v2753_v52 = vsel %vm1032_vm1, %v2749_v27, %v4534_v34  ;;  %v2752_v46 = vsel %vm1032_vm1, %v2748_v32, %v4533_v31  ;;  %v4684_v34 = vld [vmem:[%s6446_s11 + $0xa4] ss:$8 sps:$4 sm:$0xff]   ;;  %v4682_v31 = vld [vmem:[%s6446_s11 + $0xa0] ss:$8 sps:$4 sm:$0xff]  }
 0xef4   :  { %v4542_v48 = vpop.permute.xlu1 %4541 }
 0xef5   :  { %v4544_v40 = vunpack.i.h.bf16 %v4542_v48  ;;  %v4543_v0 = vunpack.i.l.bf16 %v4542_v48  ;;  %v4685_v48 = vld [vmem:[%s6446_s11 + $0x90] ss:$8 sps:$4 sm:$0xff]  }
 0xef6   :  { %v4537_v35 = vpop.permute.xlu0 %4536 }
 0xef7   :  { %v2758_v10 = vsel %vm1037_vm2, %v2754_v6, %v4543_v0  ;;  %v2759_v62 = vsel %vm1037_vm2, %v2755_v38, %v4544_v40  ;;  %v4539_v7 = vunpack.i.h.bf16 %v4537_v35  ;;  %v4538_v49 = vunpack.i.l.bf16 %v4537_v35  ;;  %v4688_v40 = vld [vmem:[%s6446_s11 + $0x80] ss:$8 sps:$4 sm:$0xff]  }
 0xef8   :  { %v2761_v1 = vpack.c.bf16 %v2759_v62, %v2758_v10 }
 0xef9   :  { %v2756_v47 = vsel %vm1037_vm2, %v2752_v46, %v4538_v49  ;;  %v2757_v33 = vsel %vm1037_vm2, %v2753_v52, %v4539_v7 }
 0xefa   :  { %v2760_v60 = vpack.c.bf16 %v2757_v33, %v2756_v47  ;;  %v3888_v33 = vld [vmem:[%s6447_s9 + $0x1] ss:$0 sm:$0xff] }
 0xefc   :  { %4341 = vmatprep.mubr.bf16.mxu1 %v2760_v60 }
 0xefd   :  { %4342 = vmatmul.mubr.bf16.vlgmr.msra.gmra.mxu1 %v2761_v1 }
 0xfbd   :  { %v4343_v3 = vpop.f32.mrf.mxu1 }
 0xfbe   :  { %v2878_v23 = vadd.f32 %v4343_v3, %v3877_v37 }
 0xfbf   :  { %v2869_v24 = vpop.f32.mrf.mxu1 }
 0xfc0   :  { %v2870_v50 = vadd.f32 %v3877_v37, %v2869_v24  ;;  %v2886_v19 = vadd.f32 %v2878_v23, %v5847_v43 }
 0xfc1   :  { %v4344_v42 = vpop.f32.mrf.mxu1 }
 0xfc2   :  { %v2884_v29 = vadd.f32 %v2870_v50, %v5838_v13  ;;  %v2881_v2 = vadd.f32 %v4344_v42, %v3877_v37  ;;  %v4669_v13 = vld [vmem:[%s6446_s11 + $0xf4] ss:$8 sps:$4 sm:$0xff]   ;;  %v3889_v50 = vld [vmem:[%s6448_s10 + $0x1] ss:$0 sm:$0xff] }
 0xfc3   :  { %v2872_v21 = vpop.f32.mrf.mxu1  ;;  %3068 = vmatprep.subr.bf16.mxu0 %v4669_v13 }
 0xfc4   :  { %v2873_v51 = vadd.f32 %v3877_v37, %v2872_v21  ;;  %2892 = vadd.xlane.f32.xlu0 %v2884_v29  ;;  %v2887_v57 = vadd.f32 %v2881_v2, %v5849_v55  ;;  %3069 = vmatpush1.bf16.msra.mxu0 %v4667_v9 }
 0xfc5   :  { %3070 = vmatprep.subr.bf16.mxu0 %v4672_v22  ;;  %v3906_v22 = vld [vmem:[%s6450_s12 + $0x2] sm:$0x3] }
 0xfc6   :  { %v2885_v61 = vadd.f32 %v2873_v51, %v5840_v45 }
 0xfc8   :  { %2894 = vadd.xlane.f32.xlu1 %v2885_v61  ;;  %2896 = vadd.xlane.f32.xlu0 %v2886_v19 }
 0xfc9   :  { %3071 = vmatpush1.bf16.msra.mxu0 %v4670_v16  ;;  %v2981_v16 = vrot.slane %v3906_v22, %v5186_v15 }
 0xfca   :  { %3072 = vmatprep.subr.bf16.mxu0 %v4675_v28  ;;  %v2985_v28 = vrot.slane %v3906_v22, %v5193_v18 }
 0xfcc   :  { %2898 = vadd.xlane.f32.xlu0 %v2887_v57 }
 0xfcd   :  { %3073 = vmatpush1.bf16.msra.mxu0 %v4673_v5 }
 0xfce   :  { %3074 = vmatprep.subr.bf16.mxu0 %v4678_v25 }
 0xfd1   :  { %3075 = vmatpush1.bf16.msra.mxu0 %v4676_v44 }
 0xfd2   :  { %3076 = vmatprep.subr.bf16.mxu0 %v4681_v14 }
 0xfd5   :  { %3077 = vmatpush1.bf16.msra.mxu0 %v4679_v54 }
 0xfd6   :  { %3078 = vmatprep.subr.bf16.mxu0 %v4684_v34 }
 0xfd9   :  { %3079 = vmatpush1.bf16.msra.mxu0 %v4682_v31 }
 0xfda   :  { %3080 = vmatprep.subr.bf16.mxu0 %v4687_v20 }
 0xfdd   :  { %3081 = vmatpush1.bf16.msra.mxu0 %v4685_v48 }
 0xfde   :  { %3082 = vmatprep.subr.bf16.mxu0 %v4690_v12 }
 0xfe1   :  { %3083 = vmatpush1.bf16.msra.mxu0 %v4688_v40 }
0x104d   :  { %v2893_v56 = vpop.xlane.xlu0 %2892 }
0x104e   :  { %v2900_v43 = vmul.f32 0.0078125, %v2893_v56 }
0x1050   :  { %v6137_v58 = vsub.f32 %v2884_v29, %v2900_v43  ;;  %v4691_v43 = vld [vmem:[%s6449_s13 + $0xf8] sm:$0xff]  }
0x1051   :  { %v2895_v45 = vpop.xlane.xlu1 %2894  ;;  %v2897_v17 = vpop.xlane.xlu0 %2896  ;;  %4109 = vmatprep.subr.bf16.mxu1 %v4691_v43 }
0x1052   :  { %v2901_v11 = vmul.f32 0.0078125, %v2895_v45  ;;  %v2902_v59 = vmul.f32 0.0078125, %v2897_v17  ;;  %v2908_v55 = vmul.f32 %v6137_v58, %v6137_v58  ;;  %v4694_v45 = vld [vmem:[%s6449_s13 + $0xb0] sm:$0xff]   ;;  %v4695_v17 = vld [vmem:[%s6449_s13 + $0xe8] sm:$0xff]  }
0x1054   :  { %v2905_v53 = vsub.f32 %v2885_v61, %v2901_v11  ;;  %v6141_v26 = vsub.f32 %v2886_v19, %v2902_v59  ;;  %2912 = vadd.xlane.f32.xlu0 %v2908_v55  ;;  %v4696_v11 = vld [vmem:[%s6449_s13 + $0xa8] sm:$0xff]   ;;  %v4697_v59 = vld [vmem:[%s6449_s13 + $0xe0] sm:$0xff]  }
0x1055   :  { %v2899_v8 = vpop.xlane.xlu0 %2898  ;;  %v4698_v55 = vld [vmem:[%s6449_s13 + $0xa0] sm:$0xff]  }
0x1056   :  { %v2903_v63 = vmul.f32 0.0078125, %v2899_v8  ;;  %v2909_v30 = vmul.f32 %v2905_v53, %v2905_v53  ;;  %v2910_v4 = vmul.f32 %v6141_v26, %v6141_v26  ;;  %v4701_v8 = vld [vmem:[%s6449_s13 + $0xd0] sm:$0xff]  }
0x1058   :  { %v2907_v41 = vsub.f32 %v2887_v57, %v2903_v63  ;;  %2914 = vadd.xlane.f32.xlu1 %v2909_v30  ;;  %2916 = vadd.xlane.f32.xlu0 %v2910_v4  ;;  %v4702_v63 = vld [vmem:[%s6449_s13 + $0x90] sm:$0xff]   ;;  %v4703_v30 = vld [vmem:[%s6449_s13 + $0xc8] sm:$0xff]  }
0x1059   :  { %v4704_v4 = vld [vmem:[%s6449_s13 + $0x88] sm:$0xff]  }
0x105a   :  { %v2911_v36 = vmul.f32 %v2907_v41, %v2907_v41 }
0x105c   :  { %2918 = vadd.xlane.f32.xlu1 %v2911_v36  ;;  %v4706_v36 = vld [vmem:[%s6449_s13 + $0x80] sm:$0xff]  }
0x10dd   :  { %v2913_v0 = vpop.xlane.xlu0 %2912 }
0x10de   :  { %v2920_v32 = vmul.f32 0.0078125, %v2913_v0 }
0x10e0   :  { %v2924_v27 = vadd.f32 1e-12, %v2920_v32 }
0x10e1   :  { %v2915_v6 = vpop.xlane.xlu1 %2914  ;;  %v2917_v38 = vpop.xlane.xlu0 %2916 }
0x10e2   :  { %4891 = vrsqrt.f32 %v2924_v27  ;;  %v2921_v35 = vmul.f32 0.0078125, %v2915_v6  ;;  %v2922_v10 = vmul.f32 0.0078125, %v2917_v38 }
0x10e4   :  { %v2925_v62 = vadd.f32 1e-12, %v2921_v35  ;;  %v2926_v7 = vadd.f32 1e-12, %v2922_v10 }
0x10e5   :  { %v2919_v49 = vpop.xlane.xlu1 %2918 }
0x10e6   :  { %4893 = vrsqrt.f32 %v2925_v62  ;;  %v2923_v52 = vmul.f32 0.0078125, %v2919_v49 }
0x10e7   :  { %4895 = vrsqrt.f32 %v2926_v7 }
0x10e8   :  { %v2927_v46 = vadd.f32 1e-12, %v2923_v52 }
0x10ea   :  { %4897 = vrsqrt.f32 %v2927_v46 }
0x10ef   :  { %v4892_v1 = vpop.eup %4891 }
0x10f0   :  { %v2932_v47 = vmul.f32 %v4892_v1, %v6137_v58  ;;  %v4692_v58 = vld [vmem:[%s6449_s13 + $0xb8] sm:$0xff]  }
0x10f1   :  { %4110 = vmatpush3.bf16.msra.mxu1 %v4692_v58 }
0x10f2   :  { %v2942_v37 = vmul.f32 %v3888_v33, %v2932_v47 }
0x10f3   :  { %v4894_v60 = vpop.eup %4893 }
0x10f4   :  { %v2933_v3 = vmul.f32 %v4894_v60, %v2905_v53  ;;  %v4896_v24 = vpop.eup %4895  ;;  %v6194_v29 = vadd.f32 %v3889_v50, %v2942_v37  ;;  %v4699_v53 = vld [vmem:[%s6449_s13 + $0xd8] sm:$0xff]  }
0x10f5   :  { %v2934_v51 = vmul.f32 %v4896_v24, %v6141_v26  ;;  %v4700_v26 = vld [vmem:[%s6449_s13 + $0x98] sm:$0xff]  }
0x10f6   :  { %v2943_v42 = vmul.f32 %v3888_v33, %v2933_v3 }
0x10f7   :  { %v4898_v23 = vpop.eup %4897  ;;  %v2944_v57 = vmul.f32 %v3888_v33, %v2934_v51 }
0x10f8   :  { %v6196_v21 = vadd.f32 %v3889_v50, %v2943_v42  ;;  %v2935_v19 = vmul.f32 %v4898_v23, %v2907_v41  ;;  %v4705_v41 = vld [vmem:[%s6449_s13 + $0xc0] sm:$0xff]  }
0x10f9   :  { %v6204_v13 = vadd.f32 %v3889_v50, %v2944_v57 }
0x10fa   :  { %v2956_v2 = vpack.c.bf16 %v6196_v21, %v6194_v29  ;;  %v2945_v61 = vmul.f32 %v3888_v33, %v2935_v19 }
0x10fc   :  { %3101 = vmatmul.mubr.bf16.vlgmr.msra.gmra.mxu0 %v2956_v2  ;;  %v6202_v9 = vadd.f32 %v3889_v50, %v2945_v61 }
0x10fd   :  { %3110 = vmatprep.mubr.bf16.mxu0 %v4963_v39  ;;  %v4693_v39 = vld [vmem:[%s6449_s13 + $0xf0] sm:$0xff]  }
0x10fe   :  { %v2957_v56 = vpack.c.bf16 %v6202_v9, %v6204_v13  ;;  %4111 = vmatprep.subr.bf16.mxu1 %v4693_v39 }
0x10ff   :  { %4112 = vmatpush3.bf16.msra.mxu1 %v4694_v45 }
0x1100   :  { %4113 = vmatprep.subr.bf16.mxu1 %v4695_v17 }
0x1103   :  { %4114 = vmatpush3.bf16.msra.mxu1 %v4696_v11 }
0x1104   :  { %3111 = vmatmul.mubr.bf16.gmra.mxu0 %v2957_v56  ;;  %4115 = vmatprep.subr.bf16.mxu1 %v4697_v59 }
0x1107   :  { %4116 = vmatpush3.bf16.msra.mxu1 %v4698_v55 }
0x1108   :  { %4117 = vmatprep.subr.bf16.mxu1 %v4699_v53 }
0x110b   :  { %4118 = vmatpush3.bf16.msra.mxu1 %v4700_v26 }
0x110c   :  { %4119 = vmatprep.subr.bf16.mxu1 %v4701_v8 }
0x110f   :  { %4120 = vmatpush3.bf16.msra.mxu1 %v4702_v63 }
0x1110   :  { %4121 = vmatprep.subr.bf16.mxu1 %v4703_v30 }
0x1113   :  { %4122 = vmatpush3.bf16.msra.mxu1 %v4704_v4 }
0x1114   :  { %4123 = vmatprep.subr.bf16.mxu1 %v4705_v41 }
0x1117   :  { %4124 = vmatpush3.bf16.msra.mxu1 %v4706_v36 }
0x11bc   :  { %v3102_v5 = vpop.f32.mrf.mxu0 }
0x11bd   :  { %v6261_v25 = vadd.f32 %v3102_v5, %v2981_v16 }
0x11be   :  { %v3104_v44 = vpop.f32.mrf.mxu0 }
0x11bf   :  { %v6264_v14 = vmul.f32 0.70710677, %v6261_v25  ;;  %v6266_v54 = vadd.f32 %v3104_v44, %v2985_v28 }
0x11c0   :  { %v3106_v34 = vpop.f32.mrf.mxu0 }
0x11c1   :  { %v3137_v31 = vand.u32 2147483647, %v6264_v14  ;;  %v6270_v48 = vmul.f32 0.70710677, %v6266_v54  ;;  %v6272_v20 = vadd.f32 %v3106_v34, %v2981_v16  ;;  %vm3289_vm11 = vcmp.ge.f32.partialorder %v6264_v14, 0.0 }
0x11c2   :  { %v3108_v15 = vpop.f32.mrf.mxu0 }
0x11c3   :  { %v3145_v12 = vmul.f32 0.3275911, %v3137_v31  ;;  %v3138_v18 = vand.u32 2147483647, %v6270_v48  ;;  %v6276_v40 = vmul.f32 0.70710677, %v6272_v20  ;;  %v6278_v0 = vadd.f32 %v3108_v15, %v2985_v28 }
0x11c4   :  { %v3112_v32 = vpop.f32.mrf.mxu0  ;;  %v3241_v3 = vsub.f32 0.0, %v3137_v31  ;;  %vm3290_vm12 = vcmp.ge.f32.partialorder %v6270_v48, 0.0 }
0x11c5   :  { %v3153_v27 = vadd.f32 1.0, %v3145_v12  ;;  %v3146_v6 = vmul.f32 0.3275911, %v3138_v18  ;;  %v3139_v38 = vand.u32 2147483647, %v6276_v40  ;;  %v6285_v46 = vadd.f32 %v3112_v32, %v2981_v16 }
0x11c6   :  { %v6282_v35 = vmul.f32 0.70710677, %v6278_v0  ;;  %v3114_v10 = vpop.f32.mrf.mxu0  ;;  %v3242_v23 = vsub.f32 0.0, %v3138_v18  ;;  %v3249_v61 = vmul.f32 %v3241_v3, %v3137_v31  ;;  %vm3291_vm13 = vcmp.ge.f32.partialorder %v6276_v40, 0.0 }
0x11c7   :  { %4899 = vrcp.f32 %v3153_v27  ;;  %v3154_v62 = vadd.f32 1.0, %v3146_v6  ;;  %v3147_v7 = vmul.f32 0.3275911, %v3139_v38  ;;  %v6287_v1 = vadd.f32 %v3114_v10, %v2985_v28 }
0x11c8   :  { %v3140_v49 = vand.u32 2147483647, %v6282_v35  ;;  %v3116_v52 = vpop.f32.mrf.mxu0  ;;  %v6290_v60 = vmul.f32 0.70710677, %v6285_v46  ;;  %v3250_v58 = vmul.f32 %v3242_v23, %v3138_v18  ;;  %v3243_v39 = vsub.f32 0.0, %v3139_v38 }
0x11c9   :  { %4901 = vrcp.f32 %v3154_v62  ;;  %v3155_v47 = vadd.f32 1.0, %v3147_v7  ;;  %v6294_v42 = vmul.f32 0.70710677, %v6287_v1  ;;  %v6296_v51 = vadd.f32 %v3116_v52, %v2981_v16 }
0x11ca   :  { %v3148_v33 = vmul.f32 0.3275911, %v3140_v49  ;;  %v3118_v24 = vpop.f32.mrf.mxu0  ;;  %v3141_v50 = vand.u32 2147483647, %v6290_v60  ;;  %v3257_v55 = vmul.f32 1.442695, %v3249_v61  ;;  %v3251_v41 = vmul.f32 %v3243_v39, %v3139_v38 }
0x11cb   :  { %4903 = vrcp.f32 %v3155_v47  ;;  %v6298_v2 = vadd.f32 %v3118_v24, %v2985_v28  ;;  %v3142_v57 = vand.u32 2147483647, %v6294_v42  ;;  %v6302_v56 = vmul.f32 0.70710677, %v6296_v51 }
0x11cc   :  { %v3156_v37 = vadd.f32 1.0, %v3148_v33  ;;  %v3149_v19 = vmul.f32 0.3275911, %v3141_v50  ;;  %v3244_v53 = vsub.f32 0.0, %v3140_v49  ;;  %v3259_v4 = vmul.f32 1.442695, %v3250_v58 }
0x11cd   :  { %v3150_v45 = vmul.f32 0.3275911, %v3142_v57  ;;  %v3143_v17 = vand.u32 2147483647, %v6302_v56  ;;  %v6306_v11 = vmul.f32 0.70710677, %v6298_v2 }
0x11ce   :  { %4905 = vrcp.f32 %v3156_v37  ;;  %v3157_v43 = vadd.f32 1.0, %v3149_v19  ;;  %v3245_v28 = vsub.f32 0.0, %v3141_v50  ;;  %v3252_v34 = vmul.f32 %v3244_v53, %v3140_v49 }
0x11cf   :  { %v3158_v26 = vadd.f32 1.0, %v3150_v45  ;;  %v3151_v8 = vmul.f32 0.3275911, %v3143_v17  ;;  %v6312_v30 = vand.u32 2147483647, %v6306_v11  ;;  %v3246_v12 = vsub.f32 0.0, %v3142_v57 }
0x11d0   :  { %4907 = vrcp.f32 %v3157_v43  ;;  %v3261_v6 = vmul.f32 1.442695, %v3251_v41  ;;  %v3253_v10 = vmul.f32 %v3245_v28, %v3141_v50  ;;  %v3263_v52 = vmul.f32 1.442695, %v3252_v34 }
0x11d1   :  { %4909 = vrcp.f32 %v3158_v26  ;;  %v3159_v36 = vadd.f32 1.0, %v3151_v8  ;;  %v3152_v5 = vmul.f32 0.3275911, %v6312_v30  ;;  %v3247_v47 = vsub.f32 0.0, %v3143_v17 }
0x11d2   :  { %4911 = vpow2.f32 %v3257_v55  ;;  %v3254_v37 = vmul.f32 %v3246_v12, %v3142_v57  ;;  %v3265_v50 = vmul.f32 1.442695, %v3253_v10  ;;  %v3123_v40 = vmul.f32 0.5, %v6272_v20 }
0x11d3   :  { %4913 = vrcp.f32 %v3159_v36  ;;  %v3160_v18 = vadd.f32 1.0, %v3152_v5  ;;  %v3255_v45 = vmul.f32 %v3247_v47, %v3143_v17  ;;  %vm3292_vm14 = vcmp.ge.f32.partialorder %v6282_v35, 0.0 }
0x11d4   :  { %v6308_v59 = vpop.eup %4899  ;;  %4915 = vpow2.f32 %v3259_v4  ;;  %v3267_v26 = vmul.f32 1.442695, %v3254_v37  ;;  %v3248_v4 = vsub.f32 0.0, %v6312_v30  ;;  %vm3294_vm15 = vcmp.ge.f32.partialorder %v6294_v42, 0.0 }
0x11d5   :  { %v3169_v63 = vmul.f32 1.0614054, %v6308_v59  ;;  %4917 = vrcp.f32 %v3160_v18  ;;  %v3269_v34 = vmul.f32 1.442695, %v3255_v45  ;;  %vm3295_vm0 = vcmp.ge.f32.partialorder %v6302_v56, 0.0 }
0x11d6   :  { %v6314_v22 = vpop.eup %4901  ;;  %4919 = vpow2.f32 %v3261_v6  ;;  %vm3293_vm1 = vcmp.ge.f32.partialorder %v6290_v60, 0.0  ;;  %vm3296_vm2 = vcmp.ge.f32.partialorder %v6306_v11, 0.0  ;;  %v3128_v42 = vmul.f32 0.5, %v6298_v2 }
0x11d7   :  { %v3177_v16 = vadd.f32 -1.4531521, %v3169_v63  ;;  %v3170_v44 = vmul.f32 1.0614054, %v6314_v22  ;;  %4921 = vpow2.f32 %v3263_v52  ;;  %v3125_v60 = vmul.f32 0.5, %v6285_v46 }
0x11d8   :  { %v6318_v31 = vpop.eup %4903  ;;  %4923 = vpow2.f32 %v3265_v50 }
0x11d9   :  { %v3185_v15 = vmul.f32 %v6308_v59, %v3177_v16  ;;  %v3178_v32 = vadd.f32 -1.4531521, %v3170_v44  ;;  %v3171_v27 = vmul.f32 1.0614054, %v6318_v31  ;;  %4925 = vpow2.f32 %v3267_v26 }
0x11da   :  { %4927 = vpow2.f32 %v3269_v34 }
0x11db   :  { %v3193_v38 = vadd.f32 1.4214138, %v3185_v15  ;;  %v6322_v62 = vpop.eup %4905  ;;  %v3186_v7 = vmul.f32 %v6314_v22, %v3178_v32  ;;  %v3179_v49 = vadd.f32 -1.4531521, %v3171_v27 }
0x11dc   :  { %v3172_v3 = vmul.f32 1.0614054, %v6322_v62 }
0x11dd   :  { %v3201_v33 = vmul.f32 %v6308_v59, %v3193_v38  ;;  %v3194_v24 = vadd.f32 1.4214138, %v3186_v7  ;;  %v3187_v23 = vmul.f32 %v6318_v31, %v3179_v49  ;;  %v6328_v43 = vpop.eup %4907  ;;  %v3256_v7 = vmul.f32 %v3248_v4, %v6312_v30 }
0x11de   :  { %v3180_v61 = vadd.f32 -1.4531521, %v3172_v3  ;;  %v3173_v57 = vmul.f32 1.0614054, %v6328_v43  ;;  %v6336_v41 = vpop.eup %4909 }
0x11df   :  { %v3209_v19 = vadd.f32 -0.28449672, %v3201_v33  ;;  %v3202_v58 = vmul.f32 %v6314_v22, %v3194_v24  ;;  %v3195_v39 = vadd.f32 1.4214138, %v3187_v23  ;;  %v3174_v44 = vmul.f32 1.0614054, %v6336_v41  ;;  %v4912_v15 = vpop.eup %4911 }
0x11e0   :  { %v3188_v53 = vmul.f32 %v6322_v62, %v3180_v61  ;;  %v3181_v28 = vadd.f32 -1.4531521, %v3173_v57  ;;  %v6343_v27 = vpop.eup %4913 }
0x11e1   :  { %v3217_v55 = vmul.f32 %v6308_v59, %v3209_v19  ;;  %v3210_v8 = vadd.f32 -0.28449672, %v3202_v58  ;;  %v3203_v63 = vmul.f32 %v6318_v31, %v3195_v39  ;;  %v3182_v10 = vadd.f32 -1.4531521, %v3174_v44  ;;  %v4916_v49 = vpop.eup %4915 }
0x11e2   :  { %v3196_v16 = vadd.f32 1.4214138, %v3188_v53  ;;  %v3189_v32 = vmul.f32 %v6328_v43, %v3181_v28  ;;  %v3175_v3 = vmul.f32 1.0614054, %v6343_v27 }
0x11e3   :  { %v3225_v36 = vadd.f32 0.2548296, %v3217_v55  ;;  %v3218_v17 = vmul.f32 %v6314_v22, %v3210_v8  ;;  %v3211_v5 = vadd.f32 -0.28449672, %v3203_v63  ;;  %v3190_v23 = vmul.f32 %v6336_v41, %v3182_v10 }
0x11e4   :  { %v3204_v18 = vmul.f32 %v6322_v62, %v3196_v16  ;;  %v3197_v33 = vadd.f32 1.4214138, %v3189_v32  ;;  %v3183_v50 = vadd.f32 -1.4531521, %v3175_v3  ;;  %v3271_v8 = vmul.f32 1.442695, %v3256_v7 }
0x11e5   :  { %v3233_v12 = vmul.f32 %v6308_v59, %v3225_v36  ;;  %v3226_v6 = vadd.f32 0.2548296, %v3218_v17  ;;  %v3219_v38 = vmul.f32 %v6318_v31, %v3211_v5  ;;  %v6348_v59 = vpop.eup %4917  ;;  %v3198_v45 = vadd.f32 1.4214138, %v3190_v23 }
0x11e6   :  { %v3212_v47 = vadd.f32 -0.28449672, %v3204_v18  ;;  %v3205_v30 = vmul.f32 %v6328_v43, %v3197_v33  ;;  %v3176_v55 = vmul.f32 1.0614054, %v6348_v59  ;;  %v4920_v53 = vpop.eup %4919  ;;  %4929 = vpow2.f32 %v3271_v8 }
0x11e7   :  { %v3273_v52 = vmul.f32 %v4912_v15, %v3233_v12  ;;  %v3234_v37 = vmul.f32 %v6314_v22, %v3226_v6  ;;  %v3227_v24 = vadd.f32 0.2548296, %v3219_v38  ;;  %v3191_v22 = vmul.f32 %v6343_v27, %v3183_v50  ;;  %v4922_v28 = vpop.eup %4921 }
0x11e8   :  { %v3220_v61 = vmul.f32 %v6322_v62, %v3212_v47  ;;  %v3213_v26 = vadd.f32 -0.28449672, %v3205_v30  ;;  %v3206_v36 = vmul.f32 %v6336_v41, %v3198_v45  ;;  %v3184_v16 = vadd.f32 -1.4531521, %v3176_v55  ;;  %v4924_v10 = vpop.eup %4923 }
0x11e9   :  { %v3281_v19 = vsub.f32 1.0, %v3273_v52  ;;  %v3274_v58 = vmul.f32 %v4916_v49, %v3234_v37  ;;  %v3235_v39 = vmul.f32 %v6318_v31, %v3227_v24  ;;  %v3199_v44 = vadd.f32 1.4214138, %v3191_v22  ;;  %v4926_v3 = vpop.eup %4925 }
0x11ea   :  { %v3228_v57 = vadd.f32 0.2548296, %v3220_v61  ;;  %v3221_v31 = vmul.f32 %v6328_v43, %v3213_v26  ;;  %v3214_v12 = vadd.f32 -0.28449672, %v3206_v36  ;;  %v3192_v38 = vmul.f32 %v6348_v59, %v3184_v16 }
0x11eb   :  { %v3282_v63 = vsub.f32 1.0, %v3274_v58  ;;  %v3275_v4 = vmul.f32 %v4920_v53, %v3235_v39  ;;  %v3297_v17 = vsub.f32 0.0, %v3281_v19  ;;  %v3207_v6 = vmul.f32 %v6343_v27, %v3199_v44  ;;  %v4928_v39 = vpop.eup %4927 }
0x11ec   :  { %v3236_v5 = vmul.f32 %v6322_v62, %v3228_v57  ;;  %v3229_v32 = vadd.f32 0.2548296, %v3221_v31  ;;  %v3222_v62 = vmul.f32 %v6336_v41, %v3214_v12  ;;  %v3200_v61 = vadd.f32 1.4214138, %v3192_v38 }
0x11ed   :  { %v3298_v34 = vsub.f32 0.0, %v3282_v63  ;;  %v3283_v15 = vsub.f32 1.0, %v3275_v4  ;;  %v3305_v49 = vsel %vm3289_vm11, %v3281_v19, %v3297_v17  ;;  %v3215_v33 = vadd.f32 -0.28449672, %v3207_v6 }
0x11ee   :  { %v3276_v18 = vmul.f32 %v4922_v28, %v3236_v5  ;;  %v3237_v47 = vmul.f32 %v6328_v43, %v3229_v32  ;;  %v3230_v23 = vadd.f32 0.2548296, %v3222_v62  ;;  %v3124_v50 = vmul.f32 0.5, %v6278_v0 }
0x11ef   :  { %v3299_v7 = vsub.f32 0.0, %v3283_v15  ;;  %v3306_v37 = vsel %vm3290_vm12, %v3282_v63, %v3298_v34  ;;  %v3223_v43 = vmul.f32 %v6343_v27, %v3215_v33  ;;  %v3208_v19 = vmul.f32 %v6348_v59, %v3200_v61 }
0x11f0   :  { %v3284_v52 = vsub.f32 1.0, %v3276_v18  ;;  %v3238_v14 = vmul.f32 %v6336_v41, %v3230_v23  ;;  %v3313_v48 = vadd.f32 1.0, %v3305_v49  ;;  %v3314_v45 = vadd.f32 1.0, %v3306_v37 }
0x11f1   :  { %v3307_v24 = vsel %vm3291_vm13, %v3283_v15, %v3299_v7  ;;  %v3277_v53 = vmul.f32 %v4924_v10, %v3237_v47  ;;  %v3231_v20 = vadd.f32 0.2548296, %v3223_v43  ;;  %v3216_v22 = vadd.f32 -0.28449672, %v3208_v19 }
0x11f2   :  { %v3315_v30 = vadd.f32 1.0, %v3307_v24  ;;  %v3300_v58 = vsub.f32 0.0, %v3284_v52  ;;  %v3278_v26 = vmul.f32 %v4926_v3, %v3238_v14  ;;  %v3121_v0 = vmul.f32 0.5, %v6261_v25 }
0x11f3   :  { %v3122_v8 = vmul.f32 0.5, %v6266_v54  ;;  %v3239_v4 = vmul.f32 %v6343_v27, %v3231_v20  ;;  %v3224_v36 = vmul.f32 %v6348_v59, %v3216_v22  ;;  %v3285_v28 = vsub.f32 1.0, %v3277_v53  ;;  %v4930_v18 = vpop.eup %4929 }
0x11f4   :  { %v3308_v55 = vsel %vm3292_vm14, %v3284_v52, %v3300_v58  ;;  %v3323_v35 = vmul.f32 %v3315_v30, %v3123_v40  ;;  %v3286_v41 = vsub.f32 1.0, %v3278_v26  ;;  %v3321_v17 = vmul.f32 %v3313_v48, %v3121_v0 }
0x11f5   :  { %v3316_v57 = vadd.f32 1.0, %v3308_v55  ;;  %v3322_v16 = vmul.f32 %v3314_v45, %v3122_v8  ;;  %v3279_v5 = vmul.f32 %v4928_v39, %v3239_v4  ;;  %v3232_v31 = vadd.f32 0.2548296, %v3224_v36 }
0x11f6   :  { %v3329_v34 = vpack.c.bf16 %v3323_v35, %v3321_v17  ;;  %v3302_v15 = vsub.f32 0.0, %v3286_v41  ;;  %v3301_v54 = vsub.f32 0.0, %v3285_v28  ;;  %v3127_v47 = vmul.f32 0.5, %v6296_v51  ;;  %v3956_v51 = vld [vmem:[%s6451_s14 + $0x1] ss:$0 sm:$0xff] }
0x11f7   :  { %v3324_v63 = vmul.f32 %v3316_v57, %v3124_v50  ;;  %v3287_v12 = vsub.f32 1.0, %v3279_v5  ;;  %v3240_v25 = vmul.f32 %v6348_v59, %v3232_v31  ;;  %v3126_v3 = vmul.f32 0.5, %v6287_v1  ;;  %v3592_v5 = vld [vmem:[%s6454_s1 + $0x8] sm:$0xff]  ;;  %v3593_v31 = vld [vmem:[%s6454_s1 + $0x10] sm:$0xff] }
0x11f8   :  { %v3310_v27 = vsel %vm3294_vm15, %v3286_v41, %v3302_v15  ;;  %v3309_v7 = vsel %vm3293_vm1, %v3285_v28, %v3301_v54 }
0x11f9   :  { %v3330_v44 = vpack.c.bf16 %v3324_v63, %v3322_v16  ;;  %v3303_v32 = vsub.f32 0.0, %v3287_v12  ;;  %v3280_v6 = vmul.f32 %v4930_v18, %v3240_v25  ;;  %v3318_v52 = vadd.f32 1.0, %v3310_v27 }
0x11fa   :  { %v3317_v59 = vadd.f32 1.0, %v3309_v7  ;;  %v3635_v25 = vsel %vm3607_vm3, %v3592_v5, 0.0 }
0x11fb   :  { %3502 = vmatprep.mubr.bf16.mxu1 %v3330_v44  ;;  %v3311_v38 = vsel %vm3295_vm0, %v3287_v12, %v3303_v32  ;;  %v3288_v10 = vsub.f32 1.0, %v3280_v6  ;;  %v3326_v24 = vmul.f32 %v3318_v52, %v3126_v3  ;;  %v3594_v44 = vld [vmem:[%s6454_s1 + $0x18] sm:$0xff]  ;;  %v3636_v18 = vrot.slane %v3635_v25, 4 }
0x11fc   :  { %3503 = vmatmul.mubr.bf16.vlgmr.msra.gmra.mxu1 %v3329_v34  ;;  %v3319_v62 = vadd.f32 1.0, %v3311_v38  ;;  %v3325_v61 = vmul.f32 %v3317_v59, %v3125_v60  ;;  %v3591_v34 = vld [vmem:[%s6454_s1] sm:$0xff]  ;;  %v3662_v32 = vsel %vm3607_vm3, %v3593_v31, 0.0 }
0x11fd   :  { %v3304_v49 = vsub.f32 0.0, %v3288_v10  ;;  %v3608_v15 = vsel %vm3607_vm3, %v3591_v34, 0.0  ;;  %v3637_v6 = vadd.f32 %v3636_v18, %v3635_v25  ;;  %v3663_v27 = vrot.slane %v3662_v32, 4 }
0x11fe   :  { %v3327_v37 = vmul.f32 %v3319_v62, %v3127_v47  ;;  %v3609_v12 = vrot.slane %v3608_v15, 4 }
0x11ff   :  { %v3312_v33 = vsel %vm3296_vm2, %v3288_v10, %v3304_v49  ;;  %v3689_v10 = vsel %vm3607_vm3, %v3594_v44, 0.0  ;;  %v3638_v7 = vrot.slane %v3637_v6, 2  ;;  %v3664_v62 = vadd.f32 %v3663_v27, %v3662_v32 }
0x1200   :  { %v3320_v56 = vadd.f32 1.0, %v3312_v33  ;;  %v3331_v30 = vpack.c.bf16 %v3327_v37, %v3325_v61  ;;  %v3610_v54 = vadd.f32 %v3609_v12, %v3608_v15  ;;  %v3690_v49 = vrot.slane %v3689_v10, 4 }
0x1201   :  { %v3639_v47 = vadd.f32 %v3638_v7, %v3637_v6  ;;  %v3665_v33 = vrot.slane %v3664_v62, 2 }
0x1202   :  { %v3328_v23 = vmul.f32 %v3320_v56, %v3128_v42  ;;  %v3611_v38 = vrot.slane %v3610_v54, 2  ;;  %v3691_v3 = vadd.f32 %v3690_v49, %v3689_v10 }
0x1203   :  { %v3640_v60 = vrot.slane %v3639_v47, 1  ;;  %v3666_v37 = vadd.f32 %v3665_v33, %v3664_v62 }
0x1204   :  { %v3332_v40 = vpack.c.bf16 %v3328_v23, %v3326_v24  ;;  %v3612_v52 = vadd.f32 %v3611_v38, %v3610_v54  ;;  %v3692_v24 = vrot.slane %v3691_v3, 2  ;;  %v3976_v54 = vld [vmem:[%s6453_s16 + $0x1] ss:$0 sm:$0xff] }
0x1206   :  { %3510 = vmatprep.mubr.bf16.mxu1 %v3332_v40  ;;  %v3613_v42 = vrot.slane %v3612_v52, 1  ;;  %v3641_v40 = vadd.f32 %v3640_v60, %v3639_v47 }
0x1207   :  { %3511 = vmatmul.mubr.bf16.gmra.mxu1 %v3331_v30  ;;  %v3667_v30 = vrot.slane %v3666_v37, 1 }
0x1208   :  { %v3614_v23 = vadd.f32 %v3613_v42, %v3612_v52 }
0x12bc   :  { %v4125_v11 = vpop.f32.mrf.mxu1 }
0x12be   :  { %v4126_v50 = vpop.f32.mrf.mxu1 }
0x12bf   :  { %v4127_v1 = vadd.f32 %v4126_v50, %v4125_v11  ;;  %v3693_v11 = vadd.f32 %v3692_v24, %v3691_v3 }
0x12c0   :  { %v4128_v58 = vpop.f32.mrf.mxu1 }
0x12c1   :  { %v3505_v2 = vadd.f32 %v4127_v1, %v3956_v51  ;;  %v3642_v1 = vmax.f32 %v3641_v40, 1e-09 }
0x12c2   :  { %v4129_v14 = vpop.f32.mrf.mxu1 }
0x12c3   :  { %v4130_v43 = vadd.f32 %v4129_v14, %v4128_v58  ;;  %v3519_v46 = vadd.f32 %v3505_v2, %v6194_v29  ;;  %v3668_v58 = vadd.f32 %v3667_v30, %v3666_v37  ;;  %v3694_v2 = vrot.slane %v3693_v11, 1 }
0x12c5   :  { %v3508_v19 = vadd.f32 %v4130_v43, %v3956_v51  ;;  %3527 = vadd.xlane.f32.xlu0 %v3519_v46  ;;  %v3669_v14 = vmax.f32 %v3668_v58, 1e-09  ;;  %v3695_v43 = vadd.f32 %v3694_v2, %v3693_v11 }
0x12c7   :  { %v3520_v39 = vadd.f32 %v3508_v19, %v6196_v21  ;;  %v4131_v48 = vpop.f32.mrf.mxu1 }
0x12c9   :  { %3529 = vadd.xlane.f32.xlu1 %v3520_v39  ;;  %v4132_v45 = vpop.f32.mrf.mxu1 }
0x12ca   :  { %v4133_v55 = vadd.f32 %v4132_v45, %v4131_v48 }
0x12cb   :  { %v4134_v53 = vpop.f32.mrf.mxu1 }
0x12cc   :  { %v3513_v57 = vadd.f32 %v4133_v55, %v3956_v51 }
0x12cd   :  { %v4135_v26 = vpop.f32.mrf.mxu1 }
0x12ce   :  { %v4136_v20 = vadd.f32 %v4135_v26, %v4134_v53  ;;  %v3521_v22 = vadd.f32 %v3513_v57, %v6204_v13 }
0x12d0   :  { %v3516_v0 = vadd.f32 %v4136_v20, %v3956_v51  ;;  %3531 = vadd.xlane.f32.xlu0 %v3521_v22  ;;  %v3615_v51 = vmax.f32 %v3614_v23, 1e-09 }
0x12d2   :  { %v3522_v8 = vadd.f32 %v3516_v0, %v6202_v9  ;;  %4931 = vrcp.f32 %v3615_v51 }
0x12d3   :  { %4933 = vrcp.f32 %v3642_v1 }
0x12d4   :  { %3533 = vadd.xlane.f32.xlu1 %v3522_v8  ;;  %4935 = vrcp.f32 %v3669_v14 }
0x12df   :  { %v4932_v19 = vpop.eup %4931 }
0x134e   :  { %v3528_v29 = vpop.xlane.xlu0 %3527 }
0x134f   :  { %v3535_v35 = vmul.f32 0.0078125, %v3528_v29 }
0x1351   :  { %v6397_v63 = vsub.f32 %v3519_v46, %v3535_v35  ;;  %v3696_v46 = vmax.f32 %v3695_v43, 1e-09 }
0x1352   :  { %v3530_v21 = vpop.xlane.xlu1 %3529 }
0x1353   :  { %v3536_v41 = vmul.f32 0.0078125, %v3530_v21  ;;  %v3543_v4 = vmul.f32 %v6397_v63, %v6397_v63  ;;  %4937 = vrcp.f32 %v3696_v46 }
0x1355   :  { %v6401_v36 = vsub.f32 %v3520_v39, %v3536_v41  ;;  %3547 = vadd.xlane.f32.xlu0 %v3543_v4  ;;  %v4934_v39 = vpop.eup %4933 }
0x1356   :  { %v4936_v48 = vpop.eup %4935 }
0x1357   :  { %v3544_v13 = vmul.f32 %v6401_v36, %v6401_v36 }
0x1359   :  { %3549 = vadd.xlane.f32.xlu1 %v3544_v13  ;;  %v3532_v16 = vpop.xlane.xlu0 %3531 }
0x135a   :  { %v3537_v28 = vmul.f32 0.0078125, %v3532_v16 }
0x135c   :  { %v6405_v9 = vsub.f32 %v3521_v22, %v3537_v28 }
0x135d   :  { %v3534_v59 = vpop.xlane.xlu1 %3533 }
0x135e   :  { %v3545_v17 = vmul.f32 %v6405_v9, %v6405_v9  ;;  %v3538_v56 = vmul.f32 0.0078125, %v3534_v59 }
0x1360   :  { %3551 = vadd.xlane.f32.xlu0 %v3545_v17  ;;  %v6421_v61 = vsub.f32 %v3522_v8, %v3538_v56  ;;  %v4938_v45 = vpop.eup %4937 }
0x1362   :  { %v3546_v50 = vmul.f32 %v6421_v61, %v6421_v61 }
0x136a   :  { %3625 = vperm.xlu1 %4546, %v3592_v5  }
0x136e   :  { %3652 = vperm.xlu1 %4546, %v3593_v31   ;;  %v3975_v31 = vld [vmem:[%s6452_s15 + $0x1] ss:$0 sm:$0xff] }
0x1372   :  { %3679 = vperm.xlu1 %4546, %v3594_v44  }
0x1376   :  { %3597 = vperm.xlu0 %4545, %v3591_v34  }
0x1396   :  { %3553 = vadd.xlane.f32.xlu1 %v3546_v50 }
0x13a7   :  { %3619 = vperm.xlu1 %4546, %v4932_v19  }
0x13ab   :  { %3646 = vperm.xlu1 %4546, %v4934_v39  }
0x13af   :  { %3673 = vperm.xlu1 %4546, %v4936_v48  }
0x13b3   :  { %3700 = vperm.xlu1 %4546, %v4938_v45  }
0x13de   :  { %v3548_v55 = vpop.xlane.xlu0 %3547 }
0x13df   :  { %v3555_v22 = vmul.f32 0.0078125, %v3548_v55 }
0x13e1   :  { %v3559_v29 = vadd.f32 1e-12, %v3555_v22 }
0x13e2   :  { %v3550_v53 = vpop.xlane.xlu1 %3549 }
0x13e3   :  { %v3556_v26 = vmul.f32 0.0078125, %v3550_v53 }
0x13e5   :  { %v3560_v0 = vadd.f32 1e-12, %v3556_v26 }
0x13e6   :  { %v3626_v35 = vpop.permute.xlu1 %3625 }
0x13e7   :  { %4939 = vrsqrt.f32 %v3560_v0 }
0x13e9   :  { %v3552_v57 = vpop.xlane.xlu0 %3551 }
0x13ea   :  { %v3557_v20 = vmul.f32 0.0078125, %v3552_v57  ;;  %v3653_v21 = vpop.permute.xlu1 %3652 }
0x13ec   :  { %v3561_v8 = vadd.f32 1e-12, %v3557_v20 }
0x13ee   :  { %4941 = vrsqrt.f32 %v3561_v8  ;;  %v3680_v16 = vpop.permute.xlu1 %3679 }
0x13ef   :  { %4943 = vrsqrt.f32 %v3559_v29 }
0x13f1   :  { %v3598_v6 = vpop.permute.xlu0 %3597 }
0x13f4   :  { %v4940_v41 = vpop.eup %4939 }
0x13f5   :  { %v3568_v28 = vmul.f32 %v4940_v41, %v6401_v36 }
0x13f7   :  { %v3578_v34 = vmul.f32 %v3975_v31, %v3568_v28 }
0x13f9   :  { %v3588_v32 = vadd.f32 %v3976_v54, %v3578_v34 }
0x13fb   :  { %v4942_v4 = vpop.eup %4941 }
0x13fc   :  { %v4944_v13 = vpop.eup %4943  ;;  %v3569_v17 = vmul.f32 %v4942_v4, %v6405_v9 }
0x13fd   :  { %v3567_v5 = vmul.f32 %v4944_v13, %v6397_v63  ;;  %v3628_v63 = vmul.f32 %v3626_v35, %v3588_v32 }
0x13fe   :  { %v3579_v12 = vmul.f32 %v3975_v31, %v3569_v17 }
0x13ff   :  { %v3577_v25 = vmul.f32 %v3975_v31, %v3567_v5  ;;  %v3629_v10 = vrot.slane %v3628_v63, 4 }
0x1400   :  { %v3589_v36 = vadd.f32 %v3976_v54, %v3579_v12 }
0x1401   :  { %v3587_v9 = vadd.f32 %v3976_v54, %v3577_v25  ;;  %v3630_v49 = vadd.f32 %v3629_v10, %v3628_v63 }
0x1402   :  { %v3655_v27 = vmul.f32 %v3653_v21, %v3589_v36 }
0x1403   :  { %v3600_v38 = vmul.f32 %v3598_v6, %v3587_v9  ;;  %v3631_v42 = vrot.slane %v3630_v49, 2 }
0x1404   :  { %v3656_v7 = vrot.slane %v3655_v27, 4 }
0x1405   :  { %v3601_v62 = vrot.slane %v3600_v38, 4  ;;  %v3632_v23 = vadd.f32 %v3631_v42, %v3630_v49 }
0x1406   :  { %v3657_v59 = vadd.f32 %v3656_v7, %v3655_v27 }
0x1407   :  { %v3602_v47 = vadd.f32 %v3601_v62, %v3600_v38  ;;  %v3633_v1 = vrot.slane %v3632_v23, 1 }
0x1408   :  { %v3658_v60 = vrot.slane %v3657_v59, 2 }
0x1409   :  { %v3603_v37 = vrot.slane %v3602_v47, 2  ;;  %v3634_v19 = vadd.f32 %v3633_v1, %v3632_v23 }
0x140a   :  { %v3659_v11 = vadd.f32 %v3658_v60, %v3657_v59 }
0x140b   :  { %v3604_v51 = vadd.f32 %v3603_v37, %v3602_v47 }
0x140c   :  { %v3660_v2 = vrot.slane %v3659_v11, 1 }
0x140d   :  { %v3605_v14 = vrot.slane %v3604_v51, 1 }
0x140e   :  { %v3661_v39 = vadd.f32 %v3660_v2, %v3659_v11 }
0x140f   :  { %v3606_v48 = vadd.f32 %v3605_v14, %v3604_v51 }
0x141f   :  { %v3554_v44 = vpop.xlane.xlu1 %3553 }
0x1420   :  { %v3558_v15 = vmul.f32 0.0078125, %v3554_v44 }
0x1422   :  { %v3562_v18 = vadd.f32 1e-12, %v3558_v15 }
0x1423   :  { %v3620_v3 = vpop.permute.xlu1 %3619 }
0x1424   :  { %4945 = vrsqrt.f32 %v3562_v18  ;;  %v3622_v57 = vmul.f32 %v3620_v3, %v3606_v48 }
0x1427   :  { %v3647_v30 = vpop.permute.xlu1 %3646 }
0x1428   :  { %v3649_v45 = vmul.f32 %v3647_v30, %v3634_v19 }
0x142a   :  { %v3705_v22 = vsel %vm3704_vm4, %v3622_v57, %v3649_v45 }
0x142b   :  { %v3674_v46 = vpop.permute.xlu1 %3673 }
0x142c   :  { %v3676_v53 = vmul.f32 %v3674_v46, %v3661_v39 }
0x142e   :  { %v3707_v8 = vsel %vm3706_vm5, %v3705_v22, %v3676_v53 }
0x142f   :  { %v3701_v20 = vpop.permute.xlu1 %3700 }
0x1431   :  { %v4946_v52 = vpop.eup %4945 }
0x1432   :  { %v3570_v33 = vmul.f32 %v4946_v52, %v6421_v61 }
0x1434   :  { %v3580_v56 = vmul.f32 %v3975_v31, %v3570_v33 }
0x1436   :  { %v3590_v24 = vadd.f32 %v3976_v54, %v3580_v56 }
0x1438   :  { %v3682_v40 = vmul.f32 %v3680_v16, %v3590_v24 }
0x143a   :  { %v3683_v50 = vrot.slane %v3682_v40, 4 }
0x143c   :  { %v3684_v58 = vadd.f32 %v3683_v50, %v3682_v40 }
0x143e   :  { %v3685_v43 = vrot.slane %v3684_v58, 2 }
0x1440   :  { %v3686_v61 = vadd.f32 %v3685_v43, %v3684_v58 }
0x1442   :  { %v3687_v55 = vrot.slane %v3686_v61, 1 }
0x1444   :  { %v3688_v26 = vadd.f32 %v3687_v55, %v3686_v61 }
0x1446   :  { %v3703_v0 = vmul.f32 %v3701_v20, %v3688_v26 }
0x1448   :  { %v3709_v29 = vsel %vm3708_vm6, %v3707_v8, %v3703_v0 }
0x1449   :  { %3710 = vst [vmem:[%s6455_s17] sm:$0xf] %v3709_v29 }

</bundles_post_ra>
